<compile_context>
chip_gen: v7x
topology: tpu7x:2x2x1
jax: 0.10.0
libtpu: 0.0.40
codegen_flags: <defaults>
</compile_context>

<pallas_src>
import functools

import jax
import jax.numpy as jnp
from jax.experimental import pallas as pl
from jax.experimental.pallas import tpu as pltpu


# -----------------------------------------------------------------------------
# Fused encoder kernel
# -----------------------------------------------------------------------------
def encoder_stack_kernel(x_ref, w_ih_ref, w_hh_ref, b_ref,
                         w1_ref, b1_ref, w2_ref, b2_ref,
                         out_ref, y_ref,
                         act_a, act_b, gx_ref):
    """Fused bidirectional LSTM stack + FC heads.

    x_ref   : (T*Bp, 2H) bf16  layer-0 input (embedding, zero-padded to 2H / Bp)
    w_ih_ref: (L, 2H, 8H) bf16 fused input->gate weights, cols [0:4H] fwd, [4H:8H] bwd
    w_hh_ref: (L, 2, H, 4H) bf16 recurrent weights per direction
    b_ref   : (L, 1, 8H) f32   combined biases (b_ih + b_hh), [fwd | bwd]
    w1_ref  : (4H, 2H) bf16    block-diag [fc_hidden.w1 ; fc_cell.w1]
    b1_ref  : (1, 2H)  f32
    w2_ref  : (2H, 2H) bf16    block-diag [fc_hidden.w2 ; fc_cell.w2]
    b2_ref  : (1, 2H)  f32
    out_ref : (T*Bp, 2H) f32   encoder_states (flattened time-major)
    y_ref   : (Bp, 2H)  f32    [fc_hidden(out) | fc_cell(out)]
    act_a/b : (T*Bp, 2H) bf16  ping-pong inter-layer activation scratch
    gx_ref  : (T*Bp, 8H) f32   hoisted input-projection gate scratch

    PyTorch gate order [i, f, g, o]; c' = f*c + i*g; h' = o*tanh(c').
    """
    num_layers = w_ih_ref.shape[0]
    H = w_hh_ref.shape[2]
    Bp = y_ref.shape[0]
    TB = x_ref.shape[0]
    T = TB // Bp
    G = 4 * H

    def lstm_cell(g, c):
        # Slice first, activate second: sigmoid on [i|f] (2H), tanh on g (H),
        # sigmoid on o (H) -> ~half the EUP elements of full-tile activation.
        s_if = jax.nn.sigmoid(g[:, 0:2 * H])
        g_t = jnp.tanh(g[:, 2 * H:3 * H])
        o = jax.nn.sigmoid(g[:, 3 * H:4 * H])
        c_new = s_if[:, H:2 * H] * c + s_if[:, 0:H] * g_t
        h_new = o * jnp.tanh(c_new)
        return h_new, c_new

    layer_bufs = [act_a, act_b]
    hf = cf = hb = cb = None

    for layer in range(num_layers):
        src = x_ref if layer == 0 else layer_bufs[(layer - 1) % 2]
        dst = out_ref if layer == num_layers - 1 else layer_bufs[layer % 2]

        # ---- (1) input projection for the whole sequence, both directions,
        #          hoisted out of the recurrence; bias folded in here.
        x_all = src[...].astype(jnp.bfloat16)                       # (T*Bp, 2H)
        gx_ref[...] = (jnp.dot(x_all, w_ih_ref[layer],
                               preferred_element_type=jnp.float32)  # (T*Bp, 8H)
                       + b_ref[layer])

        w_hh_f = w_hh_ref[layer, 0]                                 # (H, 4H) bf16
        w_hh_b = w_hh_ref[layer, 1]

        hf = jnp.zeros((Bp, H), jnp.float32)
        cf = jnp.zeros((Bp, H), jnp.float32)
        hb = jnp.zeros((Bp, H), jnp.float32)
        cb = jnp.zeros((Bp, H), jnp.float32)

        # ---- (2) recurrence: fully unrolled, only h @ W_hh on the serial path.
        for t in range(T):
            rf = t * Bp                  # forward-direction row block (time t)
            rb = (T - 1 - t) * Bp        # backward-direction row block

            g_f = gx_ref[rf:rf + Bp, 0:G] + jnp.dot(
                hf.astype(jnp.bfloat16), w_hh_f,
                preferred_element_type=jnp.float32)                 # (Bp, 4H)
            g_b = gx_ref[rb:rb + Bp, G:2 * G] + jnp.dot(
                hb.astype(jnp.bfloat16), w_hh_b,
                preferred_element_type=jnp.float32)                 # (Bp, 4H)

            hf, cf = lstm_cell(g_f, cf)
            hb, cb = lstm_cell(g_b, cb)

            dst[rf:rf + Bp, 0:H] = hf.astype(dst.dtype)      # fwd half at time t
            dst[rb:rb + Bp, H:2 * H] = hb.astype(dst.dtype)  # bwd half at time T-1-t

    # ---- (3) fused fc_hidden / fc_cell heads (block-diagonal weights) --------
    # hidden_cat = [hf | hb], cell_cat = [cf | cb]  (final states of last layer)
    x_mlp = jnp.concatenate([hf, hb, cf, cb], axis=1).astype(jnp.bfloat16)
    hid = jnp.dot(x_mlp, w1_ref[...],
                  preferred_element_type=jnp.float32) + b1_ref[...]
    hid = jnp.maximum(hid, 0.0)                                     # ReLU
    # Dropout in the Sequential heads: eval-mode identity.
    y_ref[...] = jnp.dot(hid.astype(jnp.bfloat16), w2_ref[...],
                         preferred_element_type=jnp.float32) + b2_ref[...]


# -----------------------------------------------------------------------------
# pallas_call wrapper
# -----------------------------------------------------------------------------
_VMEM = pl.BlockSpec(memory_space=pltpu.MemorySpace.VMEM)


def run_encoder_stack(x_flat, w_ih, w_hh, b, w1, b1, w2, b2, *, batch_pad):
    TB, H2 = x_flat.shape            # (T*Bp, 2H)
    out_shape = (
        jax.ShapeDtypeStruct((TB, H2), jnp.float32),         # encoder states
        jax.ShapeDtypeStruct((batch_pad, H2), jnp.float32),  # [hidden | cell]
    )
    return pl.pallas_call(
        encoder_stack_kernel,
        out_shape=out_shape,
        in_specs=[_VMEM] * 8,
        out_specs=(_VMEM, _VMEM),
        scratch_shapes=[
            pltpu.VMEM((TB, H2), jnp.bfloat16),      # ping activation buffer
            pltpu.VMEM((TB, H2), jnp.bfloat16),      # pong activation buffer
            pltpu.VMEM((TB, 4 * H2), jnp.float32),   # hoisted gate projections
        ],
    )(x_flat, w_ih, w_hh, b, w1, b1, w2, b2)


# -----------------------------------------------------------------------------
# Parameter init (PyTorch shapes, stored pre-transposed for x @ W)
# -----------------------------------------------------------------------------
def init_params(key, vocab, emb, hidden, num_layers):
    params = {}
    k = 1.0 / jnp.sqrt(jnp.float32(hidden))

    def uni(key, shape):
        return jax.random.uniform(key, shape, jnp.float32, -k, k)

    keys = jax.random.split(key, 2 + num_layers * 8 + 8)
    it = iter(keys)

    params["embedding"] = jax.random.normal(next(it), (vocab, emb), jnp.float32) * 0.1

    lstm = []
    for layer in range(num_layers):
        in_dim = emb if layer == 0 else 2 * hidden
        layer_p = {}
        for tag in ("f", "b"):  # forward / backward direction
            layer_p["w_ih_" + tag] = uni(next(it), (in_dim, 4 * hidden))
            layer_p["w_hh_" + tag] = uni(next(it), (hidden, 4 * hidden))
            b_ih = uni(next(it), (1, 4 * hidden))
            b_hh = uni(next(it), (1, 4 * hidden))
            layer_p["b_" + tag] = b_ih + b_hh
        lstm.append(layer_p)
    params["lstm"] = lstm

    for name in ("fc_hidden", "fc_cell"):
        params[name] = {
            "w1": uni(next(it), (2 * hidden, hidden)),
            "b1": uni(next(it), (1, hidden)),
            "w2": uni(next(it), (hidden, hidden)),
            "b2": uni(next(it), (1, hidden)),
        }
    return params


# -----------------------------------------------------------------------------
# Encoder forward: embedding + padding + weight packing in JAX, rest in Pallas
# -----------------------------------------------------------------------------
def encoder_forward(tokens, params, num_layers):
    # tokens: (T, B) int32 — PyTorch nn.LSTM convention (seq_len, batch)
    T, B = tokens.shape
    emb_tbl = params["embedding"]
    E = emb_tbl.shape[1]
    H = params["fc_hidden"]["w2"].shape[1]
    Bp = ((B + 7) // 8) * 8          # pad batch to the 8-sublane granule
    assert E <= 2 * H, "layer-0 input is zero-padded to width 2H"

    emb = jnp.take(emb_tbl, tokens, axis=0)                   # (T, B, E)
    # nn.Dropout on the embedding: eval mode -> identity
    x = jnp.pad(emb, ((0, 0), (0, Bp - B), (0, 2 * H - E)))   # (T, Bp, 2H)
    x = x.reshape(T * Bp, 2 * H).astype(jnp.bfloat16)         # bf16 MXU operand

    # ---- pack weights into the fused layouts the kernel expects -------------
    L = num_layers
    w_ih = jnp.zeros((L, 2 * H, 8 * H), jnp.float32)
    for l in range(L):
        lw = params["lstm"][l]
        in_dim = lw["w_ih_f"].shape[0]
        w_ih = w_ih.at[l, :in_dim, :4 * H].set(lw["w_ih_f"])
        w_ih = w_ih.at[l, :in_dim, 4 * H:].set(lw["w_ih_b"])
    w_hh = jnp.stack([jnp.stack([params["lstm"][l]["w_hh_f"],
                                 params["lstm"][l]["w_hh_b"]]) for l in range(L)])
    b = jnp.stack([jnp.concatenate([params["lstm"][l]["b_f"],
                                    params["lstm"][l]["b_b"]], axis=1)
                   for l in range(L)])

    fh, fc = params["fc_hidden"], params["fc_cell"]
    w1 = jnp.zeros((4 * H, 2 * H), jnp.float32)
    w1 = w1.at[:2 * H, :H].set(fh["w1"]).at[2 * H:, H:].set(fc["w1"])
    b1 = jnp.concatenate([fh["b1"], fc["b1"]], axis=1)
    w2 = jnp.zeros((2 * H, 2 * H), jnp.float32)
    w2 = w2.at[:H, :H].set(fh["w2"]).at[H:, H:].set(fc["w2"])
    b2 = jnp.concatenate([fh["b2"], fc["b2"]], axis=1)

    out_flat, y = run_encoder_stack(
        x,
        w_ih.astype(jnp.bfloat16), w_hh.astype(jnp.bfloat16), b,
        w1.astype(jnp.bfloat16), b1, w2.astype(jnp.bfloat16), b2,
        batch_pad=Bp)

    encoder_states = out_flat.reshape(T, Bp, 2 * H)[:, :B, :]        # (T, B, 2H)
    hidden = jnp.broadcast_to(y[:B, :H][None], (num_layers, B, H))
    cell = jnp.broadcast_to(y[:B, H:][None], (num_layers, B, H))
    return encoder_states, hidden, cell


# -----------------------------------------------------------------------------
# Main
# -----------------------------------------------------------------------------
if __name__ == "__main__":
    VOCAB = 50
    EMB = 32
    HIDDEN = 32
    NUM_LAYERS = 3
    SEQ = 8
    BATCH = 2

    key = jax.random.PRNGKey(0)
    k_param, k_tok = jax.random.split(key)

    params = init_params(k_param, VOCAB, EMB, HIDDEN, NUM_LAYERS)
    tokens = jax.random.randint(k_tok, (SEQ, BATCH), 0, VOCAB, dtype=jnp.int32)

    fwd = jax.jit(functools.partial(encoder_forward, num_layers=NUM_LAYERS))
    encoder_states, hidden, cell = fwd(tokens, params)

    jax.block_until_ready((encoder_states, hidden, cell))

    assert encoder_states.shape == (SEQ, BATCH, 2 * HIDDEN)
    assert hidden.shape == (NUM_LAYERS, BATCH, HIDDEN)
    assert cell.shape == (NUM_LAYERS, BATCH, HIDDEN)
    assert bool(jnp.all(jnp.isfinite(encoder_states)))
    assert bool(jnp.all(jnp.isfinite(hidden)))
    assert bool(jnp.all(jnp.isfinite(cell)))

    print("KERNEL_OK")
</pallas_src>

<mosaic_0001>
module attributes {stable_mosaic.version = 11 : i64} {
  func.func @encoder_stack_kernel(%arg0: memref<64x64xbf16, #tpu.memory_space<vmem>>, %arg1: memref<3x64x256xbf16, #tpu.memory_space<vmem>>, %arg2: memref<3x2x32x128xbf16, #tpu.memory_space<vmem>>, %arg3: memref<3x1x256xf32, #tpu.memory_space<vmem>>, %arg4: memref<128x64xbf16, #tpu.memory_space<vmem>>, %arg5: memref<1x64xf32, #tpu.memory_space<vmem>>, %arg6: memref<64x64xbf16, #tpu.memory_space<vmem>>, %arg7: memref<1x64xf32, #tpu.memory_space<vmem>>, %arg8: memref<64x64xf32, #tpu.memory_space<vmem>>, %arg9: memref<8x64xf32, #tpu.memory_space<vmem>>, %arg10: memref<64x64xbf16, #tpu.memory_space<vmem>>, %arg11: memref<64x64xbf16, #tpu.memory_space<vmem>>, %arg12: memref<64x256xf32, #tpu.memory_space<vmem>>) attributes {dimension_semantics = [], scalar_prefetch = 0 : i64, scratch_operands = 3 : i64, tpu.core_type = #tpu.core_type<tc>} {
    %c0 = arith.constant 0 : index
    %c0_0 = arith.constant 0 : index
    %0 = vector.load %arg0[%c0, %c0_0] : memref<64x64xbf16, #tpu.memory_space<vmem>>, vector<64x64xbf16>
    %c0_1 = arith.constant 0 : index
    %c0_2 = arith.constant 0 : index
    %c0_3 = arith.constant 0 : index
    %1 = vector.load %arg1[%c0_1, %c0_2, %c0_3] : memref<3x64x256xbf16, #tpu.memory_space<vmem>>, vector<1x64x256xbf16>
    %2 = vector.shape_cast %1 : vector<1x64x256xbf16> to vector<64x256xbf16>
    %cst = arith.constant dense<0.000000e+00> : vector<64x256xf32>
    %3 = tpu.matmul %0, %2, %cst {dimension_numbers = #tpu.dot_dimension_numbers<[1], [0], [0], [1], [0, 0, 1, 1], [], []>} : vector<64x64xbf16>, vector<64x256xbf16>, vector<64x256xf32> -> vector<64x256xf32>
    %c0_4 = arith.constant 0 : index
    %c0_5 = arith.constant 0 : index
    %c0_6 = arith.constant 0 : index
    %4 = vector.load %arg3[%c0_4, %c0_5, %c0_6] : memref<3x1x256xf32, #tpu.memory_space<vmem>>, vector<1x1x256xf32>
    %5 = vector.shape_cast %4 : vector<1x1x256xf32> to vector<1x256xf32>
    %6 = vector.broadcast %5 : vector<1x256xf32> to vector<64x256xf32>
    %7 = arith.addf %3, %6 : vector<64x256xf32>
    %c0_7 = arith.constant 0 : index
    %c0_8 = arith.constant 0 : index
    %8 = vector.load %arg12[%c0_7, %c0_8] : memref<64x256xf32, #tpu.memory_space<vmem>>, vector<64x256xf32>
    tpu.vector_store %arg12[%c0_7, %c0_8], %7 {strides = array<i32>} : memref<64x256xf32, #tpu.memory_space<vmem>>, vector<64x256xf32>,
    %c0_9 = arith.constant 0 : index
    %c0_10 = arith.constant 0 : index
    %c0_11 = arith.constant 0 : index
    %c0_12 = arith.constant 0 : index
    %9 = vector.load %arg2[%c0_9, %c0_10, %c0_11, %c0_12] : memref<3x2x32x128xbf16, #tpu.memory_space<vmem>>, vector<1x1x32x128xbf16>
    %10 = vector.shape_cast %9 : vector<1x1x32x128xbf16> to vector<32x128xbf16>
    %c0_13 = arith.constant 0 : index
    %c1 = arith.constant 1 : index
    %c0_14 = arith.constant 0 : index
    %c0_15 = arith.constant 0 : index
    %11 = vector.load %arg2[%c0_13, %c1, %c0_14, %c0_15] : memref<3x2x32x128xbf16, #tpu.memory_space<vmem>>, vector<1x1x32x128xbf16>
    %12 = vector.shape_cast %11 : vector<1x1x32x128xbf16> to vector<32x128xbf16>
    %cst_16 = arith.constant 0.000000e+00 : f32
    %13 = vector.broadcast %cst_16 : f32 to vector<8x32xf32>
    %cst_17 = arith.constant 0.000000e+00 : f32
    %14 = vector.broadcast %cst_17 : f32 to vector<8x32xf32>
    %cst_18 = arith.constant 0.000000e+00 : f32
    %15 = vector.broadcast %cst_18 : f32 to vector<8x32xf32>
    %cst_19 = arith.constant 0.000000e+00 : f32
    %16 = vector.broadcast %cst_19 : f32 to vector<8x32xf32>
    %c0_20 = arith.constant 0 : index
    %c0_21 = arith.constant 0 : index
    %17 = vector.load %arg12[%c0_20, %c0_21] : memref<64x256xf32, #tpu.memory_space<vmem>>, vector<8x128xf32>
    %18 = arith.truncf %13 : vector<8x32xf32> to vector<8x32xbf16>
    %cst_22 = arith.constant dense<0.000000e+00> : vector<8x128xf32>
    %19 = tpu.matmul %18, %10, %cst_22 {dimension_numbers = #tpu.dot_dimension_numbers<[1], [0], [0], [1], [0, 0, 1, 1], [], []>} : vector<8x32xbf16>, vector<32x128xbf16>, vector<8x128xf32> -> vector<8x128xf32>
    %20 = arith.addf %17, %19 : vector<8x128xf32>
    %c56 = arith.constant 56 : index
    %c128 = arith.constant 128 : index
    %21 = vector.load %arg12[%c56, %c128] : memref<64x256xf32, #tpu.memory_space<vmem>>, vector<8x128xf32>
    %22 = arith.truncf %15 : vector<8x32xf32> to vector<8x32xbf16>
    %cst_23 = arith.constant dense<0.000000e+00> : vector<8x128xf32>
    %23 = tpu.matmul %22, %12, %cst_23 {dimension_numbers = #tpu.dot_dimension_numbers<[1], [0], [0], [1], [0, 0, 1, 1], [], []>} : vector<8x32xbf16>, vector<32x128xbf16>, vector<8x128xf32> -> vector<8x128xf32>
    %24 = arith.addf %21, %23 : vector<8x128xf32>
    %25 = vector.extract_strided_slice %20 {offsets = [0, 0], sizes = [8, 64], strides = [1, 1]} : vector<8x128xf32> to vector<8x64xf32>
    %26 = arith.negf %25 : vector<8x64xf32>
    %27 = math.exp %26 : vector<8x64xf32>
    %cst_24 = arith.constant 1.000000e+00 : f32
    %28 = vector.broadcast %cst_24 : f32 to vector<8x64xf32>
    %29 = arith.addf %28, %27 : vector<8x64xf32>
    %30 = arith.divf %28, %29 : vector<8x64xf32>
    %31 = vector.extract_strided_slice %20 {offsets = [0, 64], sizes = [8, 32], strides = [1, 1]} : vector<8x128xf32> to vector<8x32xf32>
    %32 = math.tanh %31 : vector<8x32xf32>
    %33 = vector.extract_strided_slice %20 {offsets = [0, 96], sizes = [8, 32], strides = [1, 1]} : vector<8x128xf32> to vector<8x32xf32>
    %34 = arith.negf %33 : vector<8x32xf32>
    %35 = math.exp %34 : vector<8x32xf32>
    %cst_25 = arith.constant 1.000000e+00 : f32
    %36 = vector.broadcast %cst_25 : f32 to vector<8x32xf32>
    %37 = arith.addf %36, %35 : vector<8x32xf32>
    %38 = arith.divf %36, %37 : vector<8x32xf32>
    %39 = vector.extract_strided_slice %30 {offsets = [0, 32], sizes = [8, 32], strides = [1, 1]} : vector<8x64xf32> to vector<8x32xf32>
    %40 = arith.mulf %39, %14 : vector<8x32xf32>
    %41 = vector.extract_strided_slice %30 {offsets = [0, 0], sizes = [8, 32], strides = [1, 1]} : vector<8x64xf32> to vector<8x32xf32>
    %42 = arith.mulf %41, %32 : vector<8x32xf32>
    %43 = arith.addf %40, %42 : vector<8x32xf32>
    %44 = math.tanh %43 : vector<8x32xf32>
    %45 = arith.mulf %38, %44 : vector<8x32xf32>
    %46 = vector.extract_strided_slice %24 {offsets = [0, 0], sizes = [8, 64], strides = [1, 1]} : vector<8x128xf32> to vector<8x64xf32>
    %47 = arith.negf %46 : vector<8x64xf32>
    %48 = math.exp %47 : vector<8x64xf32>
    %cst_26 = arith.constant 1.000000e+00 : f32
    %49 = vector.broadcast %cst_26 : f32 to vector<8x64xf32>
    %50 = arith.addf %49, %48 : vector<8x64xf32>
    %51 = arith.divf %49, %50 : vector<8x64xf32>
    %52 = vector.extract_strided_slice %24 {offsets = [0, 64], sizes = [8, 32], strides = [1, 1]} : vector<8x128xf32> to vector<8x32xf32>
    %53 = math.tanh %52 : vector<8x32xf32>
    %54 = vector.extract_strided_slice %24 {offsets = [0, 96], sizes = [8, 32], strides = [1, 1]} : vector<8x128xf32> to vector<8x32xf32>
    %55 = arith.negf %54 : vector<8x32xf32>
    %56 = math.exp %55 : vector<8x32xf32>
    %cst_27 = arith.constant 1.000000e+00 : f32
    %57 = vector.broadcast %cst_27 : f32 to vector<8x32xf32>
    %58 = arith.addf %57, %56 : vector<8x32xf32>
    %59 = arith.divf %57, %58 : vector<8x32xf32>
    %60 = vector.extract_strided_slice %51 {offsets = [0, 32], sizes = [8, 32], strides = [1, 1]} : vector<8x64xf32> to vector<8x32xf32>
    %61 = arith.mulf %60, %16 : vector<8x32xf32>
    %62 = vector.extract_strided_slice %51 {offsets = [0, 0], sizes = [8, 32], strides = [1, 1]} : vector<8x64xf32> to vector<8x32xf32>
    %63 = arith.mulf %62, %53 : vector<8x32xf32>
    %64 = arith.addf %61, %63 : vector<8x32xf32>
    %65 = math.tanh %64 : vector<8x32xf32>
    %66 = arith.mulf %59, %65 : vector<8x32xf32>
    %67 = arith.truncf %45 : vector<8x32xf32> to vector<8x32xbf16>
    %c0_28 = arith.constant 0 : index
    %c0_29 = arith.constant 0 : index
    %68 = vector.load %arg10[%c0_28, %c0_29] : memref<64x64xbf16, #tpu.memory_space<vmem>>, vector<8x32xbf16>
    tpu.vector_store %arg10[%c0_28, %c0_29], %67 {strides = array<i32>} : memref<64x64xbf16, #tpu.memory_space<vmem>>, vector<8x32xbf16>,
    %69 = arith.truncf %66 : vector<8x32xf32> to vector<8x32xbf16>
    %c56_30 = arith.constant 56 : index
    %c32 = arith.constant 32 : index
    %70 = vector.load %arg10[%c56_30, %c32] : memref<64x64xbf16, #tpu.memory_space<vmem>>, vector<8x32xbf16>
    tpu.vector_store %arg10[%c56_30, %c32], %69 {strides = array<i32>} : memref<64x64xbf16, #tpu.memory_space<vmem>>, vector<8x32xbf16>,
    %c8 = arith.constant 8 : index
    %c0_31 = arith.constant 0 : index
    %71 = vector.load %arg12[%c8, %c0_31] : memref<64x256xf32, #tpu.memory_space<vmem>>, vector<8x128xf32>
    %72 = arith.truncf %45 : vector<8x32xf32> to vector<8x32xbf16>
    %cst_32 = arith.constant dense<0.000000e+00> : vector<8x128xf32>
    %73 = tpu.matmul %72, %10, %cst_32 {dimension_numbers = #tpu.dot_dimension_numbers<[1], [0], [0], [1], [0, 0, 1, 1], [], []>} : vector<8x32xbf16>, vector<32x128xbf16>, vector<8x128xf32> -> vector<8x128xf32>
    %74 = arith.addf %71, %73 : vector<8x128xf32>
    %c48 = arith.constant 48 : index
    %c128_33 = arith.constant 128 : index
    %75 = vector.load %arg12[%c48, %c128_33] : memref<64x256xf32, #tpu.memory_space<vmem>>, vector<8x128xf32>
    %76 = arith.truncf %66 : vector<8x32xf32> to vector<8x32xbf16>
    %cst_34 = arith.constant dense<0.000000e+00> : vector<8x128xf32>
    %77 = tpu.matmul %76, %12, %cst_34 {dimension_numbers = #tpu.dot_dimension_numbers<[1], [0], [0], [1], [0, 0, 1, 1], [], []>} : vector<8x32xbf16>, vector<32x128xbf16>, vector<8x128xf32> -> vector<8x128xf32>
    %78 = arith.addf %75, %77 : vector<8x128xf32>
    %79 = vector.extract_strided_slice %74 {offsets = [0, 0], sizes = [8, 64], strides = [1, 1]} : vector<8x128xf32> to vector<8x64xf32>
    %80 = arith.negf %79 : vector<8x64xf32>
    %81 = math.exp %80 : vector<8x64xf32>
    %cst_35 = arith.constant 1.000000e+00 : f32
    %82 = vector.broadcast %cst_35 : f32 to vector<8x64xf32>
    %83 = arith.addf %82, %81 : vector<8x64xf32>
    %84 = arith.divf %82, %83 : vector<8x64xf32>
    %85 = vector.extract_strided_slice %74 {offsets = [0, 64], sizes = [8, 32], strides = [1, 1]} : vector<8x128xf32> to vector<8x32xf32>
    %86 = math.tanh %85 : vector<8x32xf32>
    %87 = vector.extract_strided_slice %74 {offsets = [0, 96], sizes = [8, 32], strides = [1, 1]} : vector<8x128xf32> to vector<8x32xf32>
    %88 = arith.negf %87 : vector<8x32xf32>
    %89 = math.exp %88 : vector<8x32xf32>
    %cst_36 = arith.constant 1.000000e+00 : f32
    %90 = vector.broadcast %cst_36 : f32 to vector<8x32xf32>
    %91 = arith.addf %90, %89 : vector<8x32xf32>
    %92 = arith.divf %90, %91 : vector<8x32xf32>
    %93 = vector.extract_strided_slice %84 {offsets = [0, 32], sizes = [8, 32], strides = [1, 1]} : vector<8x64xf32> to vector<8x32xf32>
    %94 = arith.mulf %93, %43 : vector<8x32xf32>
    %95 = vector.extract_strided_slice %84 {offsets = [0, 0], sizes = [8, 32], strides = [1, 1]} : vector<8x64xf32> to vector<8x32xf32>
    %96 = arith.mulf %95, %86 : vector<8x32xf32>
    %97 = arith.addf %94, %96 : vector<8x32xf32>
    %98 = math.tanh %97 : vector<8x32xf32>
    %99 = arith.mulf %92, %98 : vector<8x32xf32>
    %100 = vector.extract_strided_slice %78 {offsets = [0, 0], sizes = [8, 64], strides = [1, 1]} : vector<8x128xf32> to vector<8x64xf32>
    %101 = arith.negf %100 : vector<8x64xf32>
    %102 = math.exp %101 : vector<8x64xf32>
    %cst_37 = arith.constant 1.000000e+00 : f32
    %103 = vector.broadcast %cst_37 : f32 to vector<8x64xf32>
    %104 = arith.addf %103, %102 : vector<8x64xf32>
    %105 = arith.divf %103, %104 : vector<8x64xf32>
    %106 = vector.extract_strided_slice %78 {offsets = [0, 64], sizes = [8, 32], strides = [1, 1]} : vector<8x128xf32> to vector<8x32xf32>
    %107 = math.tanh %106 : vector<8x32xf32>
    %108 = vector.extract_strided_slice %78 {offsets = [0, 96], sizes = [8, 32], strides = [1, 1]} : vector<8x128xf32> to vector<8x32xf32>
    %109 = arith.negf %108 : vector<8x32xf32>
    %110 = math.exp %109 : vector<8x32xf32>
    %cst_38 = arith.constant 1.000000e+00 : f32
    %111 = vector.broadcast %cst_38 : f32 to vector<8x32xf32>
    %112 = arith.addf %111, %110 : vector<8x32xf32>
    %113 = arith.divf %111, %112 : vector<8x32xf32>
    %114 = vector.extract_strided_slice %105 {offsets = [0, 32], sizes = [8, 32], strides = [1, 1]} : vector<8x64xf32> to vector<8x32xf32>
    %115 = arith.mulf %114, %64 : vector<8x32xf32>
    %116 = vector.extract_strided_slice %105 {offsets = [0, 0], sizes = [8, 32], strides = [1, 1]} : vector<8x64xf32> to vector<8x32xf32>
    %117 = arith.mulf %116, %107 : vector<8x32xf32>
    %118 = arith.addf %115, %117 : vector<8x32xf32>
    %119 = math.tanh %118 : vector<8x32xf32>
    %120 = arith.mulf %113, %119 : vector<8x32xf32>
    %121 = arith.truncf %99 : vector<8x32xf32> to vector<8x32xbf16>
    %c8_39 = arith.constant 8 : index
    %c0_40 = arith.constant 0 : index
    %122 = vector.load %arg10[%c8_39, %c0_40] : memref<64x64xbf16, #tpu.memory_space<vmem>>, vector<8x32xbf16>
    tpu.vector_store %arg10[%c8_39, %c0_40], %121 {strides = array<i32>} : memref<64x64xbf16, #tpu.memory_space<vmem>>, vector<8x32xbf16>,
    %123 = arith.truncf %120 : vector<8x32xf32> to vector<8x32xbf16>
    %c48_41 = arith.constant 48 : index
    %c32_42 = arith.constant 32 : index
    %124 = vector.load %arg10[%c48_41, %c32_42] : memref<64x64xbf16, #tpu.memory_space<vmem>>, vector<8x32xbf16>
    tpu.vector_store %arg10[%c48_41, %c32_42], %123 {strides = array<i32>} : memref<64x64xbf16, #tpu.memory_space<vmem>>, vector<8x32xbf16>,
    %c16 = arith.constant 16 : index
    %c0_43 = arith.constant 0 : index
    %125 = vector.load %arg12[%c16, %c0_43] : memref<64x256xf32, #tpu.memory_space<vmem>>, vector<8x128xf32>
    %126 = arith.truncf %99 : vector<8x32xf32> to vector<8x32xbf16>
    %cst_44 = arith.constant dense<0.000000e+00> : vector<8x128xf32>
    %127 = tpu.matmul %126, %10, %cst_44 {dimension_numbers = #tpu.dot_dimension_numbers<[1], [0], [0], [1], [0, 0, 1, 1], [], []>} : vector<8x32xbf16>, vector<32x128xbf16>, vector<8x128xf32> -> vector<8x128xf32>
    %128 = arith.addf %125, %127 : vector<8x128xf32>
    %c40 = arith.constant 40 : index
    %c128_45 = arith.constant 128 : index
    %129 = vector.load %arg12[%c40, %c128_45] : memref<64x256xf32, #tpu.memory_space<vmem>>, vector<8x128xf32>
    %130 = arith.truncf %120 : vector<8x32xf32> to vector<8x32xbf16>
    %cst_46 = arith.constant dense<0.000000e+00> : vector<8x128xf32>
    %131 = tpu.matmul %130, %12, %cst_46 {dimension_numbers = #tpu.dot_dimension_numbers<[1], [0], [0], [1], [0, 0, 1, 1], [], []>} : vector<8x32xbf16>, vector<32x128xbf16>, vector<8x128xf32> -> vector<8x128xf32>
    %132 = arith.addf %129, %131 : vector<8x128xf32>
    %133 = vector.extract_strided_slice %128 {offsets = [0, 0], sizes = [8, 64], strides = [1, 1]} : vector<8x128xf32> to vector<8x64xf32>
    %134 = arith.negf %133 : vector<8x64xf32>
    %135 = math.exp %134 : vector<8x64xf32>
    %cst_47 = arith.constant 1.000000e+00 : f32
    %136 = vector.broadcast %cst_47 : f32 to vector<8x64xf32>
    %137 = arith.addf %136, %135 : vector<8x64xf32>
    %138 = arith.divf %136, %137 : vector<8x64xf32>
    %139 = vector.extract_strided_slice %128 {offsets = [0, 64], sizes = [8, 32], strides = [1, 1]} : vector<8x128xf32> to vector<8x32xf32>
    %140 = math.tanh %139 : vector<8x32xf32>
    %141 = vector.extract_strided_slice %128 {offsets = [0, 96], sizes = [8, 32], strides = [1, 1]} : vector<8x128xf32> to vector<8x32xf32>
    %142 = arith.negf %141 : vector<8x32xf32>
    %143 = math.exp %142 : vector<8x32xf32>
    %cst_48 = arith.constant 1.000000e+00 : f32
    %144 = vector.broadcast %cst_48 : f32 to vector<8x32xf32>
    %145 = arith.addf %144, %143 : vector<8x32xf32>
    %146 = arith.divf %144, %145 : vector<8x32xf32>
    %147 = vector.extract_strided_slice %138 {offsets = [0, 32], sizes = [8, 32], strides = [1, 1]} : vector<8x64xf32> to vector<8x32xf32>
    %148 = arith.mulf %147, %97 : vector<8x32xf32>
    %149 = vector.extract_strided_slice %138 {offsets = [0, 0], sizes = [8, 32], strides = [1, 1]} : vector<8x64xf32> to vector<8x32xf32>
    %150 = arith.mulf %149, %140 : vector<8x32xf32>
    %151 = arith.addf %148, %150 : vector<8x32xf32>
    %152 = math.tanh %151 : vector<8x32xf32>
    %153 = arith.mulf %146, %152 : vector<8x32xf32>
    %154 = vector.extract_strided_slice %132 {offsets = [0, 0], sizes = [8, 64], strides = [1, 1]} : vector<8x128xf32> to vector<8x64xf32>
    %155 = arith.negf %154 : vector<8x64xf32>
    %156 = math.exp %155 : vector<8x64xf32>
    %cst_49 = arith.constant 1.000000e+00 : f32
    %157 = vector.broadcast %cst_49 : f32 to vector<8x64xf32>
    %158 = arith.addf %157, %156 : vector<8x64xf32>
    %159 = arith.divf %157, %158 : vector<8x64xf32>
    %160 = vector.extract_strided_slice %132 {offsets = [0, 64], sizes = [8, 32], strides = [1, 1]} : vector<8x128xf32> to vector<8x32xf32>
    %161 = math.tanh %160 : vector<8x32xf32>
    %162 = vector.extract_strided_slice %132 {offsets = [0, 96], sizes = [8, 32], strides = [1, 1]} : vector<8x128xf32> to vector<8x32xf32>
    %163 = arith.negf %162 : vector<8x32xf32>
    %164 = math.exp %163 : vector<8x32xf32>
    %cst_50 = arith.constant 1.000000e+00 : f32
    %165 = vector.broadcast %cst_50 : f32 to vector<8x32xf32>
    %166 = arith.addf %165, %164 : vector<8x32xf32>
    %167 = arith.divf %165, %166 : vector<8x32xf32>
    %168 = vector.extract_strided_slice %159 {offsets = [0, 32], sizes = [8, 32], strides = [1, 1]} : vector<8x64xf32> to vector<8x32xf32>
    %169 = arith.mulf %168, %118 : vector<8x32xf32>
    %170 = vector.extract_strided_slice %159 {offsets = [0, 0], sizes = [8, 32], strides = [1, 1]} : vector<8x64xf32> to vector<8x32xf32>
    %171 = arith.mulf %170, %161 : vector<8x32xf32>
    %172 = arith.addf %169, %171 : vector<8x32xf32>
    %173 = math.tanh %172 : vector<8x32xf32>
    %174 = arith.mulf %167, %173 : vector<8x32xf32>
    %175 = arith.truncf %153 : vector<8x32xf32> to vector<8x32xbf16>
    %c16_51 = arith.constant 16 : index
    %c0_52 = arith.constant 0 : index
    %176 = vector.load %arg10[%c16_51, %c0_52] : memref<64x64xbf16, #tpu.memory_space<vmem>>, vector<8x32xbf16>
    tpu.vector_store %arg10[%c16_51, %c0_52], %175 {strides = array<i32>} : memref<64x64xbf16, #tpu.memory_space<vmem>>, vector<8x32xbf16>,
    %177 = arith.truncf %174 : vector<8x32xf32> to vector<8x32xbf16>
    %c40_53 = arith.constant 40 : index
    %c32_54 = arith.constant 32 : index
    %178 = vector.load %arg10[%c40_53, %c32_54] : memref<64x64xbf16, #tpu.memory_space<vmem>>, vector<8x32xbf16>
    tpu.vector_store %arg10[%c40_53, %c32_54], %177 {strides = array<i32>} : memref<64x64xbf16, #tpu.memory_space<vmem>>, vector<8x32xbf16>,
    %c24 = arith.constant 24 : index
    %c0_55 = arith.constant 0 : index
    %179 = vector.load %arg12[%c24, %c0_55] : memref<64x256xf32, #tpu.memory_space<vmem>>, vector<8x128xf32>
    %180 = arith.truncf %153 : vector<8x32xf32> to vector<8x32xbf16>
    %cst_56 = arith.constant dense<0.000000e+00> : vector<8x128xf32>
    %181 = tpu.matmul %180, %10, %cst_56 {dimension_numbers = #tpu.dot_dimension_numbers<[1], [0], [0], [1], [0, 0, 1, 1], [], []>} : vector<8x32xbf16>, vector<32x128xbf16>, vector<8x128xf32> -> vector<8x128xf32>
    %182 = arith.addf %179, %181 : vector<8x128xf32>
    %c32_57 = arith.constant 32 : index
    %c128_58 = arith.constant 128 : index
    %183 = vector.load %arg12[%c32_57, %c128_58] : memref<64x256xf32, #tpu.memory_space<vmem>>, vector<8x128xf32>
    %184 = arith.truncf %174 : vector<8x32xf32> to vector<8x32xbf16>
    %cst_59 = arith.constant dense<0.000000e+00> : vector<8x128xf32>
    %185 = tpu.matmul %184, %12, %cst_59 {dimension_numbers = #tpu.dot_dimension_numbers<[1], [0], [0], [1], [0, 0, 1, 1], [], []>} : vector<8x32xbf16>, vector<32x128xbf16>, vector<8x128xf32> -> vector<8x128xf32>
    %186 = arith.addf %183, %185 : vector<8x128xf32>
    %187 = vector.extract_strided_slice %182 {offsets = [0, 0], sizes = [8, 64], strides = [1, 1]} : vector<8x128xf32> to vector<8x64xf32>
    %188 = arith.negf %187 : vector<8x64xf32>
    %189 = math.exp %188 : vector<8x64xf32>
    %cst_60 = arith.constant 1.000000e+00 : f32
    %190 = vector.broadcast %cst_60 : f32 to vector<8x64xf32>
    %191 = arith.addf %190, %189 : vector<8x64xf32>
    %192 = arith.divf %190, %191 : vector<8x64xf32>
    %193 = vector.extract_strided_slice %182 {offsets = [0, 64], sizes = [8, 32], strides = [1, 1]} : vector<8x128xf32> to vector<8x32xf32>
    %194 = math.tanh %193 : vector<8x32xf32>
    %195 = vector.extract_strided_slice %182 {offsets = [0, 96], sizes = [8, 32], strides = [1, 1]} : vector<8x128xf32> to vector<8x32xf32>
    %196 = arith.negf %195 : vector<8x32xf32>
    %197 = math.exp %196 : vector<8x32xf32>
    %cst_61 = arith.constant 1.000000e+00 : f32
    %198 = vector.broadcast %cst_61 : f32 to vector<8x32xf32>
    %199 = arith.addf %198, %197 : vector<8x32xf32>
    %200 = arith.divf %198, %199 : vector<8x32xf32>
    %201 = vector.extract_strided_slice %192 {offsets = [0, 32], sizes = [8, 32], strides = [1, 1]} : vector<8x64xf32> to vector<8x32xf32>
    %202 = arith.mulf %201, %151 : vector<8x32xf32>
    %203 = vector.extract_strided_slice %192 {offsets = [0, 0], sizes = [8, 32], strides = [1, 1]} : vector<8x64xf32> to vector<8x32xf32>
    %204 = arith.mulf %203, %194 : vector<8x32xf32>
    %205 = arith.addf %202, %204 : vector<8x32xf32>
    %206 = math.tanh %205 : vector<8x32xf32>
    %207 = arith.mulf %200, %206 : vector<8x32xf32>
    %208 = vector.extract_strided_slice %186 {offsets = [0, 0], sizes = [8, 64], strides = [1, 1]} : vector<8x128xf32> to vector<8x64xf32>
    %209 = arith.negf %208 : vector<8x64xf32>
    %210 = math.exp %209 : vector<8x64xf32>
    %cst_62 = arith.constant 1.000000e+00 : f32
    %211 = vector.broadcast %cst_62 : f32 to vector<8x64xf32>
    %212 = arith.addf %211, %210 : vector<8x64xf32>
    %213 = arith.divf %211, %212 : vector<8x64xf32>
    %214 = vector.extract_strided_slice %186 {offsets = [0, 64], sizes = [8, 32], strides = [1, 1]} : vector<8x128xf32> to vector<8x32xf32>
    %215 = math.tanh %214 : vector<8x32xf32>
    %216 = vector.extract_strided_slice %186 {offsets = [0, 96], sizes = [8, 32], strides = [1, 1]} : vector<8x128xf32> to vector<8x32xf32>
    %217 = arith.negf %216 : vector<8x32xf32>
    %218 = math.exp %217 : vector<8x32xf32>
    %cst_63 = arith.constant 1.000000e+00 : f32
    %219 = vector.broadcast %cst_63 : f32 to vector<8x32xf32>
    %220 = arith.addf %219, %218 : vector<8x32xf32>
    %221 = arith.divf %219, %220 : vector<8x32xf32>
    %222 = vector.extract_strided_slice %213 {offsets = [0, 32], sizes = [8, 32], strides = [1, 1]} : vector<8x64xf32> to vector<8x32xf32>
    %223 = arith.mulf %222, %172 : vector<8x32xf32>
    %224 = vector.extract_strided_slice %213 {offsets = [0, 0], sizes = [8, 32], strides = [1, 1]} : vector<8x64xf32> to vector<8x32xf32>
    %225 = arith.mulf %224, %215 : vector<8x32xf32>
    %226 = arith.addf %223, %225 : vector<8x32xf32>
    %227 = math.tanh %226 : vector<8x32xf32>
    %228 = arith.mulf %221, %227 : vector<8x32xf32>
    %229 = arith.truncf %207 : vector<8x32xf32> to vector<8x32xbf16>
    %c24_64 = arith.constant 24 : index
    %c0_65 = arith.constant 0 : index
    %230 = vector.load %arg10[%c24_64, %c0_65] : memref<64x64xbf16, #tpu.memory_space<vmem>>, vector<8x32xbf16>
    tpu.vector_store %arg10[%c24_64, %c0_65], %229 {strides = array<i32>} : memref<64x64xbf16, #tpu.memory_space<vmem>>, vector<8x32xbf16>,
    %231 = arith.truncf %228 : vector<8x32xf32> to vector<8x32xbf16>
    %c32_66 = arith.constant 32 : index
    %c32_67 = arith.constant 32 : index
    %232 = vector.load %arg10[%c32_66, %c32_67] : memref<64x64xbf16, #tpu.memory_space<vmem>>, vector<8x32xbf16>
    tpu.vector_store %arg10[%c32_66, %c32_67], %231 {strides = array<i32>} : memref<64x64xbf16, #tpu.memory_space<vmem>>, vector<8x32xbf16>,
    %c32_68 = arith.constant 32 : index
    %c0_69 = arith.constant 0 : index
    %233 = vector.load %arg12[%c32_68, %c0_69] : memref<64x256xf32, #tpu.memory_space<vmem>>, vector<8x128xf32>
    %234 = arith.truncf %207 : vector<8x32xf32> to vector<8x32xbf16>
    %cst_70 = arith.constant dense<0.000000e+00> : vector<8x128xf32>
    %235 = tpu.matmul %234, %10, %cst_70 {dimension_numbers = #tpu.dot_dimension_numbers<[1], [0], [0], [1], [0, 0, 1, 1], [], []>} : vector<8x32xbf16>, vector<32x128xbf16>, vector<8x128xf32> -> vector<8x128xf32>
    %236 = arith.addf %233, %235 : vector<8x128xf32>
    %c24_71 = arith.constant 24 : index
    %c128_72 = arith.constant 128 : index
    %237 = vector.load %arg12[%c24_71, %c128_72] : memref<64x256xf32, #tpu.memory_space<vmem>>, vector<8x128xf32>
    %238 = arith.truncf %228 : vector<8x32xf32> to vector<8x32xbf16>
    %cst_73 = arith.constant dense<0.000000e+00> : vector<8x128xf32>
    %239 = tpu.matmul %238, %12, %cst_73 {dimension_numbers = #tpu.dot_dimension_numbers<[1], [0], [0], [1], [0, 0, 1, 1], [], []>} : vector<8x32xbf16>, vector<32x128xbf16>, vector<8x128xf32> -> vector<8x128xf32>
    %240 = arith.addf %237, %239 : vector<8x128xf32>
    %241 = vector.extract_strided_slice %236 {offsets = [0, 0], sizes = [8, 64], strides = [1, 1]} : vector<8x128xf32> to vector<8x64xf32>
    %242 = arith.negf %241 : vector<8x64xf32>
    %243 = math.exp %242 : vector<8x64xf32>
    %cst_74 = arith.constant 1.000000e+00 : f32
    %244 = vector.broadcast %cst_74 : f32 to vector<8x64xf32>
    %245 = arith.addf %244, %243 : vector<8x64xf32>
    %246 = arith.divf %244, %245 : vector<8x64xf32>
    %247 = vector.extract_strided_slice %236 {offsets = [0, 64], sizes = [8, 32], strides = [1, 1]} : vector<8x128xf32> to vector<8x32xf32>
    %248 = math.tanh %247 : vector<8x32xf32>
    %249 = vector.extract_strided_slice %236 {offsets = [0, 96], sizes = [8, 32], strides = [1, 1]} : vector<8x128xf32> to vector<8x32xf32>
    %250 = arith.negf %249 : vector<8x32xf32>
    %251 = math.exp %250 : vector<8x32xf32>
    %cst_75 = arith.constant 1.000000e+00 : f32
    %252 = vector.broadcast %cst_75 : f32 to vector<8x32xf32>
    %253 = arith.addf %252, %251 : vector<8x32xf32>
    %254 = arith.divf %252, %253 : vector<8x32xf32>
    %255 = vector.extract_strided_slice %246 {offsets = [0, 32], sizes = [8, 32], strides = [1, 1]} : vector<8x64xf32> to vector<8x32xf32>
    %256 = arith.mulf %255, %205 : vector<8x32xf32>
    %257 = vector.extract_strided_slice %246 {offsets = [0, 0], sizes = [8, 32], strides = [1, 1]} : vector<8x64xf32> to vector<8x32xf32>
    %258 = arith.mulf %257, %248 : vector<8x32xf32>
    %259 = arith.addf %256, %258 : vector<8x32xf32>
    %260 = math.tanh %259 : vector<8x32xf32>
    %261 = arith.mulf %254, %260 : vector<8x32xf32>
    %262 = vector.extract_strided_slice %240 {offsets = [0, 0], sizes = [8, 64], strides = [1, 1]} : vector<8x128xf32> to vector<8x64xf32>
    %263 = arith.negf %262 : vector<8x64xf32>
    %264 = math.exp %263 : vector<8x64xf32>
    %cst_76 = arith.constant 1.000000e+00 : f32
    %265 = vector.broadcast %cst_76 : f32 to vector<8x64xf32>
    %266 = arith.addf %265, %264 : vector<8x64xf32>
    %267 = arith.divf %265, %266 : vector<8x64xf32>
    %268 = vector.extract_strided_slice %240 {offsets = [0, 64], sizes = [8, 32], strides = [1, 1]} : vector<8x128xf32> to vector<8x32xf32>
    %269 = math.tanh %268 : vector<8x32xf32>
    %270 = vector.extract_strided_slice %240 {offsets = [0, 96], sizes = [8, 32], strides = [1, 1]} : vector<8x128xf32> to vector<8x32xf32>
    %271 = arith.negf %270 : vector<8x32xf32>
    %272 = math.exp %271 : vector<8x32xf32>
    %cst_77 = arith.constant 1.000000e+00 : f32
    %273 = vector.broadcast %cst_77 : f32 to vector<8x32xf32>
    %274 = arith.addf %273, %272 : vector<8x32xf32>
    %275 = arith.divf %273, %274 : vector<8x32xf32>
    %276 = vector.extract_strided_slice %267 {offsets = [0, 32], sizes = [8, 32], strides = [1, 1]} : vector<8x64xf32> to vector<8x32xf32>
    %277 = arith.mulf %276, %226 : vector<8x32xf32>
    %278 = vector.extract_strided_slice %267 {offsets = [0, 0], sizes = [8, 32], strides = [1, 1]} : vector<8x64xf32> to vector<8x32xf32>
    %279 = arith.mulf %278, %269 : vector<8x32xf32>
    %280 = arith.addf %277, %279 : vector<8x32xf32>
    %281 = math.tanh %280 : vector<8x32xf32>
    %282 = arith.mulf %275, %281 : vector<8x32xf32>
    %283 = arith.truncf %261 : vector<8x32xf32> to vector<8x32xbf16>
    %c32_78 = arith.constant 32 : index
    %c0_79 = arith.constant 0 : index
    %284 = vector.load %arg10[%c32_78, %c0_79] : memref<64x64xbf16, #tpu.memory_space<vmem>>, vector<8x32xbf16>
    tpu.vector_store %arg10[%c32_78, %c0_79], %283 {strides = array<i32>} : memref<64x64xbf16, #tpu.memory_space<vmem>>, vector<8x32xbf16>,
    %285 = arith.truncf %282 : vector<8x32xf32> to vector<8x32xbf16>
    %c24_80 = arith.constant 24 : index
    %c32_81 = arith.constant 32 : index
    %286 = vector.load %arg10[%c24_80, %c32_81] : memref<64x64xbf16, #tpu.memory_space<vmem>>, vector<8x32xbf16>
    tpu.vector_store %arg10[%c24_80, %c32_81], %285 {strides = array<i32>} : memref<64x64xbf16, #tpu.memory_space<vmem>>, vector<8x32xbf16>,
    %c40_82 = arith.constant 40 : index
    %c0_83 = arith.constant 0 : index
    %287 = vector.load %arg12[%c40_82, %c0_83] : memref<64x256xf32, #tpu.memory_space<vmem>>, vector<8x128xf32>
    %288 = arith.truncf %261 : vector<8x32xf32> to vector<8x32xbf16>
    %cst_84 = arith.constant dense<0.000000e+00> : vector<8x128xf32>
    %289 = tpu.matmul %288, %10, %cst_84 {dimension_numbers = #tpu.dot_dimension_numbers<[1], [0], [0], [1], [0, 0, 1, 1], [], []>} : vector<8x32xbf16>, vector<32x128xbf16>, vector<8x128xf32> -> vector<8x128xf32>
    %290 = arith.addf %287, %289 : vector<8x128xf32>
    %c16_85 = arith.constant 16 : index
    %c128_86 = arith.constant 128 : index
    %291 = vector.load %arg12[%c16_85, %c128_86] : memref<64x256xf32, #tpu.memory_space<vmem>>, vector<8x128xf32>
    %292 = arith.truncf %282 : vector<8x32xf32> to vector<8x32xbf16>
    %cst_87 = arith.constant dense<0.000000e+00> : vector<8x128xf32>
    %293 = tpu.matmul %292, %12, %cst_87 {dimension_numbers = #tpu.dot_dimension_numbers<[1], [0], [0], [1], [0, 0, 1, 1], [], []>} : vector<8x32xbf16>, vector<32x128xbf16>, vector<8x128xf32> -> vector<8x128xf32>
    %294 = arith.addf %291, %293 : vector<8x128xf32>
    %295 = vector.extract_strided_slice %290 {offsets = [0, 0], sizes = [8, 64], strides = [1, 1]} : vector<8x128xf32> to vector<8x64xf32>
    %296 = arith.negf %295 : vector<8x64xf32>
    %297 = math.exp %296 : vector<8x64xf32>
    %cst_88 = arith.constant 1.000000e+00 : f32
    %298 = vector.broadcast %cst_88 : f32 to vector<8x64xf32>
    %299 = arith.addf %298, %297 : vector<8x64xf32>
    %300 = arith.divf %298, %299 : vector<8x64xf32>
    %301 = vector.extract_strided_slice %290 {offsets = [0, 64], sizes = [8, 32], strides = [1, 1]} : vector<8x128xf32> to vector<8x32xf32>
    %302 = math.tanh %301 : vector<8x32xf32>
    %303 = vector.extract_strided_slice %290 {offsets = [0, 96], sizes = [8, 32], strides = [1, 1]} : vector<8x128xf32> to vector<8x32xf32>
    %304 = arith.negf %303 : vector<8x32xf32>
    %305 = math.exp %304 : vector<8x32xf32>
    %cst_89 = arith.constant 1.000000e+00 : f32
    %306 = vector.broadcast %cst_89 : f32 to vector<8x32xf32>
    %307 = arith.addf %306, %305 : vector<8x32xf32>
    %308 = arith.divf %306, %307 : vector<8x32xf32>
    %309 = vector.extract_strided_slice %300 {offsets = [0, 32], sizes = [8, 32], strides = [1, 1]} : vector<8x64xf32> to vector<8x32xf32>
    %310 = arith.mulf %309, %259 : vector<8x32xf32>
    %311 = vector.extract_strided_slice %300 {offsets = [0, 0], sizes = [8, 32], strides = [1, 1]} : vector<8x64xf32> to vector<8x32xf32>
    %312 = arith.mulf %311, %302 : vector<8x32xf32>
    %313 = arith.addf %310, %312 : vector<8x32xf32>
    %314 = math.tanh %313 : vector<8x32xf32>
    %315 = arith.mulf %308, %314 : vector<8x32xf32>
    %316 = vector.extract_strided_slice %294 {offsets = [0, 0], sizes = [8, 64], strides = [1, 1]} : vector<8x128xf32> to vector<8x64xf32>
    %317 = arith.negf %316 : vector<8x64xf32>
    %318 = math.exp %317 : vector<8x64xf32>
    %cst_90 = arith.constant 1.000000e+00 : f32
    %319 = vector.broadcast %cst_90 : f32 to vector<8x64xf32>
    %320 = arith.addf %319, %318 : vector<8x64xf32>
    %321 = arith.divf %319, %320 : vector<8x64xf32>
    %322 = vector.extract_strided_slice %294 {offsets = [0, 64], sizes = [8, 32], strides = [1, 1]} : vector<8x128xf32> to vector<8x32xf32>
    %323 = math.tanh %322 : vector<8x32xf32>
    %324 = vector.extract_strided_slice %294 {offsets = [0, 96], sizes = [8, 32], strides = [1, 1]} : vector<8x128xf32> to vector<8x32xf32>
    %325 = arith.negf %324 : vector<8x32xf32>
    %326 = math.exp %325 : vector<8x32xf32>
    %cst_91 = arith.constant 1.000000e+00 : f32
    %327 = vector.broadcast %cst_91 : f32 to vector<8x32xf32>
    %328 = arith.addf %327, %326 : vector<8x32xf32>
    %329 = arith.divf %327, %328 : vector<8x32xf32>
    %330 = vector.extract_strided_slice %321 {offsets = [0, 32], sizes = [8, 32], strides = [1, 1]} : vector<8x64xf32> to vector<8x32xf32>
    %331 = arith.mulf %330, %280 : vector<8x32xf32>
    %332 = vector.extract_strided_slice %321 {offsets = [0, 0], sizes = [8, 32], strides = [1, 1]} : vector<8x64xf32> to vector<8x32xf32>
    %333 = arith.mulf %332, %323 : vector<8x32xf32>
    %334 = arith.addf %331, %333 : vector<8x32xf32>
    %335 = math.tanh %334 : vector<8x32xf32>
    %336 = arith.mulf %329, %335 : vector<8x32xf32>
    %337 = arith.truncf %315 : vector<8x32xf32> to vector<8x32xbf16>
    %c40_92 = arith.constant 40 : index
    %c0_93 = arith.constant 0 : index
    %338 = vector.load %arg10[%c40_92, %c0_93] : memref<64x64xbf16, #tpu.memory_space<vmem>>, vector<8x32xbf16>
    tpu.vector_store %arg10[%c40_92, %c0_93], %337 {strides = array<i32>} : memref<64x64xbf16, #tpu.memory_space<vmem>>, vector<8x32xbf16>,
    %339 = arith.truncf %336 : vector<8x32xf32> to vector<8x32xbf16>
    %c16_94 = arith.constant 16 : index
    %c32_95 = arith.constant 32 : index
    %340 = vector.load %arg10[%c16_94, %c32_95] : memref<64x64xbf16, #tpu.memory_space<vmem>>, vector<8x32xbf16>
    tpu.vector_store %arg10[%c16_94, %c32_95], %339 {strides = array<i32>} : memref<64x64xbf16, #tpu.memory_space<vmem>>, vector<8x32xbf16>,
    %c48_96 = arith.constant 48 : index
    %c0_97 = arith.constant 0 : index
    %341 = vector.load %arg12[%c48_96, %c0_97] : memref<64x256xf32, #tpu.memory_space<vmem>>, vector<8x128xf32>
    %342 = arith.truncf %315 : vector<8x32xf32> to vector<8x32xbf16>
    %cst_98 = arith.constant dense<0.000000e+00> : vector<8x128xf32>
    %343 = tpu.matmul %342, %10, %cst_98 {dimension_numbers = #tpu.dot_dimension_numbers<[1], [0], [0], [1], [0, 0, 1, 1], [], []>} : vector<8x32xbf16>, vector<32x128xbf16>, vector<8x128xf32> -> vector<8x128xf32>
    %344 = arith.addf %341, %343 : vector<8x128xf32>
    %c8_99 = arith.constant 8 : index
    %c128_100 = arith.constant 128 : index
    %345 = vector.load %arg12[%c8_99, %c128_100] : memref<64x256xf32, #tpu.memory_space<vmem>>, vector<8x128xf32>
    %346 = arith.truncf %336 : vector<8x32xf32> to vector<8x32xbf16>
    %cst_101 = arith.constant dense<0.000000e+00> : vector<8x128xf32>
    %347 = tpu.matmul %346, %12, %cst_101 {dimension_numbers = #tpu.dot_dimension_numbers<[1], [0], [0], [1], [0, 0, 1, 1], [], []>} : vector<8x32xbf16>, vector<32x128xbf16>, vector<8x128xf32> -> vector<8x128xf32>
    %348 = arith.addf %345, %347 : vector<8x128xf32>
    %349 = vector.extract_strided_slice %344 {offsets = [0, 0], sizes = [8, 64], strides = [1, 1]} : vector<8x128xf32> to vector<8x64xf32>
    %350 = arith.negf %349 : vector<8x64xf32>
    %351 = math.exp %350 : vector<8x64xf32>
    %cst_102 = arith.constant 1.000000e+00 : f32
    %352 = vector.broadcast %cst_102 : f32 to vector<8x64xf32>
    %353 = arith.addf %352, %351 : vector<8x64xf32>
    %354 = arith.divf %352, %353 : vector<8x64xf32>
    %355 = vector.extract_strided_slice %344 {offsets = [0, 64], sizes = [8, 32], strides = [1, 1]} : vector<8x128xf32> to vector<8x32xf32>
    %356 = math.tanh %355 : vector<8x32xf32>
    %357 = vector.extract_strided_slice %344 {offsets = [0, 96], sizes = [8, 32], strides = [1, 1]} : vector<8x128xf32> to vector<8x32xf32>
    %358 = arith.negf %357 : vector<8x32xf32>
    %359 = math.exp %358 : vector<8x32xf32>
    %cst_103 = arith.constant 1.000000e+00 : f32
    %360 = vector.broadcast %cst_103 : f32 to vector<8x32xf32>
    %361 = arith.addf %360, %359 : vector<8x32xf32>
    %362 = arith.divf %360, %361 : vector<8x32xf32>
    %363 = vector.extract_strided_slice %354 {offsets = [0, 32], sizes = [8, 32], strides = [1, 1]} : vector<8x64xf32> to vector<8x32xf32>
    %364 = arith.mulf %363, %313 : vector<8x32xf32>
    %365 = vector.extract_strided_slice %354 {offsets = [0, 0], sizes = [8, 32], strides = [1, 1]} : vector<8x64xf32> to vector<8x32xf32>
    %366 = arith.mulf %365, %356 : vector<8x32xf32>
    %367 = arith.addf %364, %366 : vector<8x32xf32>
    %368 = math.tanh %367 : vector<8x32xf32>
    %369 = arith.mulf %362, %368 : vector<8x32xf32>
    %370 = vector.extract_strided_slice %348 {offsets = [0, 0], sizes = [8, 64], strides = [1, 1]} : vector<8x128xf32> to vector<8x64xf32>
    %371 = arith.negf %370 : vector<8x64xf32>
    %372 = math.exp %371 : vector<8x64xf32>
    %cst_104 = arith.constant 1.000000e+00 : f32
    %373 = vector.broadcast %cst_104 : f32 to vector<8x64xf32>
    %374 = arith.addf %373, %372 : vector<8x64xf32>
    %375 = arith.divf %373, %374 : vector<8x64xf32>
    %376 = vector.extract_strided_slice %348 {offsets = [0, 64], sizes = [8, 32], strides = [1, 1]} : vector<8x128xf32> to vector<8x32xf32>
    %377 = math.tanh %376 : vector<8x32xf32>
    %378 = vector.extract_strided_slice %348 {offsets = [0, 96], sizes = [8, 32], strides = [1, 1]} : vector<8x128xf32> to vector<8x32xf32>
    %379 = arith.negf %378 : vector<8x32xf32>
    %380 = math.exp %379 : vector<8x32xf32>
    %cst_105 = arith.constant 1.000000e+00 : f32
    %381 = vector.broadcast %cst_105 : f32 to vector<8x32xf32>
    %382 = arith.addf %381, %380 : vector<8x32xf32>
    %383 = arith.divf %381, %382 : vector<8x32xf32>
    %384 = vector.extract_strided_slice %375 {offsets = [0, 32], sizes = [8, 32], strides = [1, 1]} : vector<8x64xf32> to vector<8x32xf32>
    %385 = arith.mulf %384, %334 : vector<8x32xf32>
    %386 = vector.extract_strided_slice %375 {offsets = [0, 0], sizes = [8, 32], strides = [1, 1]} : vector<8x64xf32> to vector<8x32xf32>
    %387 = arith.mulf %386, %377 : vector<8x32xf32>
    %388 = arith.addf %385, %387 : vector<8x32xf32>
    %389 = math.tanh %388 : vector<8x32xf32>
    %390 = arith.mulf %383, %389 : vector<8x32xf32>
    %391 = arith.truncf %369 : vector<8x32xf32> to vector<8x32xbf16>
    %c48_106 = arith.constant 48 : index
    %c0_107 = arith.constant 0 : index
    %392 = vector.load %arg10[%c48_106, %c0_107] : memref<64x64xbf16, #tpu.memory_space<vmem>>, vector<8x32xbf16>
    tpu.vector_store %arg10[%c48_106, %c0_107], %391 {strides = array<i32>} : memref<64x64xbf16, #tpu.memory_space<vmem>>, vector<8x32xbf16>,
    %393 = arith.truncf %390 : vector<8x32xf32> to vector<8x32xbf16>
    %c8_108 = arith.constant 8 : index
    %c32_109 = arith.constant 32 : index
    %394 = vector.load %arg10[%c8_108, %c32_109] : memref<64x64xbf16, #tpu.memory_space<vmem>>, vector<8x32xbf16>
    tpu.vector_store %arg10[%c8_108, %c32_109], %393 {strides = array<i32>} : memref<64x64xbf16, #tpu.memory_space<vmem>>, vector<8x32xbf16>,
    %c56_110 = arith.constant 56 : index
    %c0_111 = arith.constant 0 : index
    %395 = vector.load %arg12[%c56_110, %c0_111] : memref<64x256xf32, #tpu.memory_space<vmem>>, vector<8x128xf32>
    %396 = arith.truncf %369 : vector<8x32xf32> to vector<8x32xbf16>
    %cst_112 = arith.constant dense<0.000000e+00> : vector<8x128xf32>
    %397 = tpu.matmul %396, %10, %cst_112 {dimension_numbers = #tpu.dot_dimension_numbers<[1], [0], [0], [1], [0, 0, 1, 1], [], []>} : vector<8x32xbf16>, vector<32x128xbf16>, vector<8x128xf32> -> vector<8x128xf32>
    %398 = arith.addf %395, %397 : vector<8x128xf32>
    %c0_113 = arith.constant 0 : index
    %c128_114 = arith.constant 128 : index
    %399 = vector.load %arg12[%c0_113, %c128_114] : memref<64x256xf32, #tpu.memory_space<vmem>>, vector<8x128xf32>
    %400 = arith.truncf %390 : vector<8x32xf32> to vector<8x32xbf16>
    %cst_115 = arith.constant dense<0.000000e+00> : vector<8x128xf32>
    %401 = tpu.matmul %400, %12, %cst_115 {dimension_numbers = #tpu.dot_dimension_numbers<[1], [0], [0], [1], [0, 0, 1, 1], [], []>} : vector<8x32xbf16>, vector<32x128xbf16>, vector<8x128xf32> -> vector<8x128xf32>
    %402 = arith.addf %399, %401 : vector<8x128xf32>
    %403 = vector.extract_strided_slice %398 {offsets = [0, 0], sizes = [8, 64], strides = [1, 1]} : vector<8x128xf32> to vector<8x64xf32>
    %404 = arith.negf %403 : vector<8x64xf32>
    %405 = math.exp %404 : vector<8x64xf32>
    %cst_116 = arith.constant 1.000000e+00 : f32
    %406 = vector.broadcast %cst_116 : f32 to vector<8x64xf32>
    %407 = arith.addf %406, %405 : vector<8x64xf32>
    %408 = arith.divf %406, %407 : vector<8x64xf32>
    %409 = vector.extract_strided_slice %398 {offsets = [0, 64], sizes = [8, 32], strides = [1, 1]} : vector<8x128xf32> to vector<8x32xf32>
    %410 = math.tanh %409 : vector<8x32xf32>
    %411 = vector.extract_strided_slice %398 {offsets = [0, 96], sizes = [8, 32], strides = [1, 1]} : vector<8x128xf32> to vector<8x32xf32>
    %412 = arith.negf %411 : vector<8x32xf32>
    %413 = math.exp %412 : vector<8x32xf32>
    %cst_117 = arith.constant 1.000000e+00 : f32
    %414 = vector.broadcast %cst_117 : f32 to vector<8x32xf32>
    %415 = arith.addf %414, %413 : vector<8x32xf32>
    %416 = arith.divf %414, %415 : vector<8x32xf32>
    %417 = vector.extract_strided_slice %408 {offsets = [0, 32], sizes = [8, 32], strides = [1, 1]} : vector<8x64xf32> to vector<8x32xf32>
    %418 = arith.mulf %417, %367 : vector<8x32xf32>
    %419 = vector.extract_strided_slice %408 {offsets = [0, 0], sizes = [8, 32], strides = [1, 1]} : vector<8x64xf32> to vector<8x32xf32>
    %420 = arith.mulf %419, %410 : vector<8x32xf32>
    %421 = arith.addf %418, %420 : vector<8x32xf32>
    %422 = math.tanh %421 : vector<8x32xf32>
    %423 = arith.mulf %416, %422 : vector<8x32xf32>
    %424 = vector.extract_strided_slice %402 {offsets = [0, 0], sizes = [8, 64], strides = [1, 1]} : vector<8x128xf32> to vector<8x64xf32>
    %425 = arith.negf %424 : vector<8x64xf32>
    %426 = math.exp %425 : vector<8x64xf32>
    %cst_118 = arith.constant 1.000000e+00 : f32
    %427 = vector.broadcast %cst_118 : f32 to vector<8x64xf32>
    %428 = arith.addf %427, %426 : vector<8x64xf32>
    %429 = arith.divf %427, %428 : vector<8x64xf32>
    %430 = vector.extract_strided_slice %402 {offsets = [0, 64], sizes = [8, 32], strides = [1, 1]} : vector<8x128xf32> to vector<8x32xf32>
    %431 = math.tanh %430 : vector<8x32xf32>
    %432 = vector.extract_strided_slice %402 {offsets = [0, 96], sizes = [8, 32], strides = [1, 1]} : vector<8x128xf32> to vector<8x32xf32>
    %433 = arith.negf %432 : vector<8x32xf32>
    %434 = math.exp %433 : vector<8x32xf32>
    %cst_119 = arith.constant 1.000000e+00 : f32
    %435 = vector.broadcast %cst_119 : f32 to vector<8x32xf32>
    %436 = arith.addf %435, %434 : vector<8x32xf32>
    %437 = arith.divf %435, %436 : vector<8x32xf32>
    %438 = vector.extract_strided_slice %429 {offsets = [0, 32], sizes = [8, 32], strides = [1, 1]} : vector<8x64xf32> to vector<8x32xf32>
    %439 = arith.mulf %438, %388 : vector<8x32xf32>
    %440 = vector.extract_strided_slice %429 {offsets = [0, 0], sizes = [8, 32], strides = [1, 1]} : vector<8x64xf32> to vector<8x32xf32>
    %441 = arith.mulf %440, %431 : vector<8x32xf32>
    %442 = arith.addf %439, %441 : vector<8x32xf32>
    %443 = math.tanh %442 : vector<8x32xf32>
    %444 = arith.mulf %437, %443 : vector<8x32xf32>
    %445 = arith.truncf %423 : vector<8x32xf32> to vector<8x32xbf16>
    %c56_120 = arith.constant 56 : index
    %c0_121 = arith.constant 0 : index
    %446 = vector.load %arg10[%c56_120, %c0_121] : memref<64x64xbf16, #tpu.memory_space<vmem>>, vector<8x32xbf16>
    tpu.vector_store %arg10[%c56_120, %c0_121], %445 {strides = array<i32>} : memref<64x64xbf16, #tpu.memory_space<vmem>>, vector<8x32xbf16>,
    %447 = arith.truncf %444 : vector<8x32xf32> to vector<8x32xbf16>
    %c0_122 = arith.constant 0 : index
    %c32_123 = arith.constant 32 : index
    %448 = vector.load %arg10[%c0_122, %c32_123] : memref<64x64xbf16, #tpu.memory_space<vmem>>, vector<8x32xbf16>
    tpu.vector_store %arg10[%c0_122, %c32_123], %447 {strides = array<i32>} : memref<64x64xbf16, #tpu.memory_space<vmem>>, vector<8x32xbf16>,
    %c0_124 = arith.constant 0 : index
    %c0_125 = arith.constant 0 : index
    %449 = vector.load %arg10[%c0_124, %c0_125] : memref<64x64xbf16, #tpu.memory_space<vmem>>, vector<64x64xbf16>
    %c1_126 = arith.constant 1 : index
    %c0_127 = arith.constant 0 : index
    %c0_128 = arith.constant 0 : index
    %450 = vector.load %arg1[%c1_126, %c0_127, %c0_128] : memref<3x64x256xbf16, #tpu.memory_space<vmem>>, vector<1x64x256xbf16>
    %451 = vector.shape_cast %450 : vector<1x64x256xbf16> to vector<64x256xbf16>
    %cst_129 = arith.constant dense<0.000000e+00> : vector<64x256xf32>
    %452 = tpu.matmul %449, %451, %cst_129 {dimension_numbers = #tpu.dot_dimension_numbers<[1], [0], [0], [1], [0, 0, 1, 1], [], []>} : vector<64x64xbf16>, vector<64x256xbf16>, vector<64x256xf32> -> vector<64x256xf32>
    %c1_130 = arith.constant 1 : index
    %c0_131 = arith.constant 0 : index
    %c0_132 = arith.constant 0 : index
    %453 = vector.load %arg3[%c1_130, %c0_131, %c0_132] : memref<3x1x256xf32, #tpu.memory_space<vmem>>, vector<1x1x256xf32>
    %454 = vector.shape_cast %453 : vector<1x1x256xf32> to vector<1x256xf32>
    %455 = vector.broadcast %454 : vector<1x256xf32> to vector<64x256xf32>
    %456 = arith.addf %452, %455 : vector<64x256xf32>
    %c0_133 = arith.constant 0 : index
    %c0_134 = arith.constant 0 : index
    %457 = vector.load %arg12[%c0_133, %c0_134] : memref<64x256xf32, #tpu.memory_space<vmem>>, vector<64x256xf32>
    tpu.vector_store %arg12[%c0_133, %c0_134], %456 {strides = array<i32>} : memref<64x256xf32, #tpu.memory_space<vmem>>, vector<64x256xf32>,
    %c1_135 = arith.constant 1 : index
    %c0_136 = arith.constant 0 : index
    %c0_137 = arith.constant 0 : index
    %c0_138 = arith.constant 0 : index
    %458 = vector.load %arg2[%c1_135, %c0_136, %c0_137, %c0_138] : memref<3x2x32x128xbf16, #tpu.memory_space<vmem>>, vector<1x1x32x128xbf16>
    %459 = vector.shape_cast %458 : vector<1x1x32x128xbf16> to vector<32x128xbf16>
    %c1_139 = arith.constant 1 : index
    %c1_140 = arith.constant 1 : index
    %c0_141 = arith.constant 0 : index
    %c0_142 = arith.constant 0 : index
    %460 = vector.load %arg2[%c1_139, %c1_140, %c0_141, %c0_142] : memref<3x2x32x128xbf16, #tpu.memory_space<vmem>>, vector<1x1x32x128xbf16>
    %461 = vector.shape_cast %460 : vector<1x1x32x128xbf16> to vector<32x128xbf16>
    %cst_143 = arith.constant 0.000000e+00 : f32
    %462 = vector.broadcast %cst_143 : f32 to vector<8x32xf32>
    %cst_144 = arith.constant 0.000000e+00 : f32
    %463 = vector.broadcast %cst_144 : f32 to vector<8x32xf32>
    %cst_145 = arith.constant 0.000000e+00 : f32
    %464 = vector.broadcast %cst_145 : f32 to vector<8x32xf32>
    %cst_146 = arith.constant 0.000000e+00 : f32
    %465 = vector.broadcast %cst_146 : f32 to vector<8x32xf32>
    %c0_147 = arith.constant 0 : index
    %c0_148 = arith.constant 0 : index
    %466 = vector.load %arg12[%c0_147, %c0_148] : memref<64x256xf32, #tpu.memory_space<vmem>>, vector<8x128xf32>
    %467 = arith.truncf %462 : vector<8x32xf32> to vector<8x32xbf16>
    %cst_149 = arith.constant dense<0.000000e+00> : vector<8x128xf32>
    %468 = tpu.matmul %467, %459, %cst_149 {dimension_numbers = #tpu.dot_dimension_numbers<[1], [0], [0], [1], [0, 0, 1, 1], [], []>} : vector<8x32xbf16>, vector<32x128xbf16>, vector<8x128xf32> -> vector<8x128xf32>
    %469 = arith.addf %466, %468 : vector<8x128xf32>
    %c56_150 = arith.constant 56 : index
    %c128_151 = arith.constant 128 : index
    %470 = vector.load %arg12[%c56_150, %c128_151] : memref<64x256xf32, #tpu.memory_space<vmem>>, vector<8x128xf32>
    %471 = arith.truncf %464 : vector<8x32xf32> to vector<8x32xbf16>
    %cst_152 = arith.constant dense<0.000000e+00> : vector<8x128xf32>
    %472 = tpu.matmul %471, %461, %cst_152 {dimension_numbers = #tpu.dot_dimension_numbers<[1], [0], [0], [1], [0, 0, 1, 1], [], []>} : vector<8x32xbf16>, vector<32x128xbf16>, vector<8x128xf32> -> vector<8x128xf32>
    %473 = arith.addf %470, %472 : vector<8x128xf32>
    %474 = vector.extract_strided_slice %469 {offsets = [0, 0], sizes = [8, 64], strides = [1, 1]} : vector<8x128xf32> to vector<8x64xf32>
    %475 = arith.negf %474 : vector<8x64xf32>
    %476 = math.exp %475 : vector<8x64xf32>
    %cst_153 = arith.constant 1.000000e+00 : f32
    %477 = vector.broadcast %cst_153 : f32 to vector<8x64xf32>
    %478 = arith.addf %477, %476 : vector<8x64xf32>
    %479 = arith.divf %477, %478 : vector<8x64xf32>
    %480 = vector.extract_strided_slice %469 {offsets = [0, 64], sizes = [8, 32], strides = [1, 1]} : vector<8x128xf32> to vector<8x32xf32>
    %481 = math.tanh %480 : vector<8x32xf32>
    %482 = vector.extract_strided_slice %469 {offsets = [0, 96], sizes = [8, 32], strides = [1, 1]} : vector<8x128xf32> to vector<8x32xf32>
    %483 = arith.negf %482 : vector<8x32xf32>
    %484 = math.exp %483 : vector<8x32xf32>
    %cst_154 = arith.constant 1.000000e+00 : f32
    %485 = vector.broadcast %cst_154 : f32 to vector<8x32xf32>
    %486 = arith.addf %485, %484 : vector<8x32xf32>
    %487 = arith.divf %485, %486 : vector<8x32xf32>
    %488 = vector.extract_strided_slice %479 {offsets = [0, 32], sizes = [8, 32], strides = [1, 1]} : vector<8x64xf32> to vector<8x32xf32>
    %489 = arith.mulf %488, %463 : vector<8x32xf32>
    %490 = vector.extract_strided_slice %479 {offsets = [0, 0], sizes = [8, 32], strides = [1, 1]} : vector<8x64xf32> to vector<8x32xf32>
    %491 = arith.mulf %490, %481 : vector<8x32xf32>
    %492 = arith.addf %489, %491 : vector<8x32xf32>
    %493 = math.tanh %492 : vector<8x32xf32>
    %494 = arith.mulf %487, %493 : vector<8x32xf32>
    %495 = vector.extract_strided_slice %473 {offsets = [0, 0], sizes = [8, 64], strides = [1, 1]} : vector<8x128xf32> to vector<8x64xf32>
    %496 = arith.negf %495 : vector<8x64xf32>
    %497 = math.exp %496 : vector<8x64xf32>
    %cst_155 = arith.constant 1.000000e+00 : f32
    %498 = vector.broadcast %cst_155 : f32 to vector<8x64xf32>
    %499 = arith.addf %498, %497 : vector<8x64xf32>
    %500 = arith.divf %498, %499 : vector<8x64xf32>
    %501 = vector.extract_strided_slice %473 {offsets = [0, 64], sizes = [8, 32], strides = [1, 1]} : vector<8x128xf32> to vector<8x32xf32>
    %502 = math.tanh %501 : vector<8x32xf32>
    %503 = vector.extract_strided_slice %473 {offsets = [0, 96], sizes = [8, 32], strides = [1, 1]} : vector<8x128xf32> to vector<8x32xf32>
    %504 = arith.negf %503 : vector<8x32xf32>
    %505 = math.exp %504 : vector<8x32xf32>
    %cst_156 = arith.constant 1.000000e+00 : f32
    %506 = vector.broadcast %cst_156 : f32 to vector<8x32xf32>
    %507 = arith.addf %506, %505 : vector<8x32xf32>
    %508 = arith.divf %506, %507 : vector<8x32xf32>
    %509 = vector.extract_strided_slice %500 {offsets = [0, 32], sizes = [8, 32], strides = [1, 1]} : vector<8x64xf32> to vector<8x32xf32>
    %510 = arith.mulf %509, %465 : vector<8x32xf32>
    %511 = vector.extract_strided_slice %500 {offsets = [0, 0], sizes = [8, 32], strides = [1, 1]} : vector<8x64xf32> to vector<8x32xf32>
    %512 = arith.mulf %511, %502 : vector<8x32xf32>
    %513 = arith.addf %510, %512 : vector<8x32xf32>
    %514 = math.tanh %513 : vector<8x32xf32>
    %515 = arith.mulf %508, %514 : vector<8x32xf32>
    %516 = arith.truncf %494 : vector<8x32xf32> to vector<8x32xbf16>
    %c0_157 = arith.constant 0 : index
    %c0_158 = arith.constant 0 : index
    %517 = vector.load %arg11[%c0_157, %c0_158] : memref<64x64xbf16, #tpu.memory_space<vmem>>, vector<8x32xbf16>
    tpu.vector_store %arg11[%c0_157, %c0_158], %516 {strides = array<i32>} : memref<64x64xbf16, #tpu.memory_space<vmem>>, vector<8x32xbf16>,
    %518 = arith.truncf %515 : vector<8x32xf32> to vector<8x32xbf16>
    %c56_159 = arith.constant 56 : index
    %c32_160 = arith.constant 32 : index
    %519 = vector.load %arg11[%c56_159, %c32_160] : memref<64x64xbf16, #tpu.memory_space<vmem>>, vector<8x32xbf16>
    tpu.vector_store %arg11[%c56_159, %c32_160], %518 {strides = array<i32>} : memref<64x64xbf16, #tpu.memory_space<vmem>>, vector<8x32xbf16>,
    %c8_161 = arith.constant 8 : index
    %c0_162 = arith.constant 0 : index
    %520 = vector.load %arg12[%c8_161, %c0_162] : memref<64x256xf32, #tpu.memory_space<vmem>>, vector<8x128xf32>
    %521 = arith.truncf %494 : vector<8x32xf32> to vector<8x32xbf16>
    %cst_163 = arith.constant dense<0.000000e+00> : vector<8x128xf32>
    %522 = tpu.matmul %521, %459, %cst_163 {dimension_numbers = #tpu.dot_dimension_numbers<[1], [0], [0], [1], [0, 0, 1, 1], [], []>} : vector<8x32xbf16>, vector<32x128xbf16>, vector<8x128xf32> -> vector<8x128xf32>
    %523 = arith.addf %520, %522 : vector<8x128xf32>
    %c48_164 = arith.constant 48 : index
    %c128_165 = arith.constant 128 : index
    %524 = vector.load %arg12[%c48_164, %c128_165] : memref<64x256xf32, #tpu.memory_space<vmem>>, vector<8x128xf32>
    %525 = arith.truncf %515 : vector<8x32xf32> to vector<8x32xbf16>
    %cst_166 = arith.constant dense<0.000000e+00> : vector<8x128xf32>
    %526 = tpu.matmul %525, %461, %cst_166 {dimension_numbers = #tpu.dot_dimension_numbers<[1], [0], [0], [1], [0, 0, 1, 1], [], []>} : vector<8x32xbf16>, vector<32x128xbf16>, vector<8x128xf32> -> vector<8x128xf32>
    %527 = arith.addf %524, %526 : vector<8x128xf32>
    %528 = vector.extract_strided_slice %523 {offsets = [0, 0], sizes = [8, 64], strides = [1, 1]} : vector<8x128xf32> to vector<8x64xf32>
    %529 = arith.negf %528 : vector<8x64xf32>
    %530 = math.exp %529 : vector<8x64xf32>
    %cst_167 = arith.constant 1.000000e+00 : f32
    %531 = vector.broadcast %cst_167 : f32 to vector<8x64xf32>
    %532 = arith.addf %531, %530 : vector<8x64xf32>
    %533 = arith.divf %531, %532 : vector<8x64xf32>
    %534 = vector.extract_strided_slice %523 {offsets = [0, 64], sizes = [8, 32], strides = [1, 1]} : vector<8x128xf32> to vector<8x32xf32>
    %535 = math.tanh %534 : vector<8x32xf32>
    %536 = vector.extract_strided_slice %523 {offsets = [0, 96], sizes = [8, 32], strides = [1, 1]} : vector<8x128xf32> to vector<8x32xf32>
    %537 = arith.negf %536 : vector<8x32xf32>
    %538 = math.exp %537 : vector<8x32xf32>
    %cst_168 = arith.constant 1.000000e+00 : f32
    %539 = vector.broadcast %cst_168 : f32 to vector<8x32xf32>
    %540 = arith.addf %539, %538 : vector<8x32xf32>
    %541 = arith.divf %539, %540 : vector<8x32xf32>
    %542 = vector.extract_strided_slice %533 {offsets = [0, 32], sizes = [8, 32], strides = [1, 1]} : vector<8x64xf32> to vector<8x32xf32>
    %543 = arith.mulf %542, %492 : vector<8x32xf32>
    %544 = vector.extract_strided_slice %533 {offsets = [0, 0], sizes = [8, 32], strides = [1, 1]} : vector<8x64xf32> to vector<8x32xf32>
    %545 = arith.mulf %544, %535 : vector<8x32xf32>
    %546 = arith.addf %543, %545 : vector<8x32xf32>
    %547 = math.tanh %546 : vector<8x32xf32>
    %548 = arith.mulf %541, %547 : vector<8x32xf32>
    %549 = vector.extract_strided_slice %527 {offsets = [0, 0], sizes = [8, 64], strides = [1, 1]} : vector<8x128xf32> to vector<8x64xf32>
    %550 = arith.negf %549 : vector<8x64xf32>
    %551 = math.exp %550 : vector<8x64xf32>
    %cst_169 = arith.constant 1.000000e+00 : f32
    %552 = vector.broadcast %cst_169 : f32 to vector<8x64xf32>
    %553 = arith.addf %552, %551 : vector<8x64xf32>
    %554 = arith.divf %552, %553 : vector<8x64xf32>
    %555 = vector.extract_strided_slice %527 {offsets = [0, 64], sizes = [8, 32], strides = [1, 1]} : vector<8x128xf32> to vector<8x32xf32>
    %556 = math.tanh %555 : vector<8x32xf32>
    %557 = vector.extract_strided_slice %527 {offsets = [0, 96], sizes = [8, 32], strides = [1, 1]} : vector<8x128xf32> to vector<8x32xf32>
    %558 = arith.negf %557 : vector<8x32xf32>
    %559 = math.exp %558 : vector<8x32xf32>
    %cst_170 = arith.constant 1.000000e+00 : f32
    %560 = vector.broadcast %cst_170 : f32 to vector<8x32xf32>
    %561 = arith.addf %560, %559 : vector<8x32xf32>
    %562 = arith.divf %560, %561 : vector<8x32xf32>
    %563 = vector.extract_strided_slice %554 {offsets = [0, 32], sizes = [8, 32], strides = [1, 1]} : vector<8x64xf32> to vector<8x32xf32>
    %564 = arith.mulf %563, %513 : vector<8x32xf32>
    %565 = vector.extract_strided_slice %554 {offsets = [0, 0], sizes = [8, 32], strides = [1, 1]} : vector<8x64xf32> to vector<8x32xf32>
    %566 = arith.mulf %565, %556 : vector<8x32xf32>
    %567 = arith.addf %564, %566 : vector<8x32xf32>
    %568 = math.tanh %567 : vector<8x32xf32>
    %569 = arith.mulf %562, %568 : vector<8x32xf32>
    %570 = arith.truncf %548 : vector<8x32xf32> to vector<8x32xbf16>
    %c8_171 = arith.constant 8 : index
    %c0_172 = arith.constant 0 : index
    %571 = vector.load %arg11[%c8_171, %c0_172] : memref<64x64xbf16, #tpu.memory_space<vmem>>, vector<8x32xbf16>
    tpu.vector_store %arg11[%c8_171, %c0_172], %570 {strides = array<i32>} : memref<64x64xbf16, #tpu.memory_space<vmem>>, vector<8x32xbf16>,
    %572 = arith.truncf %569 : vector<8x32xf32> to vector<8x32xbf16>
    %c48_173 = arith.constant 48 : index
    %c32_174 = arith.constant 32 : index
    %573 = vector.load %arg11[%c48_173, %c32_174] : memref<64x64xbf16, #tpu.memory_space<vmem>>, vector<8x32xbf16>
    tpu.vector_store %arg11[%c48_173, %c32_174], %572 {strides = array<i32>} : memref<64x64xbf16, #tpu.memory_space<vmem>>, vector<8x32xbf16>,
    %c16_175 = arith.constant 16 : index
    %c0_176 = arith.constant 0 : index
    %574 = vector.load %arg12[%c16_175, %c0_176] : memref<64x256xf32, #tpu.memory_space<vmem>>, vector<8x128xf32>
    %575 = arith.truncf %548 : vector<8x32xf32> to vector<8x32xbf16>
    %cst_177 = arith.constant dense<0.000000e+00> : vector<8x128xf32>
    %576 = tpu.matmul %575, %459, %cst_177 {dimension_numbers = #tpu.dot_dimension_numbers<[1], [0], [0], [1], [0, 0, 1, 1], [], []>} : vector<8x32xbf16>, vector<32x128xbf16>, vector<8x128xf32> -> vector<8x128xf32>
    %577 = arith.addf %574, %576 : vector<8x128xf32>
    %c40_178 = arith.constant 40 : index
    %c128_179 = arith.constant 128 : index
    %578 = vector.load %arg12[%c40_178, %c128_179] : memref<64x256xf32, #tpu.memory_space<vmem>>, vector<8x128xf32>
    %579 = arith.truncf %569 : vector<8x32xf32> to vector<8x32xbf16>
    %cst_180 = arith.constant dense<0.000000e+00> : vector<8x128xf32>
    %580 = tpu.matmul %579, %461, %cst_180 {dimension_numbers = #tpu.dot_dimension_numbers<[1], [0], [0], [1], [0, 0, 1, 1], [], []>} : vector<8x32xbf16>, vector<32x128xbf16>, vector<8x128xf32> -> vector<8x128xf32>
    %581 = arith.addf %578, %580 : vector<8x128xf32>
    %582 = vector.extract_strided_slice %577 {offsets = [0, 0], sizes = [8, 64], strides = [1, 1]} : vector<8x128xf32> to vector<8x64xf32>
    %583 = arith.negf %582 : vector<8x64xf32>
    %584 = math.exp %583 : vector<8x64xf32>
    %cst_181 = arith.constant 1.000000e+00 : f32
    %585 = vector.broadcast %cst_181 : f32 to vector<8x64xf32>
    %586 = arith.addf %585, %584 : vector<8x64xf32>
    %587 = arith.divf %585, %586 : vector<8x64xf32>
    %588 = vector.extract_strided_slice %577 {offsets = [0, 64], sizes = [8, 32], strides = [1, 1]} : vector<8x128xf32> to vector<8x32xf32>
    %589 = math.tanh %588 : vector<8x32xf32>
    %590 = vector.extract_strided_slice %577 {offsets = [0, 96], sizes = [8, 32], strides = [1, 1]} : vector<8x128xf32> to vector<8x32xf32>
    %591 = arith.negf %590 : vector<8x32xf32>
    %592 = math.exp %591 : vector<8x32xf32>
    %cst_182 = arith.constant 1.000000e+00 : f32
    %593 = vector.broadcast %cst_182 : f32 to vector<8x32xf32>
    %594 = arith.addf %593, %592 : vector<8x32xf32>
    %595 = arith.divf %593, %594 : vector<8x32xf32>
    %596 = vector.extract_strided_slice %587 {offsets = [0, 32], sizes = [8, 32], strides = [1, 1]} : vector<8x64xf32> to vector<8x32xf32>
    %597 = arith.mulf %596, %546 : vector<8x32xf32>
    %598 = vector.extract_strided_slice %587 {offsets = [0, 0], sizes = [8, 32], strides = [1, 1]} : vector<8x64xf32> to vector<8x32xf32>
    %599 = arith.mulf %598, %589 : vector<8x32xf32>
    %600 = arith.addf %597, %599 : vector<8x32xf32>
    %601 = math.tanh %600 : vector<8x32xf32>
    %602 = arith.mulf %595, %601 : vector<8x32xf32>
    %603 = vector.extract_strided_slice %581 {offsets = [0, 0], sizes = [8, 64], strides = [1, 1]} : vector<8x128xf32> to vector<8x64xf32>
    %604 = arith.negf %603 : vector<8x64xf32>
    %605 = math.exp %604 : vector<8x64xf32>
    %cst_183 = arith.constant 1.000000e+00 : f32
    %606 = vector.broadcast %cst_183 : f32 to vector<8x64xf32>
    %607 = arith.addf %606, %605 : vector<8x64xf32>
    %608 = arith.divf %606, %607 : vector<8x64xf32>
    %609 = vector.extract_strided_slice %581 {offsets = [0, 64], sizes = [8, 32], strides = [1, 1]} : vector<8x128xf32> to vector<8x32xf32>
    %610 = math.tanh %609 : vector<8x32xf32>
    %611 = vector.extract_strided_slice %581 {offsets = [0, 96], sizes = [8, 32], strides = [1, 1]} : vector<8x128xf32> to vector<8x32xf32>
    %612 = arith.negf %611 : vector<8x32xf32>
    %613 = math.exp %612 : vector<8x32xf32>
    %cst_184 = arith.constant 1.000000e+00 : f32
    %614 = vector.broadcast %cst_184 : f32 to vector<8x32xf32>
    %615 = arith.addf %614, %613 : vector<8x32xf32>
    %616 = arith.divf %614, %615 : vector<8x32xf32>
    %617 = vector.extract_strided_slice %608 {offsets = [0, 32], sizes = [8, 32], strides = [1, 1]} : vector<8x64xf32> to vector<8x32xf32>
    %618 = arith.mulf %617, %567 : vector<8x32xf32>
    %619 = vector.extract_strided_slice %608 {offsets = [0, 0], sizes = [8, 32], strides = [1, 1]} : vector<8x64xf32> to vector<8x32xf32>
    %620 = arith.mulf %619, %610 : vector<8x32xf32>
    %621 = arith.addf %618, %620 : vector<8x32xf32>
    %622 = math.tanh %621 : vector<8x32xf32>
    %623 = arith.mulf %616, %622 : vector<8x32xf32>
    %624 = arith.truncf %602 : vector<8x32xf32> to vector<8x32xbf16>
    %c16_185 = arith.constant 16 : index
    %c0_186 = arith.constant 0 : index
    %625 = vector.load %arg11[%c16_185, %c0_186] : memref<64x64xbf16, #tpu.memory_space<vmem>>, vector<8x32xbf16>
    tpu.vector_store %arg11[%c16_185, %c0_186], %624 {strides = array<i32>} : memref<64x64xbf16, #tpu.memory_space<vmem>>, vector<8x32xbf16>,
    %626 = arith.truncf %623 : vector<8x32xf32> to vector<8x32xbf16>
    %c40_187 = arith.constant 40 : index
    %c32_188 = arith.constant 32 : index
    %627 = vector.load %arg11[%c40_187, %c32_188] : memref<64x64xbf16, #tpu.memory_space<vmem>>, vector<8x32xbf16>
    tpu.vector_store %arg11[%c40_187, %c32_188], %626 {strides = array<i32>} : memref<64x64xbf16, #tpu.memory_space<vmem>>, vector<8x32xbf16>,
    %c24_189 = arith.constant 24 : index
    %c0_190 = arith.constant 0 : index
    %628 = vector.load %arg12[%c24_189, %c0_190] : memref<64x256xf32, #tpu.memory_space<vmem>>, vector<8x128xf32>
    %629 = arith.truncf %602 : vector<8x32xf32> to vector<8x32xbf16>
    %cst_191 = arith.constant dense<0.000000e+00> : vector<8x128xf32>
    %630 = tpu.matmul %629, %459, %cst_191 {dimension_numbers = #tpu.dot_dimension_numbers<[1], [0], [0], [1], [0, 0, 1, 1], [], []>} : vector<8x32xbf16>, vector<32x128xbf16>, vector<8x128xf32> -> vector<8x128xf32>
    %631 = arith.addf %628, %630 : vector<8x128xf32>
    %c32_192 = arith.constant 32 : index
    %c128_193 = arith.constant 128 : index
    %632 = vector.load %arg12[%c32_192, %c128_193] : memref<64x256xf32, #tpu.memory_space<vmem>>, vector<8x128xf32>
    %633 = arith.truncf %623 : vector<8x32xf32> to vector<8x32xbf16>
    %cst_194 = arith.constant dense<0.000000e+00> : vector<8x128xf32>
    %634 = tpu.matmul %633, %461, %cst_194 {dimension_numbers = #tpu.dot_dimension_numbers<[1], [0], [0], [1], [0, 0, 1, 1], [], []>} : vector<8x32xbf16>, vector<32x128xbf16>, vector<8x128xf32> -> vector<8x128xf32>
    %635 = arith.addf %632, %634 : vector<8x128xf32>
    %636 = vector.extract_strided_slice %631 {offsets = [0, 0], sizes = [8, 64], strides = [1, 1]} : vector<8x128xf32> to vector<8x64xf32>
    %637 = arith.negf %636 : vector<8x64xf32>
    %638 = math.exp %637 : vector<8x64xf32>
    %cst_195 = arith.constant 1.000000e+00 : f32
    %639 = vector.broadcast %cst_195 : f32 to vector<8x64xf32>
    %640 = arith.addf %639, %638 : vector<8x64xf32>
    %641 = arith.divf %639, %640 : vector<8x64xf32>
    %642 = vector.extract_strided_slice %631 {offsets = [0, 64], sizes = [8, 32], strides = [1, 1]} : vector<8x128xf32> to vector<8x32xf32>
    %643 = math.tanh %642 : vector<8x32xf32>
    %644 = vector.extract_strided_slice %631 {offsets = [0, 96], sizes = [8, 32], strides = [1, 1]} : vector<8x128xf32> to vector<8x32xf32>
    %645 = arith.negf %644 : vector<8x32xf32>
    %646 = math.exp %645 : vector<8x32xf32>
    %cst_196 = arith.constant 1.000000e+00 : f32
    %647 = vector.broadcast %cst_196 : f32 to vector<8x32xf32>
    %648 = arith.addf %647, %646 : vector<8x32xf32>
    %649 = arith.divf %647, %648 : vector<8x32xf32>
    %650 = vector.extract_strided_slice %641 {offsets = [0, 32], sizes = [8, 32], strides = [1, 1]} : vector<8x64xf32> to vector<8x32xf32>
    %651 = arith.mulf %650, %600 : vector<8x32xf32>
    %652 = vector.extract_strided_slice %641 {offsets = [0, 0], sizes = [8, 32], strides = [1, 1]} : vector<8x64xf32> to vector<8x32xf32>
    %653 = arith.mulf %652, %643 : vector<8x32xf32>
    %654 = arith.addf %651, %653 : vector<8x32xf32>
    %655 = math.tanh %654 : vector<8x32xf32>
    %656 = arith.mulf %649, %655 : vector<8x32xf32>
    %657 = vector.extract_strided_slice %635 {offsets = [0, 0], sizes = [8, 64], strides = [1, 1]} : vector<8x128xf32> to vector<8x64xf32>
    %658 = arith.negf %657 : vector<8x64xf32>
    %659 = math.exp %658 : vector<8x64xf32>
    %cst_197 = arith.constant 1.000000e+00 : f32
    %660 = vector.broadcast %cst_197 : f32 to vector<8x64xf32>
    %661 = arith.addf %660, %659 : vector<8x64xf32>
    %662 = arith.divf %660, %661 : vector<8x64xf32>
    %663 = vector.extract_strided_slice %635 {offsets = [0, 64], sizes = [8, 32], strides = [1, 1]} : vector<8x128xf32> to vector<8x32xf32>
    %664 = math.tanh %663 : vector<8x32xf32>
    %665 = vector.extract_strided_slice %635 {offsets = [0, 96], sizes = [8, 32], strides = [1, 1]} : vector<8x128xf32> to vector<8x32xf32>
    %666 = arith.negf %665 : vector<8x32xf32>
    %667 = math.exp %666 : vector<8x32xf32>
    %cst_198 = arith.constant 1.000000e+00 : f32
    %668 = vector.broadcast %cst_198 : f32 to vector<8x32xf32>
    %669 = arith.addf %668, %667 : vector<8x32xf32>
    %670 = arith.divf %668, %669 : vector<8x32xf32>
    %671 = vector.extract_strided_slice %662 {offsets = [0, 32], sizes = [8, 32], strides = [1, 1]} : vector<8x64xf32> to vector<8x32xf32>
    %672 = arith.mulf %671, %621 : vector<8x32xf32>
    %673 = vector.extract_strided_slice %662 {offsets = [0, 0], sizes = [8, 32], strides = [1, 1]} : vector<8x64xf32> to vector<8x32xf32>
    %674 = arith.mulf %673, %664 : vector<8x32xf32>
    %675 = arith.addf %672, %674 : vector<8x32xf32>
    %676 = math.tanh %675 : vector<8x32xf32>
    %677 = arith.mulf %670, %676 : vector<8x32xf32>
    %678 = arith.truncf %656 : vector<8x32xf32> to vector<8x32xbf16>
    %c24_199 = arith.constant 24 : index
    %c0_200 = arith.constant 0 : index
    %679 = vector.load %arg11[%c24_199, %c0_200] : memref<64x64xbf16, #tpu.memory_space<vmem>>, vector<8x32xbf16>
    tpu.vector_store %arg11[%c24_199, %c0_200], %678 {strides = array<i32>} : memref<64x64xbf16, #tpu.memory_space<vmem>>, vector<8x32xbf16>,
    %680 = arith.truncf %677 : vector<8x32xf32> to vector<8x32xbf16>
    %c32_201 = arith.constant 32 : index
    %c32_202 = arith.constant 32 : index
    %681 = vector.load %arg11[%c32_201, %c32_202] : memref<64x64xbf16, #tpu.memory_space<vmem>>, vector<8x32xbf16>
    tpu.vector_store %arg11[%c32_201, %c32_202], %680 {strides = array<i32>} : memref<64x64xbf16, #tpu.memory_space<vmem>>, vector<8x32xbf16>,
    %c32_203 = arith.constant 32 : index
    %c0_204 = arith.constant 0 : index
    %682 = vector.load %arg12[%c32_203, %c0_204] : memref<64x256xf32, #tpu.memory_space<vmem>>, vector<8x128xf32>
    %683 = arith.truncf %656 : vector<8x32xf32> to vector<8x32xbf16>
    %cst_205 = arith.constant dense<0.000000e+00> : vector<8x128xf32>
    %684 = tpu.matmul %683, %459, %cst_205 {dimension_numbers = #tpu.dot_dimension_numbers<[1], [0], [0], [1], [0, 0, 1, 1], [], []>} : vector<8x32xbf16>, vector<32x128xbf16>, vector<8x128xf32> -> vector<8x128xf32>
    %685 = arith.addf %682, %684 : vector<8x128xf32>
    %c24_206 = arith.constant 24 : index
    %c128_207 = arith.constant 128 : index
    %686 = vector.load %arg12[%c24_206, %c128_207] : memref<64x256xf32, #tpu.memory_space<vmem>>, vector<8x128xf32>
    %687 = arith.truncf %677 : vector<8x32xf32> to vector<8x32xbf16>
    %cst_208 = arith.constant dense<0.000000e+00> : vector<8x128xf32>
    %688 = tpu.matmul %687, %461, %cst_208 {dimension_numbers = #tpu.dot_dimension_numbers<[1], [0], [0], [1], [0, 0, 1, 1], [], []>} : vector<8x32xbf16>, vector<32x128xbf16>, vector<8x128xf32> -> vector<8x128xf32>
    %689 = arith.addf %686, %688 : vector<8x128xf32>
    %690 = vector.extract_strided_slice %685 {offsets = [0, 0], sizes = [8, 64], strides = [1, 1]} : vector<8x128xf32> to vector<8x64xf32>
    %691 = arith.negf %690 : vector<8x64xf32>
    %692 = math.exp %691 : vector<8x64xf32>
    %cst_209 = arith.constant 1.000000e+00 : f32
    %693 = vector.broadcast %cst_209 : f32 to vector<8x64xf32>
    %694 = arith.addf %693, %692 : vector<8x64xf32>
    %695 = arith.divf %693, %694 : vector<8x64xf32>
    %696 = vector.extract_strided_slice %685 {offsets = [0, 64], sizes = [8, 32], strides = [1, 1]} : vector<8x128xf32> to vector<8x32xf32>
    %697 = math.tanh %696 : vector<8x32xf32>
    %698 = vector.extract_strided_slice %685 {offsets = [0, 96], sizes = [8, 32], strides = [1, 1]} : vector<8x128xf32> to vector<8x32xf32>
    %699 = arith.negf %698 : vector<8x32xf32>
    %700 = math.exp %699 : vector<8x32xf32>
    %cst_210 = arith.constant 1.000000e+00 : f32
    %701 = vector.broadcast %cst_210 : f32 to vector<8x32xf32>
    %702 = arith.addf %701, %700 : vector<8x32xf32>
    %703 = arith.divf %701, %702 : vector<8x32xf32>
    %704 = vector.extract_strided_slice %695 {offsets = [0, 32], sizes = [8, 32], strides = [1, 1]} : vector<8x64xf32> to vector<8x32xf32>
    %705 = arith.mulf %704, %654 : vector<8x32xf32>
    %706 = vector.extract_strided_slice %695 {offsets = [0, 0], sizes = [8, 32], strides = [1, 1]} : vector<8x64xf32> to vector<8x32xf32>
    %707 = arith.mulf %706, %697 : vector<8x32xf32>
    %708 = arith.addf %705, %707 : vector<8x32xf32>
    %709 = math.tanh %708 : vector<8x32xf32>
    %710 = arith.mulf %703, %709 : vector<8x32xf32>
    %711 = vector.extract_strided_slice %689 {offsets = [0, 0], sizes = [8, 64], strides = [1, 1]} : vector<8x128xf32> to vector<8x64xf32>
    %712 = arith.negf %711 : vector<8x64xf32>
    %713 = math.exp %712 : vector<8x64xf32>
    %cst_211 = arith.constant 1.000000e+00 : f32
    %714 = vector.broadcast %cst_211 : f32 to vector<8x64xf32>
    %715 = arith.addf %714, %713 : vector<8x64xf32>
    %716 = arith.divf %714, %715 : vector<8x64xf32>
    %717 = vector.extract_strided_slice %689 {offsets = [0, 64], sizes = [8, 32], strides = [1, 1]} : vector<8x128xf32> to vector<8x32xf32>
    %718 = math.tanh %717 : vector<8x32xf32>
    %719 = vector.extract_strided_slice %689 {offsets = [0, 96], sizes = [8, 32], strides = [1, 1]} : vector<8x128xf32> to vector<8x32xf32>
    %720 = arith.negf %719 : vector<8x32xf32>
    %721 = math.exp %720 : vector<8x32xf32>
    %cst_212 = arith.constant 1.000000e+00 : f32
    %722 = vector.broadcast %cst_212 : f32 to vector<8x32xf32>
    %723 = arith.addf %722, %721 : vector<8x32xf32>
    %724 = arith.divf %722, %723 : vector<8x32xf32>
    %725 = vector.extract_strided_slice %716 {offsets = [0, 32], sizes = [8, 32], strides = [1, 1]} : vector<8x64xf32> to vector<8x32xf32>
    %726 = arith.mulf %725, %675 : vector<8x32xf32>
    %727 = vector.extract_strided_slice %716 {offsets = [0, 0], sizes = [8, 32], strides = [1, 1]} : vector<8x64xf32> to vector<8x32xf32>
    %728 = arith.mulf %727, %718 : vector<8x32xf32>
    %729 = arith.addf %726, %728 : vector<8x32xf32>
    %730 = math.tanh %729 : vector<8x32xf32>
    %731 = arith.mulf %724, %730 : vector<8x32xf32>
    %732 = arith.truncf %710 : vector<8x32xf32> to vector<8x32xbf16>
    %c32_213 = arith.constant 32 : index
    %c0_214 = arith.constant 0 : index
    %733 = vector.load %arg11[%c32_213, %c0_214] : memref<64x64xbf16, #tpu.memory_space<vmem>>, vector<8x32xbf16>
    tpu.vector_store %arg11[%c32_213, %c0_214], %732 {strides = array<i32>} : memref<64x64xbf16, #tpu.memory_space<vmem>>, vector<8x32xbf16>,
    %734 = arith.truncf %731 : vector<8x32xf32> to vector<8x32xbf16>
    %c24_215 = arith.constant 24 : index
    %c32_216 = arith.constant 32 : index
    %735 = vector.load %arg11[%c24_215, %c32_216] : memref<64x64xbf16, #tpu.memory_space<vmem>>, vector<8x32xbf16>
    tpu.vector_store %arg11[%c24_215, %c32_216], %734 {strides = array<i32>} : memref<64x64xbf16, #tpu.memory_space<vmem>>, vector<8x32xbf16>,
    %c40_217 = arith.constant 40 : index
    %c0_218 = arith.constant 0 : index
    %736 = vector.load %arg12[%c40_217, %c0_218] : memref<64x256xf32, #tpu.memory_space<vmem>>, vector<8x128xf32>
    %737 = arith.truncf %710 : vector<8x32xf32> to vector<8x32xbf16>
    %cst_219 = arith.constant dense<0.000000e+00> : vector<8x128xf32>
    %738 = tpu.matmul %737, %459, %cst_219 {dimension_numbers = #tpu.dot_dimension_numbers<[1], [0], [0], [1], [0, 0, 1, 1], [], []>} : vector<8x32xbf16>, vector<32x128xbf16>, vector<8x128xf32> -> vector<8x128xf32>
    %739 = arith.addf %736, %738 : vector<8x128xf32>
    %c16_220 = arith.constant 16 : index
    %c128_221 = arith.constant 128 : index
    %740 = vector.load %arg12[%c16_220, %c128_221] : memref<64x256xf32, #tpu.memory_space<vmem>>, vector<8x128xf32>
    %741 = arith.truncf %731 : vector<8x32xf32> to vector<8x32xbf16>
    %cst_222 = arith.constant dense<0.000000e+00> : vector<8x128xf32>
    %742 = tpu.matmul %741, %461, %cst_222 {dimension_numbers = #tpu.dot_dimension_numbers<[1], [0], [0], [1], [0, 0, 1, 1], [], []>} : vector<8x32xbf16>, vector<32x128xbf16>, vector<8x128xf32> -> vector<8x128xf32>
    %743 = arith.addf %740, %742 : vector<8x128xf32>
    %744 = vector.extract_strided_slice %739 {offsets = [0, 0], sizes = [8, 64], strides = [1, 1]} : vector<8x128xf32> to vector<8x64xf32>
    %745 = arith.negf %744 : vector<8x64xf32>
    %746 = math.exp %745 : vector<8x64xf32>
    %cst_223 = arith.constant 1.000000e+00 : f32
    %747 = vector.broadcast %cst_223 : f32 to vector<8x64xf32>
    %748 = arith.addf %747, %746 : vector<8x64xf32>
    %749 = arith.divf %747, %748 : vector<8x64xf32>
    %750 = vector.extract_strided_slice %739 {offsets = [0, 64], sizes = [8, 32], strides = [1, 1]} : vector<8x128xf32> to vector<8x32xf32>
    %751 = math.tanh %750 : vector<8x32xf32>
    %752 = vector.extract_strided_slice %739 {offsets = [0, 96], sizes = [8, 32], strides = [1, 1]} : vector<8x128xf32> to vector<8x32xf32>
    %753 = arith.negf %752 : vector<8x32xf32>
    %754 = math.exp %753 : vector<8x32xf32>
    %cst_224 = arith.constant 1.000000e+00 : f32
    %755 = vector.broadcast %cst_224 : f32 to vector<8x32xf32>
    %756 = arith.addf %755, %754 : vector<8x32xf32>
    %757 = arith.divf %755, %756 : vector<8x32xf32>
    %758 = vector.extract_strided_slice %749 {offsets = [0, 32], sizes = [8, 32], strides = [1, 1]} : vector<8x64xf32> to vector<8x32xf32>
    %759 = arith.mulf %758, %708 : vector<8x32xf32>
    %760 = vector.extract_strided_slice %749 {offsets = [0, 0], sizes = [8, 32], strides = [1, 1]} : vector<8x64xf32> to vector<8x32xf32>
    %761 = arith.mulf %760, %751 : vector<8x32xf32>
    %762 = arith.addf %759, %761 : vector<8x32xf32>
    %763 = math.tanh %762 : vector<8x32xf32>
    %764 = arith.mulf %757, %763 : vector<8x32xf32>
    %765 = vector.extract_strided_slice %743 {offsets = [0, 0], sizes = [8, 64], strides = [1, 1]} : vector<8x128xf32> to vector<8x64xf32>
    %766 = arith.negf %765 : vector<8x64xf32>
    %767 = math.exp %766 : vector<8x64xf32>
    %cst_225 = arith.constant 1.000000e+00 : f32
    %768 = vector.broadcast %cst_225 : f32 to vector<8x64xf32>
    %769 = arith.addf %768, %767 : vector<8x64xf32>
    %770 = arith.divf %768, %769 : vector<8x64xf32>
    %771 = vector.extract_strided_slice %743 {offsets = [0, 64], sizes = [8, 32], strides = [1, 1]} : vector<8x128xf32> to vector<8x32xf32>
    %772 = math.tanh %771 : vector<8x32xf32>
    %773 = vector.extract_strided_slice %743 {offsets = [0, 96], sizes = [8, 32], strides = [1, 1]} : vector<8x128xf32> to vector<8x32xf32>
    %774 = arith.negf %773 : vector<8x32xf32>
    %775 = math.exp %774 : vector<8x32xf32>
    %cst_226 = arith.constant 1.000000e+00 : f32
    %776 = vector.broadcast %cst_226 : f32 to vector<8x32xf32>
    %777 = arith.addf %776, %775 : vector<8x32xf32>
    %778 = arith.divf %776, %777 : vector<8x32xf32>
    %779 = vector.extract_strided_slice %770 {offsets = [0, 32], sizes = [8, 32], strides = [1, 1]} : vector<8x64xf32> to vector<8x32xf32>
    %780 = arith.mulf %779, %729 : vector<8x32xf32>
    %781 = vector.extract_strided_slice %770 {offsets = [0, 0], sizes = [8, 32], strides = [1, 1]} : vector<8x64xf32> to vector<8x32xf32>
    %782 = arith.mulf %781, %772 : vector<8x32xf32>
    %783 = arith.addf %780, %782 : vector<8x32xf32>
    %784 = math.tanh %783 : vector<8x32xf32>
    %785 = arith.mulf %778, %784 : vector<8x32xf32>
    %786 = arith.truncf %764 : vector<8x32xf32> to vector<8x32xbf16>
    %c40_227 = arith.constant 40 : index
    %c0_228 = arith.constant 0 : index
    %787 = vector.load %arg11[%c40_227, %c0_228] : memref<64x64xbf16, #tpu.memory_space<vmem>>, vector<8x32xbf16>
    tpu.vector_store %arg11[%c40_227, %c0_228], %786 {strides = array<i32>} : memref<64x64xbf16, #tpu.memory_space<vmem>>, vector<8x32xbf16>,
    %788 = arith.truncf %785 : vector<8x32xf32> to vector<8x32xbf16>
    %c16_229 = arith.constant 16 : index
    %c32_230 = arith.constant 32 : index
    %789 = vector.load %arg11[%c16_229, %c32_230] : memref<64x64xbf16, #tpu.memory_space<vmem>>, vector<8x32xbf16>
    tpu.vector_store %arg11[%c16_229, %c32_230], %788 {strides = array<i32>} : memref<64x64xbf16, #tpu.memory_space<vmem>>, vector<8x32xbf16>,
    %c48_231 = arith.constant 48 : index
    %c0_232 = arith.constant 0 : index
    %790 = vector.load %arg12[%c48_231, %c0_232] : memref<64x256xf32, #tpu.memory_space<vmem>>, vector<8x128xf32>
    %791 = arith.truncf %764 : vector<8x32xf32> to vector<8x32xbf16>
    %cst_233 = arith.constant dense<0.000000e+00> : vector<8x128xf32>
    %792 = tpu.matmul %791, %459, %cst_233 {dimension_numbers = #tpu.dot_dimension_numbers<[1], [0], [0], [1], [0, 0, 1, 1], [], []>} : vector<8x32xbf16>, vector<32x128xbf16>, vector<8x128xf32> -> vector<8x128xf32>
    %793 = arith.addf %790, %792 : vector<8x128xf32>
    %c8_234 = arith.constant 8 : index
    %c128_235 = arith.constant 128 : index
    %794 = vector.load %arg12[%c8_234, %c128_235] : memref<64x256xf32, #tpu.memory_space<vmem>>, vector<8x128xf32>
    %795 = arith.truncf %785 : vector<8x32xf32> to vector<8x32xbf16>
    %cst_236 = arith.constant dense<0.000000e+00> : vector<8x128xf32>
    %796 = tpu.matmul %795, %461, %cst_236 {dimension_numbers = #tpu.dot_dimension_numbers<[1], [0], [0], [1], [0, 0, 1, 1], [], []>} : vector<8x32xbf16>, vector<32x128xbf16>, vector<8x128xf32> -> vector<8x128xf32>
    %797 = arith.addf %794, %796 : vector<8x128xf32>
    %798 = vector.extract_strided_slice %793 {offsets = [0, 0], sizes = [8, 64], strides = [1, 1]} : vector<8x128xf32> to vector<8x64xf32>
    %799 = arith.negf %798 : vector<8x64xf32>
    %800 = math.exp %799 : vector<8x64xf32>
    %cst_237 = arith.constant 1.000000e+00 : f32
    %801 = vector.broadcast %cst_237 : f32 to vector<8x64xf32>
    %802 = arith.addf %801, %800 : vector<8x64xf32>
    %803 = arith.divf %801, %802 : vector<8x64xf32>
    %804 = vector.extract_strided_slice %793 {offsets = [0, 64], sizes = [8, 32], strides = [1, 1]} : vector<8x128xf32> to vector<8x32xf32>
    %805 = math.tanh %804 : vector<8x32xf32>
    %806 = vector.extract_strided_slice %793 {offsets = [0, 96], sizes = [8, 32], strides = [1, 1]} : vector<8x128xf32> to vector<8x32xf32>
    %807 = arith.negf %806 : vector<8x32xf32>
    %808 = math.exp %807 : vector<8x32xf32>
    %cst_238 = arith.constant 1.000000e+00 : f32
    %809 = vector.broadcast %cst_238 : f32 to vector<8x32xf32>
    %810 = arith.addf %809, %808 : vector<8x32xf32>
    %811 = arith.divf %809, %810 : vector<8x32xf32>
    %812 = vector.extract_strided_slice %803 {offsets = [0, 32], sizes = [8, 32], strides = [1, 1]} : vector<8x64xf32> to vector<8x32xf32>
    %813 = arith.mulf %812, %762 : vector<8x32xf32>
    %814 = vector.extract_strided_slice %803 {offsets = [0, 0], sizes = [8, 32], strides = [1, 1]} : vector<8x64xf32> to vector<8x32xf32>
    %815 = arith.mulf %814, %805 : vector<8x32xf32>
    %816 = arith.addf %813, %815 : vector<8x32xf32>
    %817 = math.tanh %816 : vector<8x32xf32>
    %818 = arith.mulf %811, %817 : vector<8x32xf32>
    %819 = vector.extract_strided_slice %797 {offsets = [0, 0], sizes = [8, 64], strides = [1, 1]} : vector<8x128xf32> to vector<8x64xf32>
    %820 = arith.negf %819 : vector<8x64xf32>
    %821 = math.exp %820 : vector<8x64xf32>
    %cst_239 = arith.constant 1.000000e+00 : f32
    %822 = vector.broadcast %cst_239 : f32 to vector<8x64xf32>
    %823 = arith.addf %822, %821 : vector<8x64xf32>
    %824 = arith.divf %822, %823 : vector<8x64xf32>
    %825 = vector.extract_strided_slice %797 {offsets = [0, 64], sizes = [8, 32], strides = [1, 1]} : vector<8x128xf32> to vector<8x32xf32>
    %826 = math.tanh %825 : vector<8x32xf32>
    %827 = vector.extract_strided_slice %797 {offsets = [0, 96], sizes = [8, 32], strides = [1, 1]} : vector<8x128xf32> to vector<8x32xf32>
    %828 = arith.negf %827 : vector<8x32xf32>
    %829 = math.exp %828 : vector<8x32xf32>
    %cst_240 = arith.constant 1.000000e+00 : f32
    %830 = vector.broadcast %cst_240 : f32 to vector<8x32xf32>
    %831 = arith.addf %830, %829 : vector<8x32xf32>
    %832 = arith.divf %830, %831 : vector<8x32xf32>
    %833 = vector.extract_strided_slice %824 {offsets = [0, 32], sizes = [8, 32], strides = [1, 1]} : vector<8x64xf32> to vector<8x32xf32>
    %834 = arith.mulf %833, %783 : vector<8x32xf32>
    %835 = vector.extract_strided_slice %824 {offsets = [0, 0], sizes = [8, 32], strides = [1, 1]} : vector<8x64xf32> to vector<8x32xf32>
    %836 = arith.mulf %835, %826 : vector<8x32xf32>
    %837 = arith.addf %834, %836 : vector<8x32xf32>
    %838 = math.tanh %837 : vector<8x32xf32>
    %839 = arith.mulf %832, %838 : vector<8x32xf32>
    %840 = arith.truncf %818 : vector<8x32xf32> to vector<8x32xbf16>
    %c48_241 = arith.constant 48 : index
    %c0_242 = arith.constant 0 : index
    %841 = vector.load %arg11[%c48_241, %c0_242] : memref<64x64xbf16, #tpu.memory_space<vmem>>, vector<8x32xbf16>
    tpu.vector_store %arg11[%c48_241, %c0_242], %840 {strides = array<i32>} : memref<64x64xbf16, #tpu.memory_space<vmem>>, vector<8x32xbf16>,
    %842 = arith.truncf %839 : vector<8x32xf32> to vector<8x32xbf16>
    %c8_243 = arith.constant 8 : index
    %c32_244 = arith.constant 32 : index
    %843 = vector.load %arg11[%c8_243, %c32_244] : memref<64x64xbf16, #tpu.memory_space<vmem>>, vector<8x32xbf16>
    tpu.vector_store %arg11[%c8_243, %c32_244], %842 {strides = array<i32>} : memref<64x64xbf16, #tpu.memory_space<vmem>>, vector<8x32xbf16>,
    %c56_245 = arith.constant 56 : index
    %c0_246 = arith.constant 0 : index
    %844 = vector.load %arg12[%c56_245, %c0_246] : memref<64x256xf32, #tpu.memory_space<vmem>>, vector<8x128xf32>
    %845 = arith.truncf %818 : vector<8x32xf32> to vector<8x32xbf16>
    %cst_247 = arith.constant dense<0.000000e+00> : vector<8x128xf32>
    %846 = tpu.matmul %845, %459, %cst_247 {dimension_numbers = #tpu.dot_dimension_numbers<[1], [0], [0], [1], [0, 0, 1, 1], [], []>} : vector<8x32xbf16>, vector<32x128xbf16>, vector<8x128xf32> -> vector<8x128xf32>
    %847 = arith.addf %844, %846 : vector<8x128xf32>
    %c0_248 = arith.constant 0 : index
    %c128_249 = arith.constant 128 : index
    %848 = vector.load %arg12[%c0_248, %c128_249] : memref<64x256xf32, #tpu.memory_space<vmem>>, vector<8x128xf32>
    %849 = arith.truncf %839 : vector<8x32xf32> to vector<8x32xbf16>
    %cst_250 = arith.constant dense<0.000000e+00> : vector<8x128xf32>
    %850 = tpu.matmul %849, %461, %cst_250 {dimension_numbers = #tpu.dot_dimension_numbers<[1], [0], [0], [1], [0, 0, 1, 1], [], []>} : vector<8x32xbf16>, vector<32x128xbf16>, vector<8x128xf32> -> vector<8x128xf32>
    %851 = arith.addf %848, %850 : vector<8x128xf32>
    %852 = vector.extract_strided_slice %847 {offsets = [0, 0], sizes = [8, 64], strides = [1, 1]} : vector<8x128xf32> to vector<8x64xf32>
    %853 = arith.negf %852 : vector<8x64xf32>
    %854 = math.exp %853 : vector<8x64xf32>
    %cst_251 = arith.constant 1.000000e+00 : f32
    %855 = vector.broadcast %cst_251 : f32 to vector<8x64xf32>
    %856 = arith.addf %855, %854 : vector<8x64xf32>
    %857 = arith.divf %855, %856 : vector<8x64xf32>
    %858 = vector.extract_strided_slice %847 {offsets = [0, 64], sizes = [8, 32], strides = [1, 1]} : vector<8x128xf32> to vector<8x32xf32>
    %859 = math.tanh %858 : vector<8x32xf32>
    %860 = vector.extract_strided_slice %847 {offsets = [0, 96], sizes = [8, 32], strides = [1, 1]} : vector<8x128xf32> to vector<8x32xf32>
    %861 = arith.negf %860 : vector<8x32xf32>
    %862 = math.exp %861 : vector<8x32xf32>
    %cst_252 = arith.constant 1.000000e+00 : f32
    %863 = vector.broadcast %cst_252 : f32 to vector<8x32xf32>
    %864 = arith.addf %863, %862 : vector<8x32xf32>
    %865 = arith.divf %863, %864 : vector<8x32xf32>
    %866 = vector.extract_strided_slice %857 {offsets = [0, 32], sizes = [8, 32], strides = [1, 1]} : vector<8x64xf32> to vector<8x32xf32>
    %867 = arith.mulf %866, %816 : vector<8x32xf32>
    %868 = vector.extract_strided_slice %857 {offsets = [0, 0], sizes = [8, 32], strides = [1, 1]} : vector<8x64xf32> to vector<8x32xf32>
    %869 = arith.mulf %868, %859 : vector<8x32xf32>
    %870 = arith.addf %867, %869 : vector<8x32xf32>
    %871 = math.tanh %870 : vector<8x32xf32>
    %872 = arith.mulf %865, %871 : vector<8x32xf32>
    %873 = vector.extract_strided_slice %851 {offsets = [0, 0], sizes = [8, 64], strides = [1, 1]} : vector<8x128xf32> to vector<8x64xf32>
    %874 = arith.negf %873 : vector<8x64xf32>
    %875 = math.exp %874 : vector<8x64xf32>
    %cst_253 = arith.constant 1.000000e+00 : f32
    %876 = vector.broadcast %cst_253 : f32 to vector<8x64xf32>
    %877 = arith.addf %876, %875 : vector<8x64xf32>
    %878 = arith.divf %876, %877 : vector<8x64xf32>
    %879 = vector.extract_strided_slice %851 {offsets = [0, 64], sizes = [8, 32], strides = [1, 1]} : vector<8x128xf32> to vector<8x32xf32>
    %880 = math.tanh %879 : vector<8x32xf32>
    %881 = vector.extract_strided_slice %851 {offsets = [0, 96], sizes = [8, 32], strides = [1, 1]} : vector<8x128xf32> to vector<8x32xf32>
    %882 = arith.negf %881 : vector<8x32xf32>
    %883 = math.exp %882 : vector<8x32xf32>
    %cst_254 = arith.constant 1.000000e+00 : f32
    %884 = vector.broadcast %cst_254 : f32 to vector<8x32xf32>
    %885 = arith.addf %884, %883 : vector<8x32xf32>
    %886 = arith.divf %884, %885 : vector<8x32xf32>
    %887 = vector.extract_strided_slice %878 {offsets = [0, 32], sizes = [8, 32], strides = [1, 1]} : vector<8x64xf32> to vector<8x32xf32>
    %888 = arith.mulf %887, %837 : vector<8x32xf32>
    %889 = vector.extract_strided_slice %878 {offsets = [0, 0], sizes = [8, 32], strides = [1, 1]} : vector<8x64xf32> to vector<8x32xf32>
    %890 = arith.mulf %889, %880 : vector<8x32xf32>
    %891 = arith.addf %888, %890 : vector<8x32xf32>
    %892 = math.tanh %891 : vector<8x32xf32>
    %893 = arith.mulf %886, %892 : vector<8x32xf32>
    %894 = arith.truncf %872 : vector<8x32xf32> to vector<8x32xbf16>
    %c56_255 = arith.constant 56 : index
    %c0_256 = arith.constant 0 : index
    %895 = vector.load %arg11[%c56_255, %c0_256] : memref<64x64xbf16, #tpu.memory_space<vmem>>, vector<8x32xbf16>
    tpu.vector_store %arg11[%c56_255, %c0_256], %894 {strides = array<i32>} : memref<64x64xbf16, #tpu.memory_space<vmem>>, vector<8x32xbf16>,
    %896 = arith.truncf %893 : vector<8x32xf32> to vector<8x32xbf16>
    %c0_257 = arith.constant 0 : index
    %c32_258 = arith.constant 32 : index
    %897 = vector.load %arg11[%c0_257, %c32_258] : memref<64x64xbf16, #tpu.memory_space<vmem>>, vector<8x32xbf16>
    tpu.vector_store %arg11[%c0_257, %c32_258], %896 {strides = array<i32>} : memref<64x64xbf16, #tpu.memory_space<vmem>>, vector<8x32xbf16>,
    %c0_259 = arith.constant 0 : index
    %c0_260 = arith.constant 0 : index
    %898 = vector.load %arg11[%c0_259, %c0_260] : memref<64x64xbf16, #tpu.memory_space<vmem>>, vector<64x64xbf16>
    %c2 = arith.constant 2 : index
    %c0_261 = arith.constant 0 : index
    %c0_262 = arith.constant 0 : index
    %899 = vector.load %arg1[%c2, %c0_261, %c0_262] : memref<3x64x256xbf16, #tpu.memory_space<vmem>>, vector<1x64x256xbf16>
    %900 = vector.shape_cast %899 : vector<1x64x256xbf16> to vector<64x256xbf16>
    %cst_263 = arith.constant dense<0.000000e+00> : vector<64x256xf32>
    %901 = tpu.matmul %898, %900, %cst_263 {dimension_numbers = #tpu.dot_dimension_numbers<[1], [0], [0], [1], [0, 0, 1, 1], [], []>} : vector<64x64xbf16>, vector<64x256xbf16>, vector<64x256xf32> -> vector<64x256xf32>
    %c2_264 = arith.constant 2 : index
    %c0_265 = arith.constant 0 : index
    %c0_266 = arith.constant 0 : index
    %902 = vector.load %arg3[%c2_264, %c0_265, %c0_266] : memref<3x1x256xf32, #tpu.memory_space<vmem>>, vector<1x1x256xf32>
    %903 = vector.shape_cast %902 : vector<1x1x256xf32> to vector<1x256xf32>
    %904 = vector.broadcast %903 : vector<1x256xf32> to vector<64x256xf32>
    %905 = arith.addf %901, %904 : vector<64x256xf32>
    %c0_267 = arith.constant 0 : index
    %c0_268 = arith.constant 0 : index
    %906 = vector.load %arg12[%c0_267, %c0_268] : memref<64x256xf32, #tpu.memory_space<vmem>>, vector<64x256xf32>
    tpu.vector_store %arg12[%c0_267, %c0_268], %905 {strides = array<i32>} : memref<64x256xf32, #tpu.memory_space<vmem>>, vector<64x256xf32>,
    %c2_269 = arith.constant 2 : index
    %c0_270 = arith.constant 0 : index
    %c0_271 = arith.constant 0 : index
    %c0_272 = arith.constant 0 : index
    %907 = vector.load %arg2[%c2_269, %c0_270, %c0_271, %c0_272] : memref<3x2x32x128xbf16, #tpu.memory_space<vmem>>, vector<1x1x32x128xbf16>
    %908 = vector.shape_cast %907 : vector<1x1x32x128xbf16> to vector<32x128xbf16>
    %c2_273 = arith.constant 2 : index
    %c1_274 = arith.constant 1 : index
    %c0_275 = arith.constant 0 : index
    %c0_276 = arith.constant 0 : index
    %909 = vector.load %arg2[%c2_273, %c1_274, %c0_275, %c0_276] : memref<3x2x32x128xbf16, #tpu.memory_space<vmem>>, vector<1x1x32x128xbf16>
    %910 = vector.shape_cast %909 : vector<1x1x32x128xbf16> to vector<32x128xbf16>
    %cst_277 = arith.constant 0.000000e+00 : f32
    %911 = vector.broadcast %cst_277 : f32 to vector<8x32xf32>
    %cst_278 = arith.constant 0.000000e+00 : f32
    %912 = vector.broadcast %cst_278 : f32 to vector<8x32xf32>
    %cst_279 = arith.constant 0.000000e+00 : f32
    %913 = vector.broadcast %cst_279 : f32 to vector<8x32xf32>
    %cst_280 = arith.constant 0.000000e+00 : f32
    %914 = vector.broadcast %cst_280 : f32 to vector<8x32xf32>
    %c0_281 = arith.constant 0 : index
    %c0_282 = arith.constant 0 : index
    %915 = vector.load %arg12[%c0_281, %c0_282] : memref<64x256xf32, #tpu.memory_space<vmem>>, vector<8x128xf32>
    %916 = arith.truncf %911 : vector<8x32xf32> to vector<8x32xbf16>
    %cst_283 = arith.constant dense<0.000000e+00> : vector<8x128xf32>
    %917 = tpu.matmul %916, %908, %cst_283 {dimension_numbers = #tpu.dot_dimension_numbers<[1], [0], [0], [1], [0, 0, 1, 1], [], []>} : vector<8x32xbf16>, vector<32x128xbf16>, vector<8x128xf32> -> vector<8x128xf32>
    %918 = arith.addf %915, %917 : vector<8x128xf32>
    %c56_284 = arith.constant 56 : index
    %c128_285 = arith.constant 128 : index
    %919 = vector.load %arg12[%c56_284, %c128_285] : memref<64x256xf32, #tpu.memory_space<vmem>>, vector<8x128xf32>
    %920 = arith.truncf %913 : vector<8x32xf32> to vector<8x32xbf16>
    %cst_286 = arith.constant dense<0.000000e+00> : vector<8x128xf32>
    %921 = tpu.matmul %920, %910, %cst_286 {dimension_numbers = #tpu.dot_dimension_numbers<[1], [0], [0], [1], [0, 0, 1, 1], [], []>} : vector<8x32xbf16>, vector<32x128xbf16>, vector<8x128xf32> -> vector<8x128xf32>
    %922 = arith.addf %919, %921 : vector<8x128xf32>
    %923 = vector.extract_strided_slice %918 {offsets = [0, 0], sizes = [8, 64], strides = [1, 1]} : vector<8x128xf32> to vector<8x64xf32>
    %924 = arith.negf %923 : vector<8x64xf32>
    %925 = math.exp %924 : vector<8x64xf32>
    %cst_287 = arith.constant 1.000000e+00 : f32
    %926 = vector.broadcast %cst_287 : f32 to vector<8x64xf32>
    %927 = arith.addf %926, %925 : vector<8x64xf32>
    %928 = arith.divf %926, %927 : vector<8x64xf32>
    %929 = vector.extract_strided_slice %918 {offsets = [0, 64], sizes = [8, 32], strides = [1, 1]} : vector<8x128xf32> to vector<8x32xf32>
    %930 = math.tanh %929 : vector<8x32xf32>
    %931 = vector.extract_strided_slice %918 {offsets = [0, 96], sizes = [8, 32], strides = [1, 1]} : vector<8x128xf32> to vector<8x32xf32>
    %932 = arith.negf %931 : vector<8x32xf32>
    %933 = math.exp %932 : vector<8x32xf32>
    %cst_288 = arith.constant 1.000000e+00 : f32
    %934 = vector.broadcast %cst_288 : f32 to vector<8x32xf32>
    %935 = arith.addf %934, %933 : vector<8x32xf32>
    %936 = arith.divf %934, %935 : vector<8x32xf32>
    %937 = vector.extract_strided_slice %928 {offsets = [0, 32], sizes = [8, 32], strides = [1, 1]} : vector<8x64xf32> to vector<8x32xf32>
    %938 = arith.mulf %937, %912 : vector<8x32xf32>
    %939 = vector.extract_strided_slice %928 {offsets = [0, 0], sizes = [8, 32], strides = [1, 1]} : vector<8x64xf32> to vector<8x32xf32>
    %940 = arith.mulf %939, %930 : vector<8x32xf32>
    %941 = arith.addf %938, %940 : vector<8x32xf32>
    %942 = math.tanh %941 : vector<8x32xf32>
    %943 = arith.mulf %936, %942 : vector<8x32xf32>
    %944 = vector.extract_strided_slice %922 {offsets = [0, 0], sizes = [8, 64], strides = [1, 1]} : vector<8x128xf32> to vector<8x64xf32>
    %945 = arith.negf %944 : vector<8x64xf32>
    %946 = math.exp %945 : vector<8x64xf32>
    %cst_289 = arith.constant 1.000000e+00 : f32
    %947 = vector.broadcast %cst_289 : f32 to vector<8x64xf32>
    %948 = arith.addf %947, %946 : vector<8x64xf32>
    %949 = arith.divf %947, %948 : vector<8x64xf32>
    %950 = vector.extract_strided_slice %922 {offsets = [0, 64], sizes = [8, 32], strides = [1, 1]} : vector<8x128xf32> to vector<8x32xf32>
    %951 = math.tanh %950 : vector<8x32xf32>
    %952 = vector.extract_strided_slice %922 {offsets = [0, 96], sizes = [8, 32], strides = [1, 1]} : vector<8x128xf32> to vector<8x32xf32>
    %953 = arith.negf %952 : vector<8x32xf32>
    %954 = math.exp %953 : vector<8x32xf32>
    %cst_290 = arith.constant 1.000000e+00 : f32
    %955 = vector.broadcast %cst_290 : f32 to vector<8x32xf32>
    %956 = arith.addf %955, %954 : vector<8x32xf32>
    %957 = arith.divf %955, %956 : vector<8x32xf32>
    %958 = vector.extract_strided_slice %949 {offsets = [0, 32], sizes = [8, 32], strides = [1, 1]} : vector<8x64xf32> to vector<8x32xf32>
    %959 = arith.mulf %958, %914 : vector<8x32xf32>
    %960 = vector.extract_strided_slice %949 {offsets = [0, 0], sizes = [8, 32], strides = [1, 1]} : vector<8x64xf32> to vector<8x32xf32>
    %961 = arith.mulf %960, %951 : vector<8x32xf32>
    %962 = arith.addf %959, %961 : vector<8x32xf32>
    %963 = math.tanh %962 : vector<8x32xf32>
    %964 = arith.mulf %957, %963 : vector<8x32xf32>
    %c0_291 = arith.constant 0 : index
    %c0_292 = arith.constant 0 : index
    %965 = vector.load %arg8[%c0_291, %c0_292] : memref<64x64xf32, #tpu.memory_space<vmem>>, vector<8x32xf32>
    tpu.vector_store %arg8[%c0_291, %c0_292], %943 {strides = array<i32>} : memref<64x64xf32, #tpu.memory_space<vmem>>, vector<8x32xf32>,
    %c56_293 = arith.constant 56 : index
    %c32_294 = arith.constant 32 : index
    %966 = vector.load %arg8[%c56_293, %c32_294] : memref<64x64xf32, #tpu.memory_space<vmem>>, vector<8x32xf32>
    tpu.vector_store %arg8[%c56_293, %c32_294], %964 {strides = array<i32>} : memref<64x64xf32, #tpu.memory_space<vmem>>, vector<8x32xf32>,
    %c8_295 = arith.constant 8 : index
    %c0_296 = arith.constant 0 : index
    %967 = vector.load %arg12[%c8_295, %c0_296] : memref<64x256xf32, #tpu.memory_space<vmem>>, vector<8x128xf32>
    %968 = arith.truncf %943 : vector<8x32xf32> to vector<8x32xbf16>
    %cst_297 = arith.constant dense<0.000000e+00> : vector<8x128xf32>
    %969 = tpu.matmul %968, %908, %cst_297 {dimension_numbers = #tpu.dot_dimension_numbers<[1], [0], [0], [1], [0, 0, 1, 1], [], []>} : vector<8x32xbf16>, vector<32x128xbf16>, vector<8x128xf32> -> vector<8x128xf32>
    %970 = arith.addf %967, %969 : vector<8x128xf32>
    %c48_298 = arith.constant 48 : index
    %c128_299 = arith.constant 128 : index
    %971 = vector.load %arg12[%c48_298, %c128_299] : memref<64x256xf32, #tpu.memory_space<vmem>>, vector<8x128xf32>
    %972 = arith.truncf %964 : vector<8x32xf32> to vector<8x32xbf16>
    %cst_300 = arith.constant dense<0.000000e+00> : vector<8x128xf32>
    %973 = tpu.matmul %972, %910, %cst_300 {dimension_numbers = #tpu.dot_dimension_numbers<[1], [0], [0], [1], [0, 0, 1, 1], [], []>} : vector<8x32xbf16>, vector<32x128xbf16>, vector<8x128xf32> -> vector<8x128xf32>
    %974 = arith.addf %971, %973 : vector<8x128xf32>
    %975 = vector.extract_strided_slice %970 {offsets = [0, 0], sizes = [8, 64], strides = [1, 1]} : vector<8x128xf32> to vector<8x64xf32>
    %976 = arith.negf %975 : vector<8x64xf32>
    %977 = math.exp %976 : vector<8x64xf32>
    %cst_301 = arith.constant 1.000000e+00 : f32
    %978 = vector.broadcast %cst_301 : f32 to vector<8x64xf32>
    %979 = arith.addf %978, %977 : vector<8x64xf32>
    %980 = arith.divf %978, %979 : vector<8x64xf32>
    %981 = vector.extract_strided_slice %970 {offsets = [0, 64], sizes = [8, 32], strides = [1, 1]} : vector<8x128xf32> to vector<8x32xf32>
    %982 = math.tanh %981 : vector<8x32xf32>
    %983 = vector.extract_strided_slice %970 {offsets = [0, 96], sizes = [8, 32], strides = [1, 1]} : vector<8x128xf32> to vector<8x32xf32>
    %984 = arith.negf %983 : vector<8x32xf32>
    %985 = math.exp %984 : vector<8x32xf32>
    %cst_302 = arith.constant 1.000000e+00 : f32
    %986 = vector.broadcast %cst_302 : f32 to vector<8x32xf32>
    %987 = arith.addf %986, %985 : vector<8x32xf32>
    %988 = arith.divf %986, %987 : vector<8x32xf32>
    %989 = vector.extract_strided_slice %980 {offsets = [0, 32], sizes = [8, 32], strides = [1, 1]} : vector<8x64xf32> to vector<8x32xf32>
    %990 = arith.mulf %989, %941 : vector<8x32xf32>
    %991 = vector.extract_strided_slice %980 {offsets = [0, 0], sizes = [8, 32], strides = [1, 1]} : vector<8x64xf32> to vector<8x32xf32>
    %992 = arith.mulf %991, %982 : vector<8x32xf32>
    %993 = arith.addf %990, %992 : vector<8x32xf32>
    %994 = math.tanh %993 : vector<8x32xf32>
    %995 = arith.mulf %988, %994 : vector<8x32xf32>
    %996 = vector.extract_strided_slice %974 {offsets = [0, 0], sizes = [8, 64], strides = [1, 1]} : vector<8x128xf32> to vector<8x64xf32>
    %997 = arith.negf %996 : vector<8x64xf32>
    %998 = math.exp %997 : vector<8x64xf32>
    %cst_303 = arith.constant 1.000000e+00 : f32
    %999 = vector.broadcast %cst_303 : f32 to vector<8x64xf32>
    %1000 = arith.addf %999, %998 : vector<8x64xf32>
    %1001 = arith.divf %999, %1000 : vector<8x64xf32>
    %1002 = vector.extract_strided_slice %974 {offsets = [0, 64], sizes = [8, 32], strides = [1, 1]} : vector<8x128xf32> to vector<8x32xf32>
    %1003 = math.tanh %1002 : vector<8x32xf32>
    %1004 = vector.extract_strided_slice %974 {offsets = [0, 96], sizes = [8, 32], strides = [1, 1]} : vector<8x128xf32> to vector<8x32xf32>
    %1005 = arith.negf %1004 : vector<8x32xf32>
    %1006 = math.exp %1005 : vector<8x32xf32>
    %cst_304 = arith.constant 1.000000e+00 : f32
    %1007 = vector.broadcast %cst_304 : f32 to vector<8x32xf32>
    %1008 = arith.addf %1007, %1006 : vector<8x32xf32>
    %1009 = arith.divf %1007, %1008 : vector<8x32xf32>
    %1010 = vector.extract_strided_slice %1001 {offsets = [0, 32], sizes = [8, 32], strides = [1, 1]} : vector<8x64xf32> to vector<8x32xf32>
    %1011 = arith.mulf %1010, %962 : vector<8x32xf32>
    %1012 = vector.extract_strided_slice %1001 {offsets = [0, 0], sizes = [8, 32], strides = [1, 1]} : vector<8x64xf32> to vector<8x32xf32>
    %1013 = arith.mulf %1012, %1003 : vector<8x32xf32>
    %1014 = arith.addf %1011, %1013 : vector<8x32xf32>
    %1015 = math.tanh %1014 : vector<8x32xf32>
    %1016 = arith.mulf %1009, %1015 : vector<8x32xf32>
    %c8_305 = arith.constant 8 : index
    %c0_306 = arith.constant 0 : index
    %1017 = vector.load %arg8[%c8_305, %c0_306] : memref<64x64xf32, #tpu.memory_space<vmem>>, vector<8x32xf32>
    tpu.vector_store %arg8[%c8_305, %c0_306], %995 {strides = array<i32>} : memref<64x64xf32, #tpu.memory_space<vmem>>, vector<8x32xf32>,
    %c48_307 = arith.constant 48 : index
    %c32_308 = arith.constant 32 : index
    %1018 = vector.load %arg8[%c48_307, %c32_308] : memref<64x64xf32, #tpu.memory_space<vmem>>, vector<8x32xf32>
    tpu.vector_store %arg8[%c48_307, %c32_308], %1016 {strides = array<i32>} : memref<64x64xf32, #tpu.memory_space<vmem>>, vector<8x32xf32>,
    %c16_309 = arith.constant 16 : index
    %c0_310 = arith.constant 0 : index
    %1019 = vector.load %arg12[%c16_309, %c0_310] : memref<64x256xf32, #tpu.memory_space<vmem>>, vector<8x128xf32>
    %1020 = arith.truncf %995 : vector<8x32xf32> to vector<8x32xbf16>
    %cst_311 = arith.constant dense<0.000000e+00> : vector<8x128xf32>
    %1021 = tpu.matmul %1020, %908, %cst_311 {dimension_numbers = #tpu.dot_dimension_numbers<[1], [0], [0], [1], [0, 0, 1, 1], [], []>} : vector<8x32xbf16>, vector<32x128xbf16>, vector<8x128xf32> -> vector<8x128xf32>
    %1022 = arith.addf %1019, %1021 : vector<8x128xf32>
    %c40_312 = arith.constant 40 : index
    %c128_313 = arith.constant 128 : index
    %1023 = vector.load %arg12[%c40_312, %c128_313] : memref<64x256xf32, #tpu.memory_space<vmem>>, vector<8x128xf32>
    %1024 = arith.truncf %1016 : vector<8x32xf32> to vector<8x32xbf16>
    %cst_314 = arith.constant dense<0.000000e+00> : vector<8x128xf32>
    %1025 = tpu.matmul %1024, %910, %cst_314 {dimension_numbers = #tpu.dot_dimension_numbers<[1], [0], [0], [1], [0, 0, 1, 1], [], []>} : vector<8x32xbf16>, vector<32x128xbf16>, vector<8x128xf32> -> vector<8x128xf32>
    %1026 = arith.addf %1023, %1025 : vector<8x128xf32>
    %1027 = vector.extract_strided_slice %1022 {offsets = [0, 0], sizes = [8, 64], strides = [1, 1]} : vector<8x128xf32> to vector<8x64xf32>
    %1028 = arith.negf %1027 : vector<8x64xf32>
    %1029 = math.exp %1028 : vector<8x64xf32>
    %cst_315 = arith.constant 1.000000e+00 : f32
    %1030 = vector.broadcast %cst_315 : f32 to vector<8x64xf32>
    %1031 = arith.addf %1030, %1029 : vector<8x64xf32>
    %1032 = arith.divf %1030, %1031 : vector<8x64xf32>
    %1033 = vector.extract_strided_slice %1022 {offsets = [0, 64], sizes = [8, 32], strides = [1, 1]} : vector<8x128xf32> to vector<8x32xf32>
    %1034 = math.tanh %1033 : vector<8x32xf32>
    %1035 = vector.extract_strided_slice %1022 {offsets = [0, 96], sizes = [8, 32], strides = [1, 1]} : vector<8x128xf32> to vector<8x32xf32>
    %1036 = arith.negf %1035 : vector<8x32xf32>
    %1037 = math.exp %1036 : vector<8x32xf32>
    %cst_316 = arith.constant 1.000000e+00 : f32
    %1038 = vector.broadcast %cst_316 : f32 to vector<8x32xf32>
    %1039 = arith.addf %1038, %1037 : vector<8x32xf32>
    %1040 = arith.divf %1038, %1039 : vector<8x32xf32>
    %1041 = vector.extract_strided_slice %1032 {offsets = [0, 32], sizes = [8, 32], strides = [1, 1]} : vector<8x64xf32> to vector<8x32xf32>
    %1042 = arith.mulf %1041, %993 : vector<8x32xf32>
    %1043 = vector.extract_strided_slice %1032 {offsets = [0, 0], sizes = [8, 32], strides = [1, 1]} : vector<8x64xf32> to vector<8x32xf32>
    %1044 = arith.mulf %1043, %1034 : vector<8x32xf32>
    %1045 = arith.addf %1042, %1044 : vector<8x32xf32>
    %1046 = math.tanh %1045 : vector<8x32xf32>
    %1047 = arith.mulf %1040, %1046 : vector<8x32xf32>
    %1048 = vector.extract_strided_slice %1026 {offsets = [0, 0], sizes = [8, 64], strides = [1, 1]} : vector<8x128xf32> to vector<8x64xf32>
    %1049 = arith.negf %1048 : vector<8x64xf32>
    %1050 = math.exp %1049 : vector<8x64xf32>
    %cst_317 = arith.constant 1.000000e+00 : f32
    %1051 = vector.broadcast %cst_317 : f32 to vector<8x64xf32>
    %1052 = arith.addf %1051, %1050 : vector<8x64xf32>
    %1053 = arith.divf %1051, %1052 : vector<8x64xf32>
    %1054 = vector.extract_strided_slice %1026 {offsets = [0, 64], sizes = [8, 32], strides = [1, 1]} : vector<8x128xf32> to vector<8x32xf32>
    %1055 = math.tanh %1054 : vector<8x32xf32>
    %1056 = vector.extract_strided_slice %1026 {offsets = [0, 96], sizes = [8, 32], strides = [1, 1]} : vector<8x128xf32> to vector<8x32xf32>
    %1057 = arith.negf %1056 : vector<8x32xf32>
    %1058 = math.exp %1057 : vector<8x32xf32>
    %cst_318 = arith.constant 1.000000e+00 : f32
    %1059 = vector.broadcast %cst_318 : f32 to vector<8x32xf32>
    %1060 = arith.addf %1059, %1058 : vector<8x32xf32>
    %1061 = arith.divf %1059, %1060 : vector<8x32xf32>
    %1062 = vector.extract_strided_slice %1053 {offsets = [0, 32], sizes = [8, 32], strides = [1, 1]} : vector<8x64xf32> to vector<8x32xf32>
    %1063 = arith.mulf %1062, %1014 : vector<8x32xf32>
    %1064 = vector.extract_strided_slice %1053 {offsets = [0, 0], sizes = [8, 32], strides = [1, 1]} : vector<8x64xf32> to vector<8x32xf32>
    %1065 = arith.mulf %1064, %1055 : vector<8x32xf32>
    %1066 = arith.addf %1063, %1065 : vector<8x32xf32>
    %1067 = math.tanh %1066 : vector<8x32xf32>
    %1068 = arith.mulf %1061, %1067 : vector<8x32xf32>
    %c16_319 = arith.constant 16 : index
    %c0_320 = arith.constant 0 : index
    %1069 = vector.load %arg8[%c16_319, %c0_320] : memref<64x64xf32, #tpu.memory_space<vmem>>, vector<8x32xf32>
    tpu.vector_store %arg8[%c16_319, %c0_320], %1047 {strides = array<i32>} : memref<64x64xf32, #tpu.memory_space<vmem>>, vector<8x32xf32>,
    %c40_321 = arith.constant 40 : index
    %c32_322 = arith.constant 32 : index
    %1070 = vector.load %arg8[%c40_321, %c32_322] : memref<64x64xf32, #tpu.memory_space<vmem>>, vector<8x32xf32>
    tpu.vector_store %arg8[%c40_321, %c32_322], %1068 {strides = array<i32>} : memref<64x64xf32, #tpu.memory_space<vmem>>, vector<8x32xf32>,
    %c24_323 = arith.constant 24 : index
    %c0_324 = arith.constant 0 : index
    %1071 = vector.load %arg12[%c24_323, %c0_324] : memref<64x256xf32, #tpu.memory_space<vmem>>, vector<8x128xf32>
    %1072 = arith.truncf %1047 : vector<8x32xf32> to vector<8x32xbf16>
    %cst_325 = arith.constant dense<0.000000e+00> : vector<8x128xf32>
    %1073 = tpu.matmul %1072, %908, %cst_325 {dimension_numbers = #tpu.dot_dimension_numbers<[1], [0], [0], [1], [0, 0, 1, 1], [], []>} : vector<8x32xbf16>, vector<32x128xbf16>, vector<8x128xf32> -> vector<8x128xf32>
    %1074 = arith.addf %1071, %1073 : vector<8x128xf32>
    %c32_326 = arith.constant 32 : index
    %c128_327 = arith.constant 128 : index
    %1075 = vector.load %arg12[%c32_326, %c128_327] : memref<64x256xf32, #tpu.memory_space<vmem>>, vector<8x128xf32>
    %1076 = arith.truncf %1068 : vector<8x32xf32> to vector<8x32xbf16>
    %cst_328 = arith.constant dense<0.000000e+00> : vector<8x128xf32>
    %1077 = tpu.matmul %1076, %910, %cst_328 {dimension_numbers = #tpu.dot_dimension_numbers<[1], [0], [0], [1], [0, 0, 1, 1], [], []>} : vector<8x32xbf16>, vector<32x128xbf16>, vector<8x128xf32> -> vector<8x128xf32>
    %1078 = arith.addf %1075, %1077 : vector<8x128xf32>
    %1079 = vector.extract_strided_slice %1074 {offsets = [0, 0], sizes = [8, 64], strides = [1, 1]} : vector<8x128xf32> to vector<8x64xf32>
    %1080 = arith.negf %1079 : vector<8x64xf32>
    %1081 = math.exp %1080 : vector<8x64xf32>
    %cst_329 = arith.constant 1.000000e+00 : f32
    %1082 = vector.broadcast %cst_329 : f32 to vector<8x64xf32>
    %1083 = arith.addf %1082, %1081 : vector<8x64xf32>
    %1084 = arith.divf %1082, %1083 : vector<8x64xf32>
    %1085 = vector.extract_strided_slice %1074 {offsets = [0, 64], sizes = [8, 32], strides = [1, 1]} : vector<8x128xf32> to vector<8x32xf32>
    %1086 = math.tanh %1085 : vector<8x32xf32>
    %1087 = vector.extract_strided_slice %1074 {offsets = [0, 96], sizes = [8, 32], strides = [1, 1]} : vector<8x128xf32> to vector<8x32xf32>
    %1088 = arith.negf %1087 : vector<8x32xf32>
    %1089 = math.exp %1088 : vector<8x32xf32>
    %cst_330 = arith.constant 1.000000e+00 : f32
    %1090 = vector.broadcast %cst_330 : f32 to vector<8x32xf32>
    %1091 = arith.addf %1090, %1089 : vector<8x32xf32>
    %1092 = arith.divf %1090, %1091 : vector<8x32xf32>
    %1093 = vector.extract_strided_slice %1084 {offsets = [0, 32], sizes = [8, 32], strides = [1, 1]} : vector<8x64xf32> to vector<8x32xf32>
    %1094 = arith.mulf %1093, %1045 : vector<8x32xf32>
    %1095 = vector.extract_strided_slice %1084 {offsets = [0, 0], sizes = [8, 32], strides = [1, 1]} : vector<8x64xf32> to vector<8x32xf32>
    %1096 = arith.mulf %1095, %1086 : vector<8x32xf32>
    %1097 = arith.addf %1094, %1096 : vector<8x32xf32>
    %1098 = math.tanh %1097 : vector<8x32xf32>
    %1099 = arith.mulf %1092, %1098 : vector<8x32xf32>
    %1100 = vector.extract_strided_slice %1078 {offsets = [0, 0], sizes = [8, 64], strides = [1, 1]} : vector<8x128xf32> to vector<8x64xf32>
    %1101 = arith.negf %1100 : vector<8x64xf32>
    %1102 = math.exp %1101 : vector<8x64xf32>
    %cst_331 = arith.constant 1.000000e+00 : f32
    %1103 = vector.broadcast %cst_331 : f32 to vector<8x64xf32>
    %1104 = arith.addf %1103, %1102 : vector<8x64xf32>
    %1105 = arith.divf %1103, %1104 : vector<8x64xf32>
    %1106 = vector.extract_strided_slice %1078 {offsets = [0, 64], sizes = [8, 32], strides = [1, 1]} : vector<8x128xf32> to vector<8x32xf32>
    %1107 = math.tanh %1106 : vector<8x32xf32>
    %1108 = vector.extract_strided_slice %1078 {offsets = [0, 96], sizes = [8, 32], strides = [1, 1]} : vector<8x128xf32> to vector<8x32xf32>
    %1109 = arith.negf %1108 : vector<8x32xf32>
    %1110 = math.exp %1109 : vector<8x32xf32>
    %cst_332 = arith.constant 1.000000e+00 : f32
    %1111 = vector.broadcast %cst_332 : f32 to vector<8x32xf32>
    %1112 = arith.addf %1111, %1110 : vector<8x32xf32>
    %1113 = arith.divf %1111, %1112 : vector<8x32xf32>
    %1114 = vector.extract_strided_slice %1105 {offsets = [0, 32], sizes = [8, 32], strides = [1, 1]} : vector<8x64xf32> to vector<8x32xf32>
    %1115 = arith.mulf %1114, %1066 : vector<8x32xf32>
    %1116 = vector.extract_strided_slice %1105 {offsets = [0, 0], sizes = [8, 32], strides = [1, 1]} : vector<8x64xf32> to vector<8x32xf32>
    %1117 = arith.mulf %1116, %1107 : vector<8x32xf32>
    %1118 = arith.addf %1115, %1117 : vector<8x32xf32>
    %1119 = math.tanh %1118 : vector<8x32xf32>
    %1120 = arith.mulf %1113, %1119 : vector<8x32xf32>
    %c24_333 = arith.constant 24 : index
    %c0_334 = arith.constant 0 : index
    %1121 = vector.load %arg8[%c24_333, %c0_334] : memref<64x64xf32, #tpu.memory_space<vmem>>, vector<8x32xf32>
    tpu.vector_store %arg8[%c24_333, %c0_334], %1099 {strides = array<i32>} : memref<64x64xf32, #tpu.memory_space<vmem>>, vector<8x32xf32>,
    %c32_335 = arith.constant 32 : index
    %c32_336 = arith.constant 32 : index
    %1122 = vector.load %arg8[%c32_335, %c32_336] : memref<64x64xf32, #tpu.memory_space<vmem>>, vector<8x32xf32>
    tpu.vector_store %arg8[%c32_335, %c32_336], %1120 {strides = array<i32>} : memref<64x64xf32, #tpu.memory_space<vmem>>, vector<8x32xf32>,
    %c32_337 = arith.constant 32 : index
    %c0_338 = arith.constant 0 : index
    %1123 = vector.load %arg12[%c32_337, %c0_338] : memref<64x256xf32, #tpu.memory_space<vmem>>, vector<8x128xf32>
    %1124 = arith.truncf %1099 : vector<8x32xf32> to vector<8x32xbf16>
    %cst_339 = arith.constant dense<0.000000e+00> : vector<8x128xf32>
    %1125 = tpu.matmul %1124, %908, %cst_339 {dimension_numbers = #tpu.dot_dimension_numbers<[1], [0], [0], [1], [0, 0, 1, 1], [], []>} : vector<8x32xbf16>, vector<32x128xbf16>, vector<8x128xf32> -> vector<8x128xf32>
    %1126 = arith.addf %1123, %1125 : vector<8x128xf32>
    %c24_340 = arith.constant 24 : index
    %c128_341 = arith.constant 128 : index
    %1127 = vector.load %arg12[%c24_340, %c128_341] : memref<64x256xf32, #tpu.memory_space<vmem>>, vector<8x128xf32>
    %1128 = arith.truncf %1120 : vector<8x32xf32> to vector<8x32xbf16>
    %cst_342 = arith.constant dense<0.000000e+00> : vector<8x128xf32>
    %1129 = tpu.matmul %1128, %910, %cst_342 {dimension_numbers = #tpu.dot_dimension_numbers<[1], [0], [0], [1], [0, 0, 1, 1], [], []>} : vector<8x32xbf16>, vector<32x128xbf16>, vector<8x128xf32> -> vector<8x128xf32>
    %1130 = arith.addf %1127, %1129 : vector<8x128xf32>
    %1131 = vector.extract_strided_slice %1126 {offsets = [0, 0], sizes = [8, 64], strides = [1, 1]} : vector<8x128xf32> to vector<8x64xf32>
    %1132 = arith.negf %1131 : vector<8x64xf32>
    %1133 = math.exp %1132 : vector<8x64xf32>
    %cst_343 = arith.constant 1.000000e+00 : f32
    %1134 = vector.broadcast %cst_343 : f32 to vector<8x64xf32>
    %1135 = arith.addf %1134, %1133 : vector<8x64xf32>
    %1136 = arith.divf %1134, %1135 : vector<8x64xf32>
    %1137 = vector.extract_strided_slice %1126 {offsets = [0, 64], sizes = [8, 32], strides = [1, 1]} : vector<8x128xf32> to vector<8x32xf32>
    %1138 = math.tanh %1137 : vector<8x32xf32>
    %1139 = vector.extract_strided_slice %1126 {offsets = [0, 96], sizes = [8, 32], strides = [1, 1]} : vector<8x128xf32> to vector<8x32xf32>
    %1140 = arith.negf %1139 : vector<8x32xf32>
    %1141 = math.exp %1140 : vector<8x32xf32>
    %cst_344 = arith.constant 1.000000e+00 : f32
    %1142 = vector.broadcast %cst_344 : f32 to vector<8x32xf32>
    %1143 = arith.addf %1142, %1141 : vector<8x32xf32>
    %1144 = arith.divf %1142, %1143 : vector<8x32xf32>
    %1145 = vector.extract_strided_slice %1136 {offsets = [0, 32], sizes = [8, 32], strides = [1, 1]} : vector<8x64xf32> to vector<8x32xf32>
    %1146 = arith.mulf %1145, %1097 : vector<8x32xf32>
    %1147 = vector.extract_strided_slice %1136 {offsets = [0, 0], sizes = [8, 32], strides = [1, 1]} : vector<8x64xf32> to vector<8x32xf32>
    %1148 = arith.mulf %1147, %1138 : vector<8x32xf32>
    %1149 = arith.addf %1146, %1148 : vector<8x32xf32>
    %1150 = math.tanh %1149 : vector<8x32xf32>
    %1151 = arith.mulf %1144, %1150 : vector<8x32xf32>
    %1152 = vector.extract_strided_slice %1130 {offsets = [0, 0], sizes = [8, 64], strides = [1, 1]} : vector<8x128xf32> to vector<8x64xf32>
    %1153 = arith.negf %1152 : vector<8x64xf32>
    %1154 = math.exp %1153 : vector<8x64xf32>
    %cst_345 = arith.constant 1.000000e+00 : f32
    %1155 = vector.broadcast %cst_345 : f32 to vector<8x64xf32>
    %1156 = arith.addf %1155, %1154 : vector<8x64xf32>
    %1157 = arith.divf %1155, %1156 : vector<8x64xf32>
    %1158 = vector.extract_strided_slice %1130 {offsets = [0, 64], sizes = [8, 32], strides = [1, 1]} : vector<8x128xf32> to vector<8x32xf32>
    %1159 = math.tanh %1158 : vector<8x32xf32>
    %1160 = vector.extract_strided_slice %1130 {offsets = [0, 96], sizes = [8, 32], strides = [1, 1]} : vector<8x128xf32> to vector<8x32xf32>
    %1161 = arith.negf %1160 : vector<8x32xf32>
    %1162 = math.exp %1161 : vector<8x32xf32>
    %cst_346 = arith.constant 1.000000e+00 : f32
    %1163 = vector.broadcast %cst_346 : f32 to vector<8x32xf32>
    %1164 = arith.addf %1163, %1162 : vector<8x32xf32>
    %1165 = arith.divf %1163, %1164 : vector<8x32xf32>
    %1166 = vector.extract_strided_slice %1157 {offsets = [0, 32], sizes = [8, 32], strides = [1, 1]} : vector<8x64xf32> to vector<8x32xf32>
    %1167 = arith.mulf %1166, %1118 : vector<8x32xf32>
    %1168 = vector.extract_strided_slice %1157 {offsets = [0, 0], sizes = [8, 32], strides = [1, 1]} : vector<8x64xf32> to vector<8x32xf32>
    %1169 = arith.mulf %1168, %1159 : vector<8x32xf32>
    %1170 = arith.addf %1167, %1169 : vector<8x32xf32>
    %1171 = math.tanh %1170 : vector<8x32xf32>
    %1172 = arith.mulf %1165, %1171 : vector<8x32xf32>
    %c32_347 = arith.constant 32 : index
    %c0_348 = arith.constant 0 : index
    %1173 = vector.load %arg8[%c32_347, %c0_348] : memref<64x64xf32, #tpu.memory_space<vmem>>, vector<8x32xf32>
    tpu.vector_store %arg8[%c32_347, %c0_348], %1151 {strides = array<i32>} : memref<64x64xf32, #tpu.memory_space<vmem>>, vector<8x32xf32>,
    %c24_349 = arith.constant 24 : index
    %c32_350 = arith.constant 32 : index
    %1174 = vector.load %arg8[%c24_349, %c32_350] : memref<64x64xf32, #tpu.memory_space<vmem>>, vector<8x32xf32>
    tpu.vector_store %arg8[%c24_349, %c32_350], %1172 {strides = array<i32>} : memref<64x64xf32, #tpu.memory_space<vmem>>, vector<8x32xf32>,
    %c40_351 = arith.constant 40 : index
    %c0_352 = arith.constant 0 : index
    %1175 = vector.load %arg12[%c40_351, %c0_352] : memref<64x256xf32, #tpu.memory_space<vmem>>, vector<8x128xf32>
    %1176 = arith.truncf %1151 : vector<8x32xf32> to vector<8x32xbf16>
    %cst_353 = arith.constant dense<0.000000e+00> : vector<8x128xf32>
    %1177 = tpu.matmul %1176, %908, %cst_353 {dimension_numbers = #tpu.dot_dimension_numbers<[1], [0], [0], [1], [0, 0, 1, 1], [], []>} : vector<8x32xbf16>, vector<32x128xbf16>, vector<8x128xf32> -> vector<8x128xf32>
    %1178 = arith.addf %1175, %1177 : vector<8x128xf32>
    %c16_354 = arith.constant 16 : index
    %c128_355 = arith.constant 128 : index
    %1179 = vector.load %arg12[%c16_354, %c128_355] : memref<64x256xf32, #tpu.memory_space<vmem>>, vector<8x128xf32>
    %1180 = arith.truncf %1172 : vector<8x32xf32> to vector<8x32xbf16>
    %cst_356 = arith.constant dense<0.000000e+00> : vector<8x128xf32>
    %1181 = tpu.matmul %1180, %910, %cst_356 {dimension_numbers = #tpu.dot_dimension_numbers<[1], [0], [0], [1], [0, 0, 1, 1], [], []>} : vector<8x32xbf16>, vector<32x128xbf16>, vector<8x128xf32> -> vector<8x128xf32>
    %1182 = arith.addf %1179, %1181 : vector<8x128xf32>
    %1183 = vector.extract_strided_slice %1178 {offsets = [0, 0], sizes = [8, 64], strides = [1, 1]} : vector<8x128xf32> to vector<8x64xf32>
    %1184 = arith.negf %1183 : vector<8x64xf32>
    %1185 = math.exp %1184 : vector<8x64xf32>
    %cst_357 = arith.constant 1.000000e+00 : f32
    %1186 = vector.broadcast %cst_357 : f32 to vector<8x64xf32>
    %1187 = arith.addf %1186, %1185 : vector<8x64xf32>
    %1188 = arith.divf %1186, %1187 : vector<8x64xf32>
    %1189 = vector.extract_strided_slice %1178 {offsets = [0, 64], sizes = [8, 32], strides = [1, 1]} : vector<8x128xf32> to vector<8x32xf32>
    %1190 = math.tanh %1189 : vector<8x32xf32>
    %1191 = vector.extract_strided_slice %1178 {offsets = [0, 96], sizes = [8, 32], strides = [1, 1]} : vector<8x128xf32> to vector<8x32xf32>
    %1192 = arith.negf %1191 : vector<8x32xf32>
    %1193 = math.exp %1192 : vector<8x32xf32>
    %cst_358 = arith.constant 1.000000e+00 : f32
    %1194 = vector.broadcast %cst_358 : f32 to vector<8x32xf32>
    %1195 = arith.addf %1194, %1193 : vector<8x32xf32>
    %1196 = arith.divf %1194, %1195 : vector<8x32xf32>
    %1197 = vector.extract_strided_slice %1188 {offsets = [0, 32], sizes = [8, 32], strides = [1, 1]} : vector<8x64xf32> to vector<8x32xf32>
    %1198 = arith.mulf %1197, %1149 : vector<8x32xf32>
    %1199 = vector.extract_strided_slice %1188 {offsets = [0, 0], sizes = [8, 32], strides = [1, 1]} : vector<8x64xf32> to vector<8x32xf32>
    %1200 = arith.mulf %1199, %1190 : vector<8x32xf32>
    %1201 = arith.addf %1198, %1200 : vector<8x32xf32>
    %1202 = math.tanh %1201 : vector<8x32xf32>
    %1203 = arith.mulf %1196, %1202 : vector<8x32xf32>
    %1204 = vector.extract_strided_slice %1182 {offsets = [0, 0], sizes = [8, 64], strides = [1, 1]} : vector<8x128xf32> to vector<8x64xf32>
    %1205 = arith.negf %1204 : vector<8x64xf32>
    %1206 = math.exp %1205 : vector<8x64xf32>
    %cst_359 = arith.constant 1.000000e+00 : f32
    %1207 = vector.broadcast %cst_359 : f32 to vector<8x64xf32>
    %1208 = arith.addf %1207, %1206 : vector<8x64xf32>
    %1209 = arith.divf %1207, %1208 : vector<8x64xf32>
    %1210 = vector.extract_strided_slice %1182 {offsets = [0, 64], sizes = [8, 32], strides = [1, 1]} : vector<8x128xf32> to vector<8x32xf32>
    %1211 = math.tanh %1210 : vector<8x32xf32>
    %1212 = vector.extract_strided_slice %1182 {offsets = [0, 96], sizes = [8, 32], strides = [1, 1]} : vector<8x128xf32> to vector<8x32xf32>
    %1213 = arith.negf %1212 : vector<8x32xf32>
    %1214 = math.exp %1213 : vector<8x32xf32>
    %cst_360 = arith.constant 1.000000e+00 : f32
    %1215 = vector.broadcast %cst_360 : f32 to vector<8x32xf32>
    %1216 = arith.addf %1215, %1214 : vector<8x32xf32>
    %1217 = arith.divf %1215, %1216 : vector<8x32xf32>
    %1218 = vector.extract_strided_slice %1209 {offsets = [0, 32], sizes = [8, 32], strides = [1, 1]} : vector<8x64xf32> to vector<8x32xf32>
    %1219 = arith.mulf %1218, %1170 : vector<8x32xf32>
    %1220 = vector.extract_strided_slice %1209 {offsets = [0, 0], sizes = [8, 32], strides = [1, 1]} : vector<8x64xf32> to vector<8x32xf32>
    %1221 = arith.mulf %1220, %1211 : vector<8x32xf32>
    %1222 = arith.addf %1219, %1221 : vector<8x32xf32>
    %1223 = math.tanh %1222 : vector<8x32xf32>
    %1224 = arith.mulf %1217, %1223 : vector<8x32xf32>
    %c40_361 = arith.constant 40 : index
    %c0_362 = arith.constant 0 : index
    %1225 = vector.load %arg8[%c40_361, %c0_362] : memref<64x64xf32, #tpu.memory_space<vmem>>, vector<8x32xf32>
    tpu.vector_store %arg8[%c40_361, %c0_362], %1203 {strides = array<i32>} : memref<64x64xf32, #tpu.memory_space<vmem>>, vector<8x32xf32>,
    %c16_363 = arith.constant 16 : index
    %c32_364 = arith.constant 32 : index
    %1226 = vector.load %arg8[%c16_363, %c32_364] : memref<64x64xf32, #tpu.memory_space<vmem>>, vector<8x32xf32>
    tpu.vector_store %arg8[%c16_363, %c32_364], %1224 {strides = array<i32>} : memref<64x64xf32, #tpu.memory_space<vmem>>, vector<8x32xf32>,
    %c48_365 = arith.constant 48 : index
    %c0_366 = arith.constant 0 : index
    %1227 = vector.load %arg12[%c48_365, %c0_366] : memref<64x256xf32, #tpu.memory_space<vmem>>, vector<8x128xf32>
    %1228 = arith.truncf %1203 : vector<8x32xf32> to vector<8x32xbf16>
    %cst_367 = arith.constant dense<0.000000e+00> : vector<8x128xf32>
    %1229 = tpu.matmul %1228, %908, %cst_367 {dimension_numbers = #tpu.dot_dimension_numbers<[1], [0], [0], [1], [0, 0, 1, 1], [], []>} : vector<8x32xbf16>, vector<32x128xbf16>, vector<8x128xf32> -> vector<8x128xf32>
    %1230 = arith.addf %1227, %1229 : vector<8x128xf32>
    %c8_368 = arith.constant 8 : index
    %c128_369 = arith.constant 128 : index
    %1231 = vector.load %arg12[%c8_368, %c128_369] : memref<64x256xf32, #tpu.memory_space<vmem>>, vector<8x128xf32>
    %1232 = arith.truncf %1224 : vector<8x32xf32> to vector<8x32xbf16>
    %cst_370 = arith.constant dense<0.000000e+00> : vector<8x128xf32>
    %1233 = tpu.matmul %1232, %910, %cst_370 {dimension_numbers = #tpu.dot_dimension_numbers<[1], [0], [0], [1], [0, 0, 1, 1], [], []>} : vector<8x32xbf16>, vector<32x128xbf16>, vector<8x128xf32> -> vector<8x128xf32>
    %1234 = arith.addf %1231, %1233 : vector<8x128xf32>
    %1235 = vector.extract_strided_slice %1230 {offsets = [0, 0], sizes = [8, 64], strides = [1, 1]} : vector<8x128xf32> to vector<8x64xf32>
    %1236 = arith.negf %1235 : vector<8x64xf32>
    %1237 = math.exp %1236 : vector<8x64xf32>
    %cst_371 = arith.constant 1.000000e+00 : f32
    %1238 = vector.broadcast %cst_371 : f32 to vector<8x64xf32>
    %1239 = arith.addf %1238, %1237 : vector<8x64xf32>
    %1240 = arith.divf %1238, %1239 : vector<8x64xf32>
    %1241 = vector.extract_strided_slice %1230 {offsets = [0, 64], sizes = [8, 32], strides = [1, 1]} : vector<8x128xf32> to vector<8x32xf32>
    %1242 = math.tanh %1241 : vector<8x32xf32>
    %1243 = vector.extract_strided_slice %1230 {offsets = [0, 96], sizes = [8, 32], strides = [1, 1]} : vector<8x128xf32> to vector<8x32xf32>
    %1244 = arith.negf %1243 : vector<8x32xf32>
    %1245 = math.exp %1244 : vector<8x32xf32>
    %cst_372 = arith.constant 1.000000e+00 : f32
    %1246 = vector.broadcast %cst_372 : f32 to vector<8x32xf32>
    %1247 = arith.addf %1246, %1245 : vector<8x32xf32>
    %1248 = arith.divf %1246, %1247 : vector<8x32xf32>
    %1249 = vector.extract_strided_slice %1240 {offsets = [0, 32], sizes = [8, 32], strides = [1, 1]} : vector<8x64xf32> to vector<8x32xf32>
    %1250 = arith.mulf %1249, %1201 : vector<8x32xf32>
    %1251 = vector.extract_strided_slice %1240 {offsets = [0, 0], sizes = [8, 32], strides = [1, 1]} : vector<8x64xf32> to vector<8x32xf32>
    %1252 = arith.mulf %1251, %1242 : vector<8x32xf32>
    %1253 = arith.addf %1250, %1252 : vector<8x32xf32>
    %1254 = math.tanh %1253 : vector<8x32xf32>
    %1255 = arith.mulf %1248, %1254 : vector<8x32xf32>
    %1256 = vector.extract_strided_slice %1234 {offsets = [0, 0], sizes = [8, 64], strides = [1, 1]} : vector<8x128xf32> to vector<8x64xf32>
    %1257 = arith.negf %1256 : vector<8x64xf32>
    %1258 = math.exp %1257 : vector<8x64xf32>
    %cst_373 = arith.constant 1.000000e+00 : f32
    %1259 = vector.broadcast %cst_373 : f32 to vector<8x64xf32>
    %1260 = arith.addf %1259, %1258 : vector<8x64xf32>
    %1261 = arith.divf %1259, %1260 : vector<8x64xf32>
    %1262 = vector.extract_strided_slice %1234 {offsets = [0, 64], sizes = [8, 32], strides = [1, 1]} : vector<8x128xf32> to vector<8x32xf32>
    %1263 = math.tanh %1262 : vector<8x32xf32>
    %1264 = vector.extract_strided_slice %1234 {offsets = [0, 96], sizes = [8, 32], strides = [1, 1]} : vector<8x128xf32> to vector<8x32xf32>
    %1265 = arith.negf %1264 : vector<8x32xf32>
    %1266 = math.exp %1265 : vector<8x32xf32>
    %cst_374 = arith.constant 1.000000e+00 : f32
    %1267 = vector.broadcast %cst_374 : f32 to vector<8x32xf32>
    %1268 = arith.addf %1267, %1266 : vector<8x32xf32>
    %1269 = arith.divf %1267, %1268 : vector<8x32xf32>
    %1270 = vector.extract_strided_slice %1261 {offsets = [0, 32], sizes = [8, 32], strides = [1, 1]} : vector<8x64xf32> to vector<8x32xf32>
    %1271 = arith.mulf %1270, %1222 : vector<8x32xf32>
    %1272 = vector.extract_strided_slice %1261 {offsets = [0, 0], sizes = [8, 32], strides = [1, 1]} : vector<8x64xf32> to vector<8x32xf32>
    %1273 = arith.mulf %1272, %1263 : vector<8x32xf32>
    %1274 = arith.addf %1271, %1273 : vector<8x32xf32>
    %1275 = math.tanh %1274 : vector<8x32xf32>
    %1276 = arith.mulf %1269, %1275 : vector<8x32xf32>
    %c48_375 = arith.constant 48 : index
    %c0_376 = arith.constant 0 : index
    %1277 = vector.load %arg8[%c48_375, %c0_376] : memref<64x64xf32, #tpu.memory_space<vmem>>, vector<8x32xf32>
    tpu.vector_store %arg8[%c48_375, %c0_376], %1255 {strides = array<i32>} : memref<64x64xf32, #tpu.memory_space<vmem>>, vector<8x32xf32>,
    %c8_377 = arith.constant 8 : index
    %c32_378 = arith.constant 32 : index
    %1278 = vector.load %arg8[%c8_377, %c32_378] : memref<64x64xf32, #tpu.memory_space<vmem>>, vector<8x32xf32>
    tpu.vector_store %arg8[%c8_377, %c32_378], %1276 {strides = array<i32>} : memref<64x64xf32, #tpu.memory_space<vmem>>, vector<8x32xf32>,
    %c56_379 = arith.constant 56 : index
    %c0_380 = arith.constant 0 : index
    %1279 = vector.load %arg12[%c56_379, %c0_380] : memref<64x256xf32, #tpu.memory_space<vmem>>, vector<8x128xf32>
    %1280 = arith.truncf %1255 : vector<8x32xf32> to vector<8x32xbf16>
    %cst_381 = arith.constant dense<0.000000e+00> : vector<8x128xf32>
    %1281 = tpu.matmul %1280, %908, %cst_381 {dimension_numbers = #tpu.dot_dimension_numbers<[1], [0], [0], [1], [0, 0, 1, 1], [], []>} : vector<8x32xbf16>, vector<32x128xbf16>, vector<8x128xf32> -> vector<8x128xf32>
    %1282 = arith.addf %1279, %1281 : vector<8x128xf32>
    %c0_382 = arith.constant 0 : index
    %c128_383 = arith.constant 128 : index
    %1283 = vector.load %arg12[%c0_382, %c128_383] : memref<64x256xf32, #tpu.memory_space<vmem>>, vector<8x128xf32>
    %1284 = arith.truncf %1276 : vector<8x32xf32> to vector<8x32xbf16>
    %cst_384 = arith.constant dense<0.000000e+00> : vector<8x128xf32>
    %1285 = tpu.matmul %1284, %910, %cst_384 {dimension_numbers = #tpu.dot_dimension_numbers<[1], [0], [0], [1], [0, 0, 1, 1], [], []>} : vector<8x32xbf16>, vector<32x128xbf16>, vector<8x128xf32> -> vector<8x128xf32>
    %1286 = arith.addf %1283, %1285 : vector<8x128xf32>
    %1287 = vector.extract_strided_slice %1282 {offsets = [0, 0], sizes = [8, 64], strides = [1, 1]} : vector<8x128xf32> to vector<8x64xf32>
    %1288 = arith.negf %1287 : vector<8x64xf32>
    %1289 = math.exp %1288 : vector<8x64xf32>
    %cst_385 = arith.constant 1.000000e+00 : f32
    %1290 = vector.broadcast %cst_385 : f32 to vector<8x64xf32>
    %1291 = arith.addf %1290, %1289 : vector<8x64xf32>
    %1292 = arith.divf %1290, %1291 : vector<8x64xf32>
    %1293 = vector.extract_strided_slice %1282 {offsets = [0, 64], sizes = [8, 32], strides = [1, 1]} : vector<8x128xf32> to vector<8x32xf32>
    %1294 = math.tanh %1293 : vector<8x32xf32>
    %1295 = vector.extract_strided_slice %1282 {offsets = [0, 96], sizes = [8, 32], strides = [1, 1]} : vector<8x128xf32> to vector<8x32xf32>
    %1296 = arith.negf %1295 : vector<8x32xf32>
    %1297 = math.exp %1296 : vector<8x32xf32>
    %cst_386 = arith.constant 1.000000e+00 : f32
    %1298 = vector.broadcast %cst_386 : f32 to vector<8x32xf32>
    %1299 = arith.addf %1298, %1297 : vector<8x32xf32>
    %1300 = arith.divf %1298, %1299 : vector<8x32xf32>
    %1301 = vector.extract_strided_slice %1292 {offsets = [0, 32], sizes = [8, 32], strides = [1, 1]} : vector<8x64xf32> to vector<8x32xf32>
    %1302 = arith.mulf %1301, %1253 : vector<8x32xf32>
    %1303 = vector.extract_strided_slice %1292 {offsets = [0, 0], sizes = [8, 32], strides = [1, 1]} : vector<8x64xf32> to vector<8x32xf32>
    %1304 = arith.mulf %1303, %1294 : vector<8x32xf32>
    %1305 = arith.addf %1302, %1304 : vector<8x32xf32>
    %1306 = math.tanh %1305 : vector<8x32xf32>
    %1307 = arith.mulf %1300, %1306 : vector<8x32xf32>
    %1308 = vector.extract_strided_slice %1286 {offsets = [0, 0], sizes = [8, 64], strides = [1, 1]} : vector<8x128xf32> to vector<8x64xf32>
    %1309 = arith.negf %1308 : vector<8x64xf32>
    %1310 = math.exp %1309 : vector<8x64xf32>
    %cst_387 = arith.constant 1.000000e+00 : f32
    %1311 = vector.broadcast %cst_387 : f32 to vector<8x64xf32>
    %1312 = arith.addf %1311, %1310 : vector<8x64xf32>
    %1313 = arith.divf %1311, %1312 : vector<8x64xf32>
    %1314 = vector.extract_strided_slice %1286 {offsets = [0, 64], sizes = [8, 32], strides = [1, 1]} : vector<8x128xf32> to vector<8x32xf32>
    %1315 = math.tanh %1314 : vector<8x32xf32>
    %1316 = vector.extract_strided_slice %1286 {offsets = [0, 96], sizes = [8, 32], strides = [1, 1]} : vector<8x128xf32> to vector<8x32xf32>
    %1317 = arith.negf %1316 : vector<8x32xf32>
    %1318 = math.exp %1317 : vector<8x32xf32>
    %cst_388 = arith.constant 1.000000e+00 : f32
    %1319 = vector.broadcast %cst_388 : f32 to vector<8x32xf32>
    %1320 = arith.addf %1319, %1318 : vector<8x32xf32>
    %1321 = arith.divf %1319, %1320 : vector<8x32xf32>
    %1322 = vector.extract_strided_slice %1313 {offsets = [0, 32], sizes = [8, 32], strides = [1, 1]} : vector<8x64xf32> to vector<8x32xf32>
    %1323 = arith.mulf %1322, %1274 : vector<8x32xf32>
    %1324 = vector.extract_strided_slice %1313 {offsets = [0, 0], sizes = [8, 32], strides = [1, 1]} : vector<8x64xf32> to vector<8x32xf32>
    %1325 = arith.mulf %1324, %1315 : vector<8x32xf32>
    %1326 = arith.addf %1323, %1325 : vector<8x32xf32>
    %1327 = math.tanh %1326 : vector<8x32xf32>
    %1328 = arith.mulf %1321, %1327 : vector<8x32xf32>
    %c56_389 = arith.constant 56 : index
    %c0_390 = arith.constant 0 : index
    %1329 = vector.load %arg8[%c56_389, %c0_390] : memref<64x64xf32, #tpu.memory_space<vmem>>, vector<8x32xf32>
    tpu.vector_store %arg8[%c56_389, %c0_390], %1307 {strides = array<i32>} : memref<64x64xf32, #tpu.memory_space<vmem>>, vector<8x32xf32>,
    %c0_391 = arith.constant 0 : index
    %c32_392 = arith.constant 32 : index
    %1330 = vector.load %arg8[%c0_391, %c32_392] : memref<64x64xf32, #tpu.memory_space<vmem>>, vector<8x32xf32>
    tpu.vector_store %arg8[%c0_391, %c32_392], %1328 {strides = array<i32>} : memref<64x64xf32, #tpu.memory_space<vmem>>, vector<8x32xf32>,
    %1331 = tpu.concatenate %1307, %1328, %1305, %1326 in 1 : vector<8x32xf32>, vector<8x32xf32>, vector<8x32xf32>, vector<8x32xf32> -> vector<8x128xf32>
    %1332 = arith.truncf %1331 : vector<8x128xf32> to vector<8x128xbf16>
    %c0_393 = arith.constant 0 : index
    %c0_394 = arith.constant 0 : index
    %1333 = vector.load %arg4[%c0_393, %c0_394] : memref<128x64xbf16, #tpu.memory_space<vmem>>, vector<128x64xbf16>
    %cst_395 = arith.constant dense<0.000000e+00> : vector<8x64xf32>
    %1334 = tpu.matmul %1332, %1333, %cst_395 {dimension_numbers = #tpu.dot_dimension_numbers<[1], [0], [0], [1], [0, 0, 1, 1], [], []>} : vector<8x128xbf16>, vector<128x64xbf16>, vector<8x64xf32> -> vector<8x64xf32>
    %c0_396 = arith.constant 0 : index
    %c0_397 = arith.constant 0 : index
    %1335 = vector.load %arg5[%c0_396, %c0_397] : memref<1x64xf32, #tpu.memory_space<vmem>>, vector<1x64xf32>
    %1336 = vector.broadcast %1335 : vector<1x64xf32> to vector<8x64xf32>
    %1337 = arith.addf %1334, %1336 : vector<8x64xf32>
    %cst_398 = arith.constant 0.000000e+00 : f32
    %1338 = vector.broadcast %cst_398 : f32 to vector<8x64xf32>
    %1339 = arith.maximumf %1337, %1338 : vector<8x64xf32>
    %1340 = arith.truncf %1339 : vector<8x64xf32> to vector<8x64xbf16>
    %c0_399 = arith.constant 0 : index
    %c0_400 = arith.constant 0 : index
    %1341 = vector.load %arg6[%c0_399, %c0_400] : memref<64x64xbf16, #tpu.memory_space<vmem>>, vector<64x64xbf16>
    %cst_401 = arith.constant dense<0.000000e+00> : vector<8x64xf32>
    %1342 = tpu.matmul %1340, %1341, %cst_401 {dimension_numbers = #tpu.dot_dimension_numbers<[1], [0], [0], [1], [0, 0, 1, 1], [], []>} : vector<8x64xbf16>, vector<64x64xbf16>, vector<8x64xf32> -> vector<8x64xf32>
    %c0_402 = arith.constant 0 : index
    %c0_403 = arith.constant 0 : index
    %1343 = vector.load %arg7[%c0_402, %c0_403] : memref<1x64xf32, #tpu.memory_space<vmem>>, vector<1x64xf32>
    %1344 = vector.broadcast %1343 : vector<1x64xf32> to vector<8x64xf32>
    %1345 = arith.addf %1342, %1344 : vector<8x64xf32>
    %c0_404 = arith.constant 0 : index
    %c0_405 = arith.constant 0 : index
    %1346 = vector.load %arg9[%c0_404, %c0_405] : memref<8x64xf32, #tpu.memory_space<vmem>>, vector<8x64xf32>
    tpu.vector_store %arg9[%c0_404, %c0_405], %1345 {strides = array<i32>} : memref<8x64xf32, #tpu.memory_space<vmem>>, vector<8x64xf32>,
    return
  }
}

</mosaic_0001>

<bundles_post_ra>
// kernel: encoder_forward.1
= control target key start
LH: loop header
LB: loop body
LE: loop exit
PB: predicated region body
PF: predicated region fallthrough
CT: control target
= control target key end

     0   :  { %v5787_v1 = vmov 0.0   ;;  %v5788_v2 = vmov 0   ;;  %vm5789_vm0 = vmmov 0   ;;  %vm120_vm1 = vcmask 523264   ;;  %s5791_s22 = smov 32   ;;  %s7208_s1 = inlined_call_operand.vmem [shape: bf16[3,64,256], index: 1, kind: input, shape index: {}]   ;;  %s7209_s2 = inlined_call_operand.vmem [shape: bf16[3,2,32,128], index: 2, kind: input, shape index: {}]   ;;  %s7210_s0 = inlined_call_operand.vmem [shape: bf16[64,64], index: 0, kind: input, shape index: {}]   ;;  %s7211_s3 = inlined_call_operand.vmem [shape: f32[3,1,256], index: 3, kind: input, shape index: {}]   ;;  %s7212_s4 = inlined_call_operand.vmem [shape: bf16[128,64], index: 4, kind: input, shape index: {}]   ;;  %s7213_s6 = inlined_call_operand.vmem [shape: bf16[64,64], index: 6, kind: input, shape index: {}]   ;;  %s7214_s8 = inlined_call_operand.vmem [shape: f32[64,64], index: 8, kind: output, shape index: {0}]   ;;  %s7215_s5 = inlined_call_operand.vmem [shape: f32[1,64], index: 5, kind: input, shape index: {}]   ;;  %s7216_s7 = inlined_call_operand.vmem [shape: f32[1,64], index: 7, kind: input, shape index: {}]   ;;  %s7217_s9 = inlined_call_operand.vmem [shape: f32[8,64], index: 9, kind: output, shape index: {1}]  }
   0x1   :  { %v5335_v0 = vld [vmem:[%s7208_s1 + $0x4] ss:$8 sps:$4 sm:$0xff]   ;;  %4914 = vmatprep.subr.bf16.mxu1 %v5787_v1  ;;  %165 = vmatprep.mubr.bf16.mxu0 %v5788_v2  ;;  %v5337_v3 = vld [vmem:[%s7208_s1] ss:$8 sps:$4 sm:$0xff]   ;;  %v5338_v4 = vld [vmem:[%s7208_s1 + $0x14] ss:$8 sps:$4 sm:$0xff]   ;;  %v50_v18 = vlaneseq }
   0x2   :  { %4918 = vmatprep.mubr.msk.bf16.mxu1 %vm5789_vm0, %v5787_v1  ;;  %133 = vmatprep.subr.bf16.mxu0 %v5335_v0  ;;  %v5340_v5 = vld [vmem:[%s7208_s1 + $0x10] ss:$8 sps:$4 sm:$0xff]   ;;  %v5341_v6 = vld [vmem:[%s7208_s1 + $0x24] ss:$8 sps:$4 sm:$0xff]   ;;  %v5343_v8 = vld [vmem:[%s7208_s1 + $0x20] ss:$8 sps:$4 sm:$0xff]  }
   0x3   :  { %134 = vmatpush1.bf16.msra.mxu0 %v5337_v3  ;;  %v5864_v7 = vld [vmem:[%s7209_s2] sm:$0xff]   ;;  %v5874_v9 = vld [vmem:[%s7209_s2 + $0x8] sm:$0xff]   ;;  %v5345_v10 = vld [vmem:[%s7208_s1 + $0x34] ss:$8 sps:$4 sm:$0xff]   ;;  %v51_v19 = vshrl.u32 %v50_v18, 7  ;;  %vm396_vm2 = vcmask 257024  }
   0x4   :  { %135 = vmatprep.subr.bf16.mxu0 %v5338_v4  ;;  %4915 = vmatpush3.bf16.msra.mxu1 %v5864_v7  ;;  %v5347_v11 = vld [vmem:[%s7208_s1 + $0x30] ss:$8 sps:$4 sm:$0xff]   ;;  %v5349_v13 = vld [vmem:[%s7210_s0] sm:$0xff]   ;;  %v5350_v15 = vld [vmem:[%s7210_s0 + $0x8] sm:$0xff]   ;;  %vm244_vm3 = vcmask 261120   ;;  %vm552_vm4 = vcmask 261124  }
   0x5   :  { %4916 = vmatprep.subr.bf16.mxu1 %v5787_v1  ;;  %v5887_v12 = vld [vmem:[%s7209_s2 + $0x10] sm:$0xff]   ;;  %v5896_v14 = vld [vmem:[%s7209_s2 + $0x18] sm:$0xff]   ;;  %v5934_v20 = vsub.s32 0, %v51_v19  ;;  %v48_v21 = vld [vmem:[%s7211_s3] sm:$0x3]  ;;  %v5939_v22 = vsub.s32 1, %v51_v19 }
   0x6   :  { %v5351_v16 = vld [vmem:[%s7210_s0 + $0x10] sm:$0xff]   ;;  %v5354_v17 = vld [vmem:[%s7210_s0 + $0x18] sm:$0xff]   ;;  %s5790_s0 = smov 64   ;;  %vm559_vm5 = vcmask 519424   ;;  %vm404_vm6 = vcmask 523524   ;;  %vm3250_vm7 = vcmask 523520  }
   0x7   :  { %136 = vmatpush1.bf16.msra.mxu0 %v5340_v5  ;;  %v53_v25 = vrot.slane %v48_v21, %v5934_v20  ;;  %v57_v27 = vrot.slane %v48_v21, %v5939_v22  ;;  %vm4354_vm8 = vcmask 785408  }
   0x8   :  { %137 = vmatprep.subr.bf16.mxu0 %v5341_v6  ;;  %4917 = vmatpush3.bf16.msra.mxu1 %v5874_v9 }
   0x9   :  { %4922 = vmatprep.subr.bf16.mxu1 %v5787_v1 }
   0xb   :  { %138 = vmatpush1.bf16.msra.mxu0 %v5343_v8  ;;  %4919 = vmatmul.mubr.bf16.vlgmr.msra.gmra.mrb[0].mxu1 %v5788_v2 }
   0xc   :  { %139 = vmatprep.subr.bf16.mxu0 %v5345_v10  ;;  %4923 = vmatpush3.bf16.msra.mxu1 %v5887_v12 }
   0xd   :  { %4926 = vmatprep.mubr.msk.bf16.mxu1 %vm5789_vm0, %v5787_v1  ;;  %4924 = vmatprep.subr.bf16.mxu1 %v5787_v1 }
   0xf   :  { %140 = vmatpush1.bf16.msra.mxu0 %v5347_v11 }
  0x10   :  { %4954 = vmatprep.subr.bf16.mxu0 %v5787_v1  ;;  %4925 = vmatpush3.bf16.msra.mxu1 %v5896_v14 }
  0x11   :  { %4930 = vmatprep.subr.bf16.mxu1 %v5787_v1 }
  0x12   :  { %4573 = vmatmul.mubr.msk.bf16.vlgmr.msra.gmra.mrb[0].mxu0 %vm120_vm1, %v5349_v13 }
  0x13   :  { %175 = vmatprep.mubr.bf16.mxu0 %v5788_v2  ;;  %4955 = vmatpush3.bf16.msra.mxu0 %v5887_v12 }
  0x14   :  { %4927 = vmatmul.mubr.bf16.vlgmr.msra.gmra.mrb[4].mxu1 %v5788_v2  ;;  %4956 = vmatprep.subr.bf16.mxu0 %v5787_v1 }
  0x15   :  { %4931 = vmatpush3.bf16.msra.mxu1 %v5864_v7  ;;  %4934 = vmatprep.mubr.msk.bf16.mxu1 %vm5789_vm0, %v5787_v1 }
  0x16   :  { %4932 = vmatprep.subr.bf16.mxu1 %v5787_v1 }
  0x17   :  { %4957 = vmatpush3.bf16.msra.mxu0 %v5896_v14 }
  0x18   :  { %4970 = vmatprep.subr.bf16.mxu0 %v5787_v1 }
  0x19   :  { %4933 = vmatpush3.bf16.msra.mxu1 %v5874_v9 }
  0x1a   :  { %4574 = vmatmul.mubr.msk.bf16.gmra.mrb[4].mxu0 %vm120_vm1, %v5350_v15  ;;  %4938 = vmatprep.subr.bf16.mxu1 %v5787_v1 }
  0x1b   :  { %185 = vmatprep.mubr.bf16.mxu0 %v5788_v2 }
  0x22   :  { %4575 = vmatmul.mubr.msk.bf16.gmra.mrb[8].mxu0 %vm120_vm1, %v5351_v16 }
  0x23   :  { %195 = vmatprep.mubr.bf16.mxu0 %v5788_v2 }
  0x2a   :  { %4576 = vmatmul.mubr.msk.bf16.gmra.mrb[12].mxu0 %vm120_vm1, %v5354_v17 }
  0x2b   :  { %4958 = vmatprep.mubr.msk.bf16.mxu0 %vm5789_vm0, %v5787_v1 }
  0xde   :  { %v282_v23 = vpop.f32.mrb[0].mxu1 }
  0xdf   :  { %v4920_v24 = vpop.f32.mrb[1].mxu1 }
  0xe0   :  { %v285_v26 = vpop.f32.mrb[2].mxu1 }
  0xe1   :  { %v4921_v28 = vpop.f32.mrb[3].mxu1 }
  0xe5   :  { %v167_v29 = vpop.f32.mrb[0].mxu0 }
  0xe6   :  { %v168_v30 = vadd.f32 %v167_v29, %v53_v25  ;;  %v169_v31 = vpop.f32.mrb[1].mxu0 }
  0xe7   :  { %v5943_v32 = vadd.f32 %v169_v31, %v57_v27  ;;  %v171_v33 = vpop.f32.mrb[2].mxu0  ;;  %v336_v37 = vpop.f32.mrb[4].mxu1 }
  0xe8   :  { %v5945_v34 = vadd.f32 %v171_v33, %v53_v25  ;;  %v288_v35 = vadd.f32 %v282_v23, %v168_v30  ;;  %v173_v36 = vpop.f32.mrb[3].mxu0  ;;  %v4928_v39 = vpop.f32.mrb[5].mxu1 }
  0xe9   :  { %v5947_v38 = vadd.f32 %v173_v36, %v57_v27  ;;  %v339_v40 = vpop.f32.mrb[6].mxu1 }
  0xea   :  { %5399 = vtanh.f32 %v288_v35  ;;  %v4929_v41 = vpop.f32.mrb[7].mxu1  ;;  %v4585_v8 = vmul.f32 -1.442695, %v288_v35 }
  0xed   :  { %v177_v42 = vpop.f32.mrb[4].mxu0 }
  0xee   :  { %v5949_v43 = vadd.f32 %v177_v42, %v53_v25  ;;  %v179_v44 = vpop.f32.mrb[5].mxu0 }
  0xef   :  { %v5951_v45 = vadd.f32 %v179_v44, %v57_v27  ;;  %v181_v46 = vpop.f32.mrb[6].mxu0 }
  0xf0   :  { %v5953_v47 = vadd.f32 %v181_v46, %v53_v25  ;;  %v183_v48 = vpop.f32.mrb[7].mxu0 }
  0xf1   :  { %v5955_v49 = vadd.f32 %v183_v48, %v57_v27 }
  0xf4   :  { %v5400_v50 = vpop.eup %5399 }
  0xf5   :  { %v187_v51 = vpop.f32.mrb[8].mxu0  ;;  %352 = vrot.lane.b32.xlu0 %v5400_v50, %s5790_s0 }
  0xf6   :  { %v5958_v52 = vadd.f32 %v187_v51, %v53_v25  ;;  %v189_v53 = vpop.f32.mrb[9].mxu0 }
  0xf7   :  { %v5960_v54 = vadd.f32 %v189_v53, %v57_v27  ;;  %v191_v55 = vpop.f32.mrb[10].mxu0 }
  0xf8   :  { %v5962_v56 = vadd.f32 %v191_v55, %v53_v25  ;;  %v193_v57 = vpop.f32.mrb[11].mxu0 }
  0xf9   :  { %v5964_v58 = vadd.f32 %v193_v57, %v57_v27 }
  0xfd   :  { %v197_v59 = vpop.f32.mrb[12].mxu0 }
  0xfe   :  { %v5966_v60 = vadd.f32 %v197_v59, %v53_v25  ;;  %v199_v61 = vpop.f32.mrb[13].mxu0 }
  0xff   :  { %v5968_v62 = vadd.f32 %v199_v61, %v57_v27  ;;  %v201_v63 = vpop.f32.mrb[14].mxu0 }
 0x100   :  { %v5970_v0 = vadd.f32 %v201_v63, %v53_v25  ;;  %v203_v3 = vpop.f32.mrb[15].mxu0 }
 0x101   :  { %v204_v4 = vadd.f32 %v203_v3, %v57_v27 }
 0x103   :  { %v342_v5 = vadd.f32 %v336_v37, %v204_v4 }
 0x105   :  { %5401 = vtanh.f32 %v342_v5  ;;  %v4586_v13 = vmul.f32 -1.442695, %v342_v5 }
 0x106   :  { %5403 = vpow2.f32 %v4585_v8 }
 0x10f   :  { %v5402_v6 = vpop.eup %5401 }
 0x110   :  { %376 = vrot.lane.b32.xlu0 %v5402_v6, %s5790_s0  ;;  %v5404_v10 = vpop.eup %5403 }
 0x111   :  { %v346_v11 = vadd.f32 1.0, %v5404_v10 }
 0x113   :  { %5405 = vrcp.f32 %v346_v11 }
 0x114   :  { %5407 = vpow2.f32 %v4586_v13 }
 0x11d   :  { %v5406_v15 = vpop.eup %5405 }
 0x11e   :  { %v5408_v18 = vpop.eup %5407  ;;  %v350_v25 = vmul.f32 0.0, %v5406_v15 }
 0x11f   :  { %v370_v19 = vadd.f32 1.0, %v5408_v18 }
 0x121   :  { %5409 = vrcp.f32 %v370_v19 }
 0x12b   :  { %v5410_v21 = vpop.eup %5409 }
 0x12c   :  { %v374_v29 = vmul.f32 0.0, %v5410_v21 }
 0x167   :  { %v353_v16 = vpop.permute.xlu0 %352 }
 0x168   :  { %v355_v17 = vmul.f32 %v5406_v15, %v353_v16 }
 0x16a   :  { %357 = vrot.lane.b32.xlu1 %v355_v17, %s5791_s22 }
 0x182   :  { %v377_v23 = vpop.permute.xlu0 %376 }
 0x183   :  { %v379_v24 = vmul.f32 %v5410_v21, %v377_v23 }
 0x185   :  { %381 = vrot.lane.b32.xlu1 %v379_v24, %s5791_s22 }
 0x1dc   :  { %v358_v26 = vpop.permute.xlu1 %357 }
 0x1dd   :  { %v5975_v27 = vadd.f32 %v358_v26, %v350_v25 }
 0x1df   :  { %5411 = vtanh.f32 %v5975_v27 }
 0x1e9   :  { %v5412_v28 = vpop.eup %5411 }
 0x1ea   :  { %363 = vrot.lane.b32.xlu0 %v5412_v28, %s5790_s0 }
 0x1f7   :  { %v382_v30 = vpop.permute.xlu1 %381 }
 0x1f8   :  { %v5979_v31 = vadd.f32 %v382_v30, %v374_v29 }
 0x1fa   :  { %5413 = vtanh.f32 %v5979_v31 }
 0x204   :  { %v5414_v33 = vpop.eup %5413 }
 0x205   :  { %387 = vrot.lane.b32.xlu1 %v5414_v33, %s5790_s0 }
 0x25c   :  { %v364_v35 = vpop.permute.xlu0 %363 }
 0x25d   :  { %v366_v36 = vmul.f32 %v5406_v15, %v364_v35 }
 0x25f   :  { %v391_v37 = vpack.c.bf16 %v366_v36, %v366_v36 }
 0x261   :  { %393 = vrot.lane.b32.xlu0 %v391_v37, %s5791_s22 }
 0x277   :  { %v388_v39 = vpop.permute.xlu1 %387 }
 0x278   :  { %v390_v40 = vmul.f32 %v5410_v21, %v388_v39 }
 0x27a   :  { %v5984_v41 = vpack.c.bf16 %v390_v40, %v390_v40 }
 0x27c   :  { %452 = vrot.lane.b32.xlu1 %v5984_v41, %s5791_s22 }
 0x2d3   :  { %v394_v42 = vpop.permute.xlu0 %393 }
 0x2d4   :  { %397 = vst.msk [vmem:[#allocation2] sm:$0xf] %vm396_vm2, %v394_v42  ;;  %4935 = vmatmul.mubr.msk.bf16.vlgmr.msra.gmra.mrb[8].mxu1 %vm244_vm3, %v394_v42 }
 0x2d5   :  { %4939 = vmatpush3.bf16.msra.mxu1 %v5887_v12  ;;  %4942 = vmatprep.mubr.msk.bf16.mxu1 %vm5789_vm0, %v5787_v1 }
 0x2d6   :  { %4940 = vmatprep.subr.bf16.mxu1 %v5787_v1 }
 0x2d9   :  { %4941 = vmatpush3.bf16.msra.mxu1 %v5896_v14 }
 0x2da   :  { %4946 = vmatprep.subr.bf16.mxu1 %v5787_v1 }
 0x2ee   :  { %v453_v44 = vpop.permute.xlu1 %452 }
 0x2ef   :  { %4943 = vmatmul.mubr.msk.bf16.vlgmr.msra.gmra.mrb[12].mxu1 %vm244_vm3, %v453_v44 }
 0x2f0   :  { %4947 = vmatpush3.bf16.msra.mxu1 %v5864_v7  ;;  %4950 = vmatprep.mubr.msk.bf16.mxu1 %vm5789_vm0, %v5787_v1 }
 0x2f1   :  { %4948 = vmatprep.subr.bf16.mxu1 %v5787_v1 }
 0x2f4   :  { %4949 = vmatpush3.bf16.msra.mxu1 %v5874_v9 }
 0x2f5   :  { %4962 = vmatprep.subr.bf16.mxu1 %v5787_v1 }
 0x3a7   :  { %v444_v46 = vpop.f32.mrb[8].mxu1 }
 0x3a8   :  { %v450_v48 = vadd.f32 %v444_v46, %v5945_v34  ;;  %v4936_v50 = vpop.f32.mrb[9].mxu1 }
 0x3a9   :  { %v447_v51 = vpop.f32.mrb[10].mxu1 }
 0x3aa   :  { %5415 = vtanh.f32 %v450_v48  ;;  %v4937_v53 = vpop.f32.mrb[11].mxu1  ;;  %v4589_v5 = vmul.f32 -1.442695, %v450_v48 }
 0x3b4   :  { %v5416_v55 = vpop.eup %5415 }
 0x3b5   :  { %507 = vrot.lane.b32.xlu1 %v5416_v55, %s5790_s0 }
 0x3c2   :  { %v491_v57 = vpop.f32.mrb[12].mxu1 }
 0x3c3   :  { %v497_v59 = vadd.f32 %v491_v57, %v5968_v62  ;;  %v4944_v61 = vpop.f32.mrb[13].mxu1 }
 0x3c4   :  { %v494_v63 = vpop.f32.mrb[14].mxu1 }
 0x3c5   :  { %5417 = vtanh.f32 %v497_v59  ;;  %v4945_v3 = vpop.f32.mrb[15].mxu1  ;;  %v4590_v8 = vmul.f32 -1.442695, %v497_v59 }
 0x3c6   :  { %5419 = vpow2.f32 %v4589_v5 }
 0x3cf   :  { %v5418_v4 = vpop.eup %5417 }
 0x3d0   :  { %531 = vrot.lane.b32.xlu0 %v5418_v4, %s5790_s0  ;;  %v5420_v34 = vpop.eup %5419 }
 0x3d1   :  { %v501_v6 = vadd.f32 1.0, %v5420_v34 }
 0x3d3   :  { %5421 = vrcp.f32 %v501_v6 }
 0x3d4   :  { %5423 = vpow2.f32 %v4590_v8 }
 0x3dd   :  { %v5422_v10 = vpop.eup %5421 }
 0x3de   :  { %v5424_v62 = vpop.eup %5423  ;;  %v505_v19 = vmul.f32 %v5422_v10, %v5975_v27 }
 0x3df   :  { %v525_v15 = vadd.f32 1.0, %v5424_v62 }
 0x3e1   :  { %5425 = vrcp.f32 %v525_v15 }
 0x3eb   :  { %v5426_v16 = vpop.eup %5425 }
 0x3ec   :  { %v529_v25 = vmul.f32 %v5426_v16, %v5979_v31 }
 0x427   :  { %v508_v11 = vpop.permute.xlu1 %507 }
 0x428   :  { %v510_v13 = vmul.f32 %v5422_v10, %v508_v11 }
 0x42a   :  { %512 = vrot.lane.b32.xlu1 %v510_v13, %s5791_s22 }
 0x442   :  { %v532_v17 = vpop.permute.xlu0 %531 }
 0x443   :  { %v534_v18 = vmul.f32 %v5426_v16, %v532_v17 }
 0x445   :  { %536 = vrot.lane.b32.xlu0 %v534_v18, %s5791_s22 }
 0x49c   :  { %v513_v21 = vpop.permute.xlu1 %512 }
 0x49d   :  { %v6010_v23 = vadd.f32 %v513_v21, %v505_v19 }
 0x49f   :  { %5427 = vtanh.f32 %v6010_v23 }
 0x4a9   :  { %v5428_v24 = vpop.eup %5427 }
 0x4aa   :  { %518 = vrot.lane.b32.xlu1 %v5428_v24, %s5790_s0 }
 0x4b7   :  { %v537_v26 = vpop.permute.xlu0 %536 }
 0x4b8   :  { %v6015_v28 = vadd.f32 %v537_v26, %v529_v25 }
 0x4ba   :  { %5429 = vtanh.f32 %v6015_v28 }
 0x4c4   :  { %v5430_v29 = vpop.eup %5429 }
 0x4c5   :  { %542 = vrot.lane.b32.xlu0 %v5430_v29, %s5790_s0 }
 0x51c   :  { %v519_v30 = vpop.permute.xlu1 %518 }
 0x51d   :  { %v521_v27 = vmul.f32 %v5422_v10, %v519_v30 }
 0x51f   :  { %v6019_v33 = vpack.c.bf16 %v521_v27, %v521_v27 }
 0x521   :  { %562 = vrot.lane.b32.xlu1 %v6019_v33, %s5791_s22 }
 0x537   :  { %v543_v35 = vpop.permute.xlu0 %542 }
 0x538   :  { %v545_v36 = vmul.f32 %v5426_v16, %v543_v35 }
 0x53a   :  { %v6023_v37 = vpack.c.bf16 %v545_v36, %v545_v36 }
 0x53c   :  { %609 = vrot.lane.b32.xlu0 %v6023_v37, %s5791_s22 }
 0x593   :  { %v563_v31 = vpop.permute.xlu1 %562 }
 0x594   :  { %4951 = vmatmul.mubr.msk.bf16.vlgmr.msra.gmra.mrb[16].mxu1 %vm244_vm3, %v563_v31 }
 0x595   :  { %4963 = vmatpush3.bf16.msra.mxu1 %v5864_v7  ;;  %4966 = vmatprep.mubr.msk.bf16.mxu1 %vm5789_vm0, %v5787_v1 }
 0x596   :  { %4964 = vmatprep.subr.bf16.mxu1 %v5787_v1 }
 0x599   :  { %4965 = vmatpush3.bf16.msra.mxu1 %v5874_v9 }
 0x59a   :  { %4978 = vmatprep.subr.bf16.mxu1 %v5787_v1 }
 0x5ae   :  { %v610_v39 = vpop.permute.xlu0 %609 }
 0x5af   :  { %4959 = vmatmul.mubr.msk.bf16.vlgmr.msra.gmra.mrb[16].mxu0 %vm244_vm3, %v610_v39 }
 0x5b0   :  { %4971 = vmatpush3.bf16.msra.mxu0 %v5887_v12  ;;  %4974 = vmatprep.mubr.msk.bf16.mxu0 %vm5789_vm0, %v5787_v1 }
 0x5b1   :  { %4972 = vmatprep.subr.bf16.mxu0 %v5787_v1 }
 0x5b4   :  { %4973 = vmatpush3.bf16.msra.mxu0 %v5896_v14 }
 0x5b5   :  { %4986 = vmatprep.subr.bf16.mxu0 %v5787_v1 }
 0x667   :  { %v601_v40 = vpop.f32.mrb[16].mxu1 }
 0x668   :  { %v607_v42 = vadd.f32 %v601_v40, %v5949_v43  ;;  %v4952_v44 = vpop.f32.mrb[17].mxu1 }
 0x669   :  { %v604_v46 = vpop.f32.mrb[18].mxu1 }
 0x66a   :  { %5431 = vtanh.f32 %v607_v42  ;;  %v4953_v48 = vpop.f32.mrb[19].mxu1  ;;  %v4593_v63 = vmul.f32 -1.442695, %v607_v42 }
 0x674   :  { %v5432_v50 = vpop.eup %5431 }
 0x675   :  { %664 = vrot.lane.b32.xlu1 %v5432_v50, %s5790_s0 }
 0x682   :  { %v648_v51 = vpop.f32.mrb[16].mxu0 }
 0x683   :  { %v654_v53 = vadd.f32 %v648_v51, %v5964_v58  ;;  %v4960_v55 = vpop.f32.mrb[17].mxu0 }
 0x684   :  { %v651_v57 = vpop.f32.mrb[18].mxu0 }
 0x685   :  { %5433 = vtanh.f32 %v654_v53  ;;  %v4961_v59 = vpop.f32.mrb[19].mxu0  ;;  %v4594_v4 = vmul.f32 -1.442695, %v654_v53 }
 0x686   :  { %5435 = vpow2.f32 %v4593_v63 }
 0x68f   :  { %v5434_v61 = vpop.eup %5433 }
 0x690   :  { %688 = vrot.lane.b32.xlu0 %v5434_v61, %s5790_s0  ;;  %v5436_v43 = vpop.eup %5435 }
 0x691   :  { %v658_v3 = vadd.f32 1.0, %v5436_v43 }
 0x693   :  { %5437 = vrcp.f32 %v658_v3 }
 0x694   :  { %5439 = vpow2.f32 %v4594_v4 }
 0x69d   :  { %v5438_v5 = vpop.eup %5437 }
 0x69e   :  { %v5440_v58 = vpop.eup %5439  ;;  %v662_v62 = vmul.f32 %v5438_v5, %v6010_v23 }
 0x69f   :  { %v682_v8 = vadd.f32 1.0, %v5440_v58 }
 0x6a1   :  { %5441 = vrcp.f32 %v682_v8 }
 0x6ab   :  { %v5442_v10 = vpop.eup %5441 }
 0x6ac   :  { %v686_v18 = vmul.f32 %v5442_v10, %v6015_v28 }
 0x6e7   :  { %v665_v34 = vpop.permute.xlu1 %664 }
 0x6e8   :  { %v667_v6 = vmul.f32 %v5438_v5, %v665_v34 }
 0x6ea   :  { %669 = vrot.lane.b32.xlu1 %v667_v6, %s5791_s22 }
 0x702   :  { %v689_v11 = vpop.permute.xlu0 %688 }
 0x703   :  { %v691_v13 = vmul.f32 %v5442_v10, %v689_v11 }
 0x705   :  { %693 = vrot.lane.b32.xlu0 %v691_v13, %s5791_s22 }
 0x75c   :  { %v670_v15 = vpop.permute.xlu1 %669 }
 0x75d   :  { %v6048_v16 = vadd.f32 %v670_v15, %v662_v62 }
 0x75f   :  { %5443 = vtanh.f32 %v6048_v16 }
 0x769   :  { %v5444_v17 = vpop.eup %5443 }
 0x76a   :  { %675 = vrot.lane.b32.xlu1 %v5444_v17, %s5790_s0 }
 0x777   :  { %v694_v19 = vpop.permute.xlu0 %693 }
 0x778   :  { %v6053_v21 = vadd.f32 %v694_v19, %v686_v18 }
 0x77a   :  { %5445 = vtanh.f32 %v6053_v21 }
 0x784   :  { %v5446_v24 = vpop.eup %5445 }
 0x785   :  { %699 = vrot.lane.b32.xlu0 %v5446_v24, %s5790_s0 }
 0x7dc   :  { %v676_v25 = vpop.permute.xlu1 %675 }
 0x7dd   :  { %v678_v23 = vmul.f32 %v5438_v5, %v676_v25 }
 0x7df   :  { %v703_v26 = vpack.c.bf16 %v678_v23, %v678_v23 }
 0x7e1   :  { %705 = vrot.lane.b32.xlu1 %v703_v26, %s5791_s22 }
 0x7f7   :  { %v700_v29 = vpop.permute.xlu0 %699 }
 0x7f8   :  { %v702_v30 = vmul.f32 %v5442_v10, %v700_v29 }
 0x7fa   :  { %v6058_v27 = vpack.c.bf16 %v702_v30, %v702_v30 }
 0x7fc   :  { %762 = vrot.lane.b32.xlu0 %v6058_v27, %s5791_s22 }
 0x853   :  { %v706_v28 = vpop.permute.xlu1 %705 }
 0x854   :  { %708 = vst.msk [vmem:[#allocation2 + $0x8] sm:$0xf] %vm396_vm2, %v706_v28  ;;  %4967 = vmatmul.mubr.msk.bf16.vlgmr.msra.gmra.mrb[20].mxu1 %vm244_vm3, %v706_v28 }
 0x855   :  { %4979 = vmatpush3.bf16.msra.mxu1 %v5864_v7  ;;  %4982 = vmatprep.mubr.msk.bf16.mxu1 %vm5789_vm0, %v5787_v1 }
 0x856   :  { %4980 = vmatprep.subr.bf16.mxu1 %v5787_v1 }
 0x859   :  { %4981 = vmatpush3.bf16.msra.mxu1 %v5874_v9 }
 0x85a   :  { %4994 = vmatprep.subr.bf16.mxu1 %v5787_v1 }
 0x86e   :  { %v763_v35 = vpop.permute.xlu0 %762 }
 0x86f   :  { %4975 = vmatmul.mubr.msk.bf16.vlgmr.msra.gmra.mrb[20].mxu0 %vm244_vm3, %v763_v35 }
 0x870   :  { %4987 = vmatpush3.bf16.msra.mxu0 %v5887_v12  ;;  %4990 = vmatprep.mubr.msk.bf16.mxu0 %vm5789_vm0, %v5787_v1 }
 0x871   :  { %4988 = vmatprep.subr.bf16.mxu0 %v5787_v1 }
 0x874   :  { %4989 = vmatpush3.bf16.msra.mxu0 %v5896_v14 }
 0x875   :  { %5002 = vmatprep.subr.bf16.mxu0 %v5787_v1 }
 0x927   :  { %v754_v36 = vpop.f32.mrb[20].mxu1 }
 0x928   :  { %v760_v31 = vadd.f32 %v754_v36, %v5953_v47  ;;  %v4968_v39 = vpop.f32.mrb[21].mxu1 }
 0x929   :  { %v757_v40 = vpop.f32.mrb[22].mxu1 }
 0x92a   :  { %5447 = vtanh.f32 %v760_v31  ;;  %v4969_v42 = vpop.f32.mrb[23].mxu1  ;;  %v4597_v57 = vmul.f32 -1.442695, %v760_v31 }
 0x934   :  { %v5448_v44 = vpop.eup %5447 }
 0x935   :  { %817 = vrot.lane.b32.xlu1 %v5448_v44, %s5790_s0 }
 0x942   :  { %v801_v46 = vpop.f32.mrb[20].mxu0 }
 0x943   :  { %v807_v48 = vadd.f32 %v801_v46, %v5960_v54  ;;  %v4976_v50 = vpop.f32.mrb[21].mxu0 }
 0x944   :  { %v804_v51 = vpop.f32.mrb[22].mxu0 }
 0x945   :  { %5449 = vtanh.f32 %v807_v48  ;;  %v4977_v53 = vpop.f32.mrb[23].mxu0  ;;  %v4598_v61 = vmul.f32 -1.442695, %v807_v48 }
 0x946   :  { %5451 = vpow2.f32 %v4597_v57 }
 0x94f   :  { %v5450_v55 = vpop.eup %5449 }
 0x950   :  { %841 = vrot.lane.b32.xlu0 %v5450_v55, %s5790_s0  ;;  %v5452_v47 = vpop.eup %5451 }
 0x951   :  { %v811_v59 = vadd.f32 1.0, %v5452_v47 }
 0x953   :  { %5453 = vrcp.f32 %v811_v59 }
 0x954   :  { %5455 = vpow2.f32 %v4598_v61 }
 0x95d   :  { %v5454_v63 = vpop.eup %5453 }
 0x95e   :  { %v5456_v54 = vpop.eup %5455  ;;  %v815_v58 = vmul.f32 %v5454_v63, %v6048_v16 }
 0x95f   :  { %v835_v4 = vadd.f32 1.0, %v5456_v54 }
 0x961   :  { %5457 = vrcp.f32 %v835_v4 }
 0x96b   :  { %v5458_v5 = vpop.eup %5457 }
 0x96c   :  { %v839_v13 = vmul.f32 %v5458_v5, %v6053_v21 }
 0x9a7   :  { %v818_v43 = vpop.permute.xlu1 %817 }
 0x9a8   :  { %v820_v3 = vmul.f32 %v5454_v63, %v818_v43 }
 0x9aa   :  { %822 = vrot.lane.b32.xlu1 %v820_v3, %s5791_s22 }
 0x9c2   :  { %v842_v34 = vpop.permute.xlu0 %841 }
 0x9c3   :  { %v844_v6 = vmul.f32 %v5458_v5, %v842_v34 }
 0x9c5   :  { %846 = vrot.lane.b32.xlu0 %v844_v6, %s5791_s22 }
 0xa1c   :  { %v823_v8 = vpop.permute.xlu1 %822 }
 0xa1d   :  { %v6084_v10 = vadd.f32 %v823_v8, %v815_v58 }
 0xa1f   :  { %5459 = vtanh.f32 %v6084_v10 }
 0xa29   :  { %v5460_v11 = vpop.eup %5459 }
 0xa2a   :  { %828 = vrot.lane.b32.xlu1 %v5460_v11, %s5790_s0 }
 0xa37   :  { %v847_v62 = vpop.permute.xlu0 %846 }
 0xa38   :  { %v6089_v15 = vadd.f32 %v847_v62, %v839_v13 }
 0xa3a   :  { %5461 = vtanh.f32 %v6089_v15 }
 0xa44   :  { %v5462_v17 = vpop.eup %5461 }
 0xa45   :  { %852 = vrot.lane.b32.xlu0 %v5462_v17, %s5790_s0 }
 0xa9c   :  { %v829_v18 = vpop.permute.xlu1 %828 }
 0xa9d   :  { %v831_v16 = vmul.f32 %v5454_v63, %v829_v18 }
 0xa9f   :  { %v6093_v19 = vpack.c.bf16 %v831_v16, %v831_v16 }
 0xaa1   :  { %870 = vrot.lane.b32.xlu1 %v6093_v19, %s5791_s22 }
 0xab7   :  { %v853_v24 = vpop.permute.xlu0 %852 }
 0xab8   :  { %v855_v25 = vmul.f32 %v5458_v5, %v853_v24 }
 0xaba   :  { %v6097_v23 = vpack.c.bf16 %v855_v25, %v855_v25 }
 0xabc   :  { %917 = vrot.lane.b32.xlu0 %v6097_v23, %s5791_s22 }
 0xb13   :  { %v871_v21 = vpop.permute.xlu1 %870 }
 0xb14   :  { %4983 = vmatmul.mubr.msk.bf16.vlgmr.msra.gmra.mrb[24].mxu1 %vm244_vm3, %v871_v21 }
 0xb15   :  { %4995 = vmatpush3.bf16.msra.mxu1 %v5864_v7  ;;  %4998 = vmatprep.mubr.msk.bf16.mxu1 %vm5789_vm0, %v5787_v1 }
 0xb16   :  { %4996 = vmatprep.subr.bf16.mxu1 %v5787_v1 }
 0xb19   :  { %4997 = vmatpush3.bf16.msra.mxu1 %v5874_v9 }
 0xb1a   :  { %5010 = vmatprep.subr.bf16.mxu1 %v5787_v1 }
 0xb2e   :  { %v918_v26 = vpop.permute.xlu0 %917 }
 0xb2f   :  { %4991 = vmatmul.mubr.msk.bf16.vlgmr.msra.gmra.mrb[24].mxu0 %vm244_vm3, %v918_v26 }
 0xb30   :  { %5003 = vmatpush3.bf16.msra.mxu0 %v5887_v12  ;;  %5006 = vmatprep.mubr.msk.bf16.mxu0 %vm5789_vm0, %v5787_v1 }
 0xb31   :  { %5004 = vmatprep.subr.bf16.mxu0 %v5787_v1 }
 0xb34   :  { %5005 = vmatpush3.bf16.msra.mxu0 %v5896_v14 }
 0xb35   :  { %5018 = vmatprep.subr.bf16.mxu0 %v5787_v1 }
 0xbe7   :  { %v909_v29 = vpop.f32.mrb[24].mxu1 }
 0xbe8   :  { %v915_v30 = vadd.f32 %v909_v29, %v5958_v52  ;;  %v4984_v28 = vpop.f32.mrb[25].mxu1 }
 0xbe9   :  { %v912_v35 = vpop.f32.mrb[26].mxu1 }
 0xbea   :  { %5463 = vtanh.f32 %v915_v30  ;;  %v4985_v36 = vpop.f32.mrb[27].mxu1  ;;  %v4601_v50 = vmul.f32 -1.442695, %v915_v30 }
 0xbf4   :  { %v5464_v31 = vpop.eup %5463 }
 0xbf5   :  { %972 = vrot.lane.b32.xlu1 %v5464_v31, %s5790_s0 }
 0xc02   :  { %v956_v39 = vpop.f32.mrb[24].mxu0 }
 0xc03   :  { %v962_v40 = vadd.f32 %v956_v39, %v5955_v49  ;;  %v4992_v42 = vpop.f32.mrb[25].mxu0 }
 0xc04   :  { %v959_v44 = vpop.f32.mrb[26].mxu0 }
 0xc05   :  { %5465 = vtanh.f32 %v962_v40  ;;  %v4993_v46 = vpop.f32.mrb[27].mxu0  ;;  %v4602_v53 = vmul.f32 -1.442695, %v962_v40 }
 0xc06   :  { %5467 = vpow2.f32 %v4601_v50 }
 0xc0f   :  { %v5466_v48 = vpop.eup %5465 }
 0xc10   :  { %996 = vrot.lane.b32.xlu0 %v5466_v48, %s5790_s0  ;;  %v5468_v52 = vpop.eup %5467 }
 0xc11   :  { %v966_v51 = vadd.f32 1.0, %v5468_v52 }
 0xc13   :  { %5469 = vrcp.f32 %v966_v51 }
 0xc14   :  { %5471 = vpow2.f32 %v4602_v53 }
 0xc1d   :  { %v5470_v55 = vpop.eup %5469 }
 0xc1e   :  { %v5472_v49 = vpop.eup %5471  ;;  %v970_v3 = vmul.f32 %v5470_v55, %v6084_v10 }
 0xc1f   :  { %v990_v59 = vadd.f32 1.0, %v5472_v49 }
 0xc21   :  { %5473 = vrcp.f32 %v990_v59 }
 0xc2b   :  { %v5474_v61 = vpop.eup %5473 }
 0xc2c   :  { %v994_v34 = vmul.f32 %v5474_v61, %v6089_v15 }
 0xc67   :  { %v973_v57 = vpop.permute.xlu1 %972 }
 0xc68   :  { %v975_v47 = vmul.f32 %v5470_v55, %v973_v57 }
 0xc6a   :  { %977 = vrot.lane.b32.xlu1 %v975_v47, %s5791_s22 }
 0xc82   :  { %v997_v63 = vpop.permute.xlu0 %996 }
 0xc83   :  { %v999_v43 = vmul.f32 %v5474_v61, %v997_v63 }
 0xc85   :  { %1001 = vrot.lane.b32.xlu0 %v999_v43, %s5791_s22 }
 0xcdc   :  { %v978_v54 = vpop.permute.xlu1 %977 }
 0xcdd   :  { %v6122_v4 = vadd.f32 %v978_v54, %v970_v3 }
 0xcdf   :  { %5475 = vtanh.f32 %v6122_v4 }
 0xce9   :  { %v5476_v5 = vpop.eup %5475 }
 0xcea   :  { %983 = vrot.lane.b32.xlu1 %v5476_v5, %s5790_s0 }
 0xcf7   :  { %v1002_v6 = vpop.permute.xlu0 %1001 }
 0xcf8   :  { %v6127_v58 = vadd.f32 %v1002_v6, %v994_v34  ;;  %v5783_v6 = vld [vmem:[%s7209_s2] sm:$0xff]  }
 0xcfa   :  { %5477 = vtanh.f32 %v6127_v58 }
 0xd04   :  { %v5478_v8 = vpop.eup %5477 }
 0xd05   :  { %1007 = vrot.lane.b32.xlu0 %v5478_v8, %s5790_s0 }
 0xd5c   :  { %v984_v11 = vpop.permute.xlu1 %983 }
 0xd5d   :  { %v986_v10 = vmul.f32 %v5470_v55, %v984_v11  ;;  %v5785_v11 = vld [vmem:[%s7209_s2 + $0x10] sm:$0xff]  }
 0xd5f   :  { %v1011_v13 = vpack.c.bf16 %v986_v10, %v986_v10  ;;  %v5786_v10 = vld [vmem:[%s7209_s2 + $0x18] sm:$0xff]  }
 0xd61   :  { %1013 = vrot.lane.b32.xlu1 %v1011_v13, %s5791_s22 }
 0xd77   :  { %v1008_v62 = vpop.permute.xlu0 %1007 }
 0xd78   :  { %v1010_v17 = vmul.f32 %v5474_v61, %v1008_v62 }
 0xd7a   :  { %v6132_v18 = vpack.c.bf16 %v1010_v17, %v1010_v17 }
 0xd7c   :  { %1070 = vrot.lane.b32.xlu0 %v6132_v18, %s5791_s22 }
 0xdd3   :  { %v6136_v15 = vpop.permute.xlu1 %1013 }
 0xdd4   :  { %4999 = vmatmul.mubr.msk.bf16.vlgmr.msra.gmra.mrb[28].mxu1 %vm244_vm3, %v6136_v15 }
 0xdd5   :  { %5011 = vmatpush3.bf16.msra.mxu1 %v5864_v7  ;;  %5014 = vmatprep.mubr.msk.bf16.mxu1 %vm5789_vm0, %v5787_v1 }
 0xdd6   :  { %5012 = vmatprep.subr.bf16.mxu1 %v5787_v1 }
 0xdd9   :  { %5013 = vmatpush3.bf16.msra.mxu1 %v5874_v9 }
 0xdda   :  { %5026 = vmatprep.subr.bf16.mxu1 %v5787_v1 }
 0xdee   :  { %v1071_v16 = vpop.permute.xlu0 %1070 }
 0xdef   :  { %5007 = vmatmul.mubr.msk.bf16.vlgmr.msra.gmra.mrb[28].mxu0 %vm244_vm3, %v1071_v16 }
 0xdf0   :  { %5019 = vmatpush3.bf16.msra.mxu0 %v5887_v12  ;;  %5022 = vmatprep.mubr.msk.bf16.mxu0 %vm5789_vm0, %v5787_v1 }
 0xdf1   :  { %5020 = vmatprep.subr.bf16.mxu0 %v5787_v1 }
 0xdf4   :  { %5021 = vmatpush3.bf16.msra.mxu0 %v5896_v14 }
 0xdf5   :  { %5034 = vmatprep.subr.bf16.mxu0 %v5787_v1 }
 0xea7   :  { %v1062_v7 = vpop.f32.mrb[28].mxu1 }
 0xea8   :  { %v1068_v24 = vadd.f32 %v1062_v7, %v5962_v56  ;;  %v5000_v9 = vpop.f32.mrb[29].mxu1 }
 0xea9   :  { %v1065_v25 = vpop.f32.mrb[30].mxu1 }
 0xeaa   :  { %5479 = vtanh.f32 %v1068_v24  ;;  %v5001_v21 = vpop.f32.mrb[31].mxu1  ;;  %v4605_v36 = vmul.f32 -1.442695, %v1068_v24 }
 0xeb4   :  { %v5480_v26 = vpop.eup %5479 }
 0xeb5   :  { %1125 = vrot.lane.b32.xlu1 %v5480_v26, %s5790_s0 }
 0xec2   :  { %v1109_v12 = vpop.f32.mrb[28].mxu0 }
 0xec3   :  { %v1115_v29 = vadd.f32 %v1109_v12, %v5951_v45  ;;  %v5008_v30 = vpop.f32.mrb[29].mxu0 }
 0xec4   :  { %v1112_v28 = vpop.f32.mrb[30].mxu0 }
 0xec5   :  { %5481 = vtanh.f32 %v1115_v29  ;;  %v5009_v35 = vpop.f32.mrb[31].mxu0  ;;  %v4606_v39 = vmul.f32 -1.442695, %v1115_v29 }
 0xec6   :  { %5483 = vpow2.f32 %v4605_v36 }
 0xecf   :  { %v5482_v14 = vpop.eup %5481 }
 0xed0   :  { %1149 = vrot.lane.b32.xlu0 %v5482_v14, %s5790_s0  ;;  %v5484_v56 = vpop.eup %5483 }
 0xed1   :  { %v1119_v31 = vadd.f32 1.0, %v5484_v56 }
 0xed3   :  { %5485 = vrcp.f32 %v1119_v31 }
 0xed4   :  { %5487 = vpow2.f32 %v4606_v39 }
 0xedd   :  { %v5486_v40 = vpop.eup %5485 }
 0xede   :  { %v5488_v45 = vpop.eup %5487  ;;  %v1123_v51 = vmul.f32 %v5486_v40, %v6122_v4 }
 0xedf   :  { %v1143_v46 = vadd.f32 1.0, %v5488_v45 }
 0xee1   :  { %5489 = vrcp.f32 %v1143_v46 }
 0xeeb   :  { %v5490_v48 = vpop.eup %5489 }
 0xeec   :  { %v1147_v47 = vmul.f32 %v5490_v48, %v6127_v58  ;;  %v5784_v58 = vld [vmem:[%s7209_s2 + $0x8] sm:$0xff]  }
 0xf27   :  { %v1126_v42 = vpop.permute.xlu1 %1125 }
 0xf28   :  { %v1128_v44 = vmul.f32 %v5486_v40, %v1126_v42 }
 0xf2a   :  { %1130 = vrot.lane.b32.xlu1 %v1128_v44, %s5791_s22 }
 0xf42   :  { %v1150_v50 = vpop.permute.xlu0 %1149 }
 0xf43   :  { %v1152_v52 = vmul.f32 %v5490_v48, %v1150_v50 }
 0xf45   :  { %1154 = vrot.lane.b32.xlu0 %v1152_v52, %s5791_s22 }
 0xf9c   :  { %v1131_v53 = vpop.permute.xlu1 %1130 }
 0xf9d   :  { %v6160_v55 = vadd.f32 %v1131_v53, %v1123_v51 }
 0xf9f   :  { %5491 = vtanh.f32 %v6160_v55 }
 0xfa9   :  { %v5492_v57 = vpop.eup %5491 }
 0xfaa   :  { %1136 = vrot.lane.b32.xlu1 %v5492_v57, %s5790_s0 }
 0xfb7   :  { %v1155_v49 = vpop.permute.xlu0 %1154 }
 0xfb8   :  { %v6165_v59 = vadd.f32 %v1155_v49, %v1147_v47 }
 0xfba   :  { %5493 = vtanh.f32 %v6165_v59 }
 0xfc4   :  { %v5494_v61 = vpop.eup %5493 }
 0xfc5   :  { %1160 = vrot.lane.b32.xlu0 %v5494_v61, %s5790_s0 }
0x101c   :  { %v1137_v63 = vpop.permute.xlu1 %1136 }
0x101d   :  { %v1139_v43 = vmul.f32 %v5486_v40, %v1137_v63 }
0x101f   :  { %v6169_v3 = vpack.c.bf16 %v1139_v43, %v1139_v43 }
0x1021   :  { %1178 = vrot.lane.b32.xlu1 %v6169_v3, %s5791_s22 }
0x1037   :  { %v1161_v54 = vpop.permute.xlu0 %1160 }
0x1038   :  { %v1163_v4 = vmul.f32 %v5490_v48, %v1161_v54 }
0x103a   :  { %v6173_v5 = vpack.c.bf16 %v1163_v4, %v1163_v4 }
0x103c   :  { %1225 = vrot.lane.b32.xlu0 %v6173_v5, %s5791_s22 }
0x1093   :  { %v1179_v34 = vpop.permute.xlu1 %1178 }
0x1094   :  { %5015 = vmatmul.mubr.msk.bf16.vlgmr.msra.gmra.mrb[32].mxu1 %vm244_vm3, %v1179_v34 }
0x1095   :  { %5027 = vmatpush3.bf16.msra.mxu1 %v5783_v6  ;;  %5030 = vmatprep.mubr.msk.bf16.mxu1 %vm5789_vm0, %v5787_v1 }
0x1096   :  { %5028 = vmatprep.subr.bf16.mxu1 %v5787_v1 }
0x1099   :  { %5029 = vmatpush3.bf16.msra.mxu1 %v5784_v58 }
0x10ae   :  { %v1226_v8 = vpop.permute.xlu0 %1225 }
0x10af   :  { %5023 = vmatmul.mubr.msk.bf16.vlgmr.msra.gmra.mrb[32].mxu0 %vm244_vm3, %v1226_v8 }
0x10b0   :  { %5035 = vmatpush3.bf16.msra.mxu0 %v5785_v11  ;;  %5038 = vmatprep.mubr.msk.bf16.mxu0 %vm5789_vm0, %v5787_v1 }
0x10b1   :  { %5036 = vmatprep.subr.bf16.mxu0 %v5787_v1 }
0x10b4   :  { %5037 = vmatpush3.bf16.msra.mxu0 %v5786_v10 }
0x10b5   :  { %5042 = vmatprep.subr.bf16.mxu0 %v5787_v1 }
0x1167   :  { %v1217_v13 = vpop.f32.mrb[32].mxu1 }
0x1168   :  { %v1223_v62 = vadd.f32 %v1217_v13, %v5966_v60  ;;  %v5016_v17 = vpop.f32.mrb[33].mxu1 }
0x1169   :  { %v1220_v16 = vpop.f32.mrb[34].mxu1 }
0x116a   :  { %5495 = vtanh.f32 %v1223_v62  ;;  %v5017_v7 = vpop.f32.mrb[35].mxu1  ;;  %v4609_v30 = vmul.f32 -1.442695, %v1223_v62 }
0x1174   :  { %v5496_v24 = vpop.eup %5495 }
0x1175   :  { %1280 = vrot.lane.b32.xlu1 %v5496_v24, %s5790_s0 }
0x1182   :  { %v1264_v9 = vpop.f32.mrb[32].mxu0 }
0x1183   :  { %v1270_v25 = vadd.f32 %v1264_v9, %v5947_v38  ;;  %v5024_v21 = vpop.f32.mrb[33].mxu0 }
0x1184   :  { %v1267_v26 = vpop.f32.mrb[34].mxu0 }
0x1185   :  { %5497 = vtanh.f32 %v1270_v25  ;;  %v5025_v12 = vpop.f32.mrb[35].mxu0  ;;  %v4610_v35 = vmul.f32 -1.442695, %v1270_v25 }
0x1186   :  { %5499 = vpow2.f32 %v4609_v30 }
0x118f   :  { %v5498_v29 = vpop.eup %5497 }
0x1190   :  { %1304 = vrot.lane.b32.xlu0 %v5498_v29, %s5790_s0  ;;  %v5500_v60 = vpop.eup %5499 }
0x1191   :  { %v1274_v28 = vadd.f32 1.0, %v5500_v60 }
0x1193   :  { %5501 = vrcp.f32 %v1274_v28 }
0x1194   :  { %5503 = vpow2.f32 %v4610_v35 }
0x119d   :  { %v5502_v14 = vpop.eup %5501 }
0x119e   :  { %v5504_v38 = vpop.eup %5503  ;;  %v1278_v44 = vmul.f32 %v5502_v14, %v6160_v55 }
0x119f   :  { %v1298_v31 = vadd.f32 1.0, %v5504_v38  ;;  %v858_v38 = vrot.slane %v6093_v19, 4  ;;  %v548_v19 = vrot.slane %v6019_v33, 4  ;;  %v5358_v33 = vld [vmem:[%s7208_s1 + $0x50] ss:$8 sps:$4 sm:$0xff]  }
0x11a1   :  { %5505 = vrcp.f32 %v1298_v31 }
0x11ab   :  { %v5506_v39 = vpop.eup %5505 }
0x11ac   :  { %v1302_v50 = vmul.f32 %v5506_v39, %v6165_v59 }
0x11e7   :  { %v1281_v36 = vpop.permute.xlu1 %1280 }
0x11e8   :  { %v1283_v56 = vmul.f32 %v5502_v14, %v1281_v36 }
0x11ea   :  { %1285 = vrot.lane.b32.xlu1 %v1283_v56, %s5791_s22 }
0x1202   :  { %v1305_v40 = vpop.permute.xlu0 %1304 }
0x1203   :  { %v1307_v42 = vmul.f32 %v5506_v39, %v1305_v40 }
0x1205   :  { %1309 = vrot.lane.b32.xlu0 %v1307_v42, %s5791_s22  ;;  %v400_v42 = vrot.slane %v5984_v41, 4  ;;  %v5360_v41 = vld [vmem:[%s7208_s1 + $0x54] ss:$8 sps:$4 sm:$0xff]  }
0x125c   :  { %v1286_v45 = vpop.permute.xlu1 %1285 }
0x125d   :  { %v1288_v46 = vadd.f32 %v1286_v45, %v1278_v44  ;;  %v5357_v45 = vld [vmem:[%s7208_s1 + $0x44] ss:$8 sps:$4 sm:$0xff]  }
0x125e   :  { %1563 = vmatprep.subr.bf16.mxu1 %v5357_v45 }
0x125f   :  { %5507 = vtanh.f32 %v1288_v46 }
0x1269   :  { %v5508_v48 = vpop.eup %5507 }
0x126a   :  { %1291 = vrot.lane.b32.xlu1 %v5508_v48, %s5790_s0 }
0x1277   :  { %v1310_v52 = vpop.permute.xlu0 %1309 }
0x1278   :  { %v6207_v51 = vadd.f32 %v1310_v52, %v1302_v50 }
0x127a   :  { %5509 = vtanh.f32 %v6207_v51 }
0x1284   :  { %v5510_v53 = vpop.eup %5509 }
0x1285   :  { %1315 = vrot.lane.b32.xlu0 %v5510_v53, %s5790_s0 }
0x12dc   :  { %v1292_v57 = vpop.permute.xlu1 %1291 }
0x12dd   :  { %v1294_v47 = vmul.f32 %v5502_v14, %v1292_v57 }
0x12df   :  { %v1319_v49 = vpack.c.bf16 %v1294_v47, %v1294_v47  ;;  %v5363_v47 = vld [vmem:[%s7208_s1 + $0x64] ss:$8 sps:$4 sm:$0xff]  }
0x12e1   :  { %1321 = vrot.lane.b32.xlu1 %v1319_v49, %s5791_s22  ;;  %v5361_v49 = vld [vmem:[%s7208_s1 + $0x60] ss:$8 sps:$4 sm:$0xff]  }
0x12f7   :  { %v1316_v55 = vpop.permute.xlu0 %1315 }
0x12f8   :  { %v1318_v61 = vmul.f32 %v5506_v39, %v1316_v55  ;;  %v6272_v55 = vld [vmem:[%s7209_s2 + $0x20] sm:$0xff]  }
0x12fa   :  { %v1325_v63 = vpack.c.bf16 %v1318_v61, %v1318_v61 }
0x12fc   :  { %1378 = vrot.lane.b32.xlu0 %v1325_v63, %s5791_s22  ;;  %v1327_v56 = vrot.slane %v1325_v63, 4  ;;  %v5365_v63 = vld [vmem:[%s7208_s1 + $0x70] ss:$8 sps:$4 sm:$0xff]  }
0x1353   :  { %v6213_v43 = vpop.permute.xlu1 %1321 }
0x1354   :  { %5031 = vmatmul.mubr.msk.bf16.vlgmr.msra.gmra.mrb[36].mxu1 %vm244_vm3, %v6213_v43 }
0x1355   :  { %1595 = vmatprep.mubr.bf16.mxu1 %v5788_v2 }
0x136e   :  { %v1379_v59 = vpop.permute.xlu0 %1378 }
0x136f   :  { %5039 = vmatmul.mubr.msk.bf16.vlgmr.msra.gmra.mrb[36].mxu0 %vm244_vm3, %v1379_v59  ;;  %v6286_v59 = vld [vmem:[%s7209_s2 + $0x28] sm:$0xff]  }
0x1370   :  { %5046 = vmatprep.mubr.msk.bf16.mxu0 %vm5789_vm0, %v5787_v1  ;;  %5043 = vmatpush3.bf16.msra.mxu0 %v6272_v55 }
0x1371   :  { %5044 = vmatprep.subr.bf16.mxu0 %v5787_v1 }
0x1374   :  { %5045 = vmatpush3.bf16.msra.mxu0 %v6286_v59 }
0x1375   :  { %5050 = vmatprep.subr.bf16.mxu0 %v5787_v1 }
0x1377   :  { %5047 = vmatmul.mubr.bf16.vlgmr.msra.gmra.mrb[40].mxu0 %v5788_v2 }
0x1378   :  { %5054 = vmatprep.mubr.msk.bf16.mxu0 %vm5789_vm0, %v5787_v1 }
0x1427   :  { %v1370_v54 = vpop.f32.mrb[36].mxu1 }
0x1428   :  { %v1376_v4 = vadd.f32 %v1370_v54, %v5970_v0  ;;  %v5032_v34 = vpop.f32.mrb[37].mxu1 }
0x1429   :  { %v1373_v6 = vpop.f32.mrb[38].mxu1 }
0x142a   :  { %5511 = vtanh.f32 %v1376_v4  ;;  %v5033_v58 = vpop.f32.mrb[39].mxu1  ;;  %v4613_v7 = vmul.f32 -1.442695, %v1376_v4 }
0x142b   :  { %v1019_v58 = vrot.slane %v6132_v18, 4  ;;  %v6313_v18 = vld [vmem:[%s7209_s2 + $0x38] sm:$0xff]  }
0x1434   :  { %v5512_v8 = vpop.eup %5511 }
0x1435   :  { %1433 = vrot.lane.b32.xlu1 %v5512_v8, %s5790_s0  ;;  %v711_v8 = vrot.slane %v6058_v27, 4 }
0x1442   :  { %v1417_v11 = vpop.f32.mrb[36].mxu0 }
0x1443   :  { %v1423_v10 = vadd.f32 %v1417_v11, %v5943_v32  ;;  %v5040_v13 = vpop.f32.mrb[37].mxu0  ;;  %v1166_v11 = vrot.slane %v6169_v3, 4 }
0x1444   :  { %v1420_v62 = vpop.f32.mrb[38].mxu0 }
0x1445   :  { %5513 = vtanh.f32 %v1423_v10  ;;  %v5041_v17 = vpop.f32.mrb[39].mxu0  ;;  %v4614_v9 = vmul.f32 -1.442695, %v1423_v10  ;;  %v6306_v10 = vld [vmem:[%s7209_s2 + $0x30] sm:$0xff]  }
0x1446   :  { %5515 = vpow2.f32 %v4613_v7  ;;  %5051 = vmatpush3.bf16.msra.mxu0 %v6306_v10 }
0x1447   :  { %5052 = vmatprep.subr.bf16.mxu0 %v5787_v1 }
0x144a   :  { %5053 = vmatpush3.bf16.msra.mxu0 %v6313_v18 }
0x144b   :  { %5058 = vmatprep.subr.bf16.mxu0 %v5787_v1 }
0x144d   :  { %5055 = vmatmul.mubr.bf16.vlgmr.msra.gmra.mrb[44].mxu0 %v5788_v2 }
0x144e   :  { %5059 = vmatpush3.bf16.msra.mxu0 %v6272_v55  ;;  %5062 = vmatprep.mubr.msk.bf16.mxu0 %vm5789_vm0, %v5787_v1 }
0x144f   :  { %v5514_v16 = vpop.eup %5513  ;;  %5060 = vmatprep.subr.bf16.mxu0 %v5787_v1 }
0x1450   :  { %1457 = vrot.lane.b32.xlu0 %v5514_v16, %s5790_s0  ;;  %v5516_v0 = vpop.eup %5515 }
0x1451   :  { %v1427_v24 = vadd.f32 1.0, %v5516_v0 }
0x1452   :  { %5061 = vmatpush3.bf16.msra.mxu0 %v6286_v59 }
0x1453   :  { %5517 = vrcp.f32 %v1427_v24  ;;  %5066 = vmatprep.subr.bf16.mxu0 %v5787_v1 }
0x1454   :  { %5519 = vpow2.f32 %v4614_v9  ;;  %v1709_v9 = vpop.f32.mrb[40].mxu0 }
0x145d   :  { %v5518_v25 = vpop.eup %5517 }
0x145e   :  { %v5520_v32 = vpop.eup %5519  ;;  %v1431_v28 = vmul.f32 %v5518_v25, %v1288_v46 }
0x145f   :  { %v1451_v12 = vadd.f32 1.0, %v5520_v32 }
0x1461   :  { %5521 = vrcp.f32 %v1451_v12 }
0x146b   :  { %v6226_v29 = vpop.eup %5521 }
0x146c   :  { %v1455_v31 = vmul.f32 %v6226_v29, %v6207_v51 }
0x14a7   :  { %v1434_v21 = vpop.permute.xlu1 %1433 }
0x14a8   :  { %v1436_v26 = vmul.f32 %v5518_v25, %v1434_v21 }
0x14aa   :  { %1438 = vrot.lane.b32.xlu1 %v1436_v26, %s5791_s22 }
0x14c2   :  { %v1458_v30 = vpop.permute.xlu0 %1457 }
0x14c3   :  { %v1460_v60 = vmul.f32 %v6226_v29, %v1458_v30  ;;  %v4623_v30 = vld [vmem:[%s7211_s3 + $0x2] sm:$0x3] }
0x14c5   :  { %1462 = vrot.lane.b32.xlu0 %v1460_v60, %s5791_s22  ;;  %v1504_v60 = vrot.slane %v4623_v30, %v5934_v20 }
0x151c   :  { %v1439_v35 = vpop.permute.xlu1 %1438 }
0x151d   :  { %v1441_v14 = vadd.f32 %v1439_v35, %v1431_v28  ;;  %v1508_v28 = vrot.slane %v4623_v30, %v5939_v22 }
0x151f   :  { %5523 = vtanh.f32 %v1441_v14 }
0x1529   :  { %v5524_v36 = vpop.eup %5523 }
0x152a   :  { %1444 = vrot.lane.b32.xlu1 %v5524_v36, %s5790_s0 }
0x152e   :  { %1328 = vrot.lane.b32.xlu1 %v1327_v56, %s5790_s0 }
0x1532   :  { %859 = vrot.lane.b32.xlu1 %v858_v38, %s5791_s22 }
0x1536   :  { %1173 = vrot.lane.b32.xlu1 %v6173_v5, %s5790_s0  ;;  %v5355_v5 = vld [vmem:[%s7208_s1 + $0x40] ss:$8 sps:$4 sm:$0xff]  }
0x1537   :  { %v1463_v39 = vpop.permute.xlu0 %1462  ;;  %1564 = vmatpush1.bf16.msra.mxu1 %v5355_v5 }
0x1538   :  { %v1465_v40 = vadd.f32 %v1463_v39, %v1455_v31  ;;  %1565 = vmatprep.subr.bf16.mxu1 %v5360_v41 }
0x153a   :  { %5525 = vtanh.f32 %v1465_v40  ;;  %865 = vrot.lane.b32.xlu1 %v6097_v23, %s5790_s0 }
0x153b   :  { %1566 = vmatpush1.bf16.msra.mxu1 %v5358_v33 }
0x153c   :  { %1567 = vmatprep.subr.bf16.mxu1 %v5363_v47 }
0x153e   :  { %401 = vrot.lane.b32.xlu1 %v400_v42, %s5790_s0 }
0x153f   :  { %1568 = vmatpush1.bf16.msra.mxu1 %v5361_v49 }
0x1544   :  { %v5526_v44 = vpop.eup %5525 }
0x1545   :  { %1468 = vrot.lane.b32.xlu0 %v5526_v44, %s5790_s0 }
0x1549   :  { %549 = vrot.lane.b32.xlu0 %v548_v19, %s5791_s22 }
0x159c   :  { %v1445_v23 = vpop.permute.xlu1 %1444 }
0x159d   :  { %v1447_v46 = vmul.f32 %v5518_v25, %v1445_v23  ;;  %v5048_v25 = vpop.f32.mrb[41].mxu0 }
0x159e   :  { %v1712_v21 = vpop.f32.mrb[42].mxu0 }
0x159f   :  { %v1472_v48 = vpack.c.bf16 %v1447_v46, %v1447_v46  ;;  %v5049_v26 = vpop.f32.mrb[43].mxu0 }
0x15a0   :  { %v1329_v50 = vpop.permute.xlu1 %1328  ;;  %v1763_v32 = vpop.f32.mrb[44].mxu0 }
0x15a1   :  { %v1474_v52 = vrot.slane %v1472_v48, 4  ;;  %v5056_v12 = vpop.f32.mrb[45].mxu0 }
0x15a3   :  { %1475 = vrot.lane.b32.xlu1 %v1474_v52, %s5791_s22 }
0x15a4   :  { %v860_v51 = vpop.permute.xlu1 %859 }
0x15a5   :  { %862 = vst.msk [vmem:[#allocation2 + $0x8] sm:$0xf0] %vm552_vm4, %v860_v51 }
0x15a8   :  { %v1174_v53 = vpop.permute.xlu1 %1173 }
0x15a9   :  { %1176 = vst.msk [vmem:[#allocation2 + $0x8] sm:$0xf] %vm559_vm5, %v1174_v53 }
0x15ac   :  { %v866_v57 = vpop.permute.xlu1 %865 }
0x15ad   :  { %868 = vst.msk [vmem:[#allocation2 + $0x10] sm:$0xf] %vm559_vm5, %v866_v57 }
0x15ae   :  { %1016 = vst.msk [vmem:[#allocation2 + $0x10] sm:$0xf] %vm396_vm2, %v6136_v15  ;;  %v5367_v15 = vld [vmem:[%s7208_s1 + $0x74] ss:$8 sps:$4 sm:$0xff]  }
0x15af   :  { %1569 = vmatprep.subr.bf16.mxu1 %v5367_v15 }
0x15b0   :  { %v402_v61 = vpop.permute.xlu1 %401  ;;  %1570 = vmatpush1.bf16.msra.mxu1 %v5365_v63 }
0x15b1   :  { %405 = vst.msk [vmem:[#allocation2 + $0x18] sm:$0xf0] %vm404_vm6, %v402_v61  ;;  %5082 = vmatprep.subr.bf16.mxu1 %v5787_v1 }
0x15b7   :  { %v1469_v54 = vpop.permute.xlu0 %1468 }
0x15b8   :  { %v1471_v4 = vmul.f32 %v6226_v29, %v1469_v54 }
0x15ba   :  { %v1479_v34 = vpack.c.bf16 %v1471_v4, %v1471_v4 }
0x15bb   :  { %v550_v6 = vpop.permute.xlu0 %549 }
0x15bc   :  { %553 = vst.msk [vmem:[#allocation2] sm:$0xf0] %vm552_vm4, %v550_v6  ;;  %1481 = vrot.lane.b32.xlu0 %v1479_v34, %s5790_s0 }
0x15bd   :  { %1331 = vst.msk [vmem:[#allocation2] sm:$0xf0] %vm404_vm6, %v1329_v50 }
0x15c0   :  { %1020 = vrot.lane.b32.xlu0 %v1019_v58, %s5790_s0 }
0x15c4   :  { %712 = vrot.lane.b32.xlu0 %v711_v8, %s5790_s0 }
0x15c8   :  { %1167 = vrot.lane.b32.xlu0 %v1166_v11, %s5791_s22 }
0x15cc   :  { %556 = vrot.lane.b32.xlu0 %v6023_v37, %s5790_s0 }
0x1615   :  { %v1476_v27 = vpop.permute.xlu1 %1475 }
0x1616   :  { %1478 = vst.msk [vmem:[#allocation2 + $0x18] sm:$0xf0] %vm552_vm4, %v1476_v27 }
0x162e   :  { %v1482_v37 = vpop.permute.xlu0 %1481 }
0x162f   :  { %1484 = vst.msk [vmem:[#allocation2] sm:$0xf] %vm559_vm5, %v1482_v37 }
0x1632   :  { %v1021_v3 = vpop.permute.xlu0 %1020 }
0x1633   :  { %1023 = vst.msk [vmem:[#allocation2 + $0x8] sm:$0xf0] %vm404_vm6, %v1021_v3 }
0x1636   :  { %v713_v13 = vpop.permute.xlu0 %712  ;;  %v1485_v62 = vld [vmem:[#allocation2] sm:$0xff] }
0x1637   :  { %715 = vst.msk [vmem:[#allocation2 + $0x10] sm:$0xf0] %vm404_vm6, %v713_v13  ;;  %4632 = vmatmul.mubr.msk.bf16.vlgmr.msra.gmra.mrb[40].mxu1 %vm120_vm1, %v1485_v62 }
0x1638   :  { %1605 = vmatprep.mubr.bf16.mxu1 %v5788_v2  ;;  %5083 = vmatpush3.bf16.msra.mxu1 %v6306_v10 }
0x1639   :  { %5084 = vmatprep.subr.bf16.mxu1 %v5787_v1 }
0x163a   :  { %v1168_v17 = vpop.permute.xlu0 %1167  ;;  %v1486_v7 = vld [vmem:[#allocation2 + $0x8] sm:$0xff] }
0x163b   :  { %1170 = vst.msk [vmem:[#allocation2 + $0x10] sm:$0xf0] %vm552_vm4, %v1168_v17 }
0x163c   :  { %5085 = vmatpush3.bf16.msra.mxu1 %v6313_v18 }
0x163d   :  { %5098 = vmatprep.subr.bf16.mxu1 %v5787_v1 }
0x163e   :  { %v557_v16 = vpop.permute.xlu0 %556 }
0x163f   :  { %560 = vst.msk [vmem:[#allocation2 + $0x18] sm:$0xf] %vm559_vm5, %v557_v16  ;;  %4633 = vmatmul.mubr.msk.bf16.gmra.mrb[44].mxu1 %vm120_vm1, %v1486_v7 }
0x1640   :  { %1324 = vst.msk [vmem:[#allocation2 + $0x18] sm:$0xf] %vm396_vm2, %v6213_v43  ;;  %1615 = vmatprep.mubr.bf16.mxu1 %v5788_v2  ;;  %v1766_v43 = vpop.f32.mrb[46].mxu0 }
0x1641   :  { %v5057_v29 = vpop.f32.mrb[47].mxu0 }
0x1642   :  { %v1487_v0 = vld [vmem:[#allocation2 + $0x10] sm:$0xff] }
0x1647   :  { %4634 = vmatmul.mubr.msk.bf16.gmra.mrb[48].mxu1 %vm120_vm1, %v1487_v0  ;;  %v1488_v24 = vld [vmem:[#allocation2 + $0x18] sm:$0xff] }
0x1648   :  { %1625 = vmatprep.mubr.bf16.mxu1 %v5788_v2 }
0x164f   :  { %4635 = vmatmul.mubr.msk.bf16.gmra.mrb[52].mxu1 %vm120_vm1, %v1488_v24 }
0x1650   :  { %5086 = vmatprep.mubr.msk.bf16.mxu1 %vm5789_vm0, %v5787_v1 }
0x170a   :  { %v1597_v35 = vpop.f32.mrb[40].mxu1 }
0x170b   :  { %v1598_v14 = vadd.f32 %v1597_v35, %v1504_v60  ;;  %v1599_v36 = vpop.f32.mrb[41].mxu1 }
0x170c   :  { %v6353_v56 = vadd.f32 %v1599_v36, %v1508_v28  ;;  %v1601_v38 = vpop.f32.mrb[42].mxu1 }
0x170d   :  { %v6355_v31 = vadd.f32 %v1601_v38, %v1504_v60  ;;  %v1715_v39 = vadd.f32 %v1709_v9, %v1598_v14  ;;  %v1603_v40 = vpop.f32.mrb[43].mxu1 }
0x170e   :  { %v6357_v42 = vadd.f32 %v1603_v40, %v1508_v28 }
0x170f   :  { %5527 = vtanh.f32 %v1715_v39  ;;  %v4648_v37 = vmul.f32 -1.442695, %v1715_v39 }
0x1712   :  { %v1607_v44 = vpop.f32.mrb[44].mxu1 }
0x1713   :  { %v6359_v19 = vadd.f32 %v1607_v44, %v1504_v60  ;;  %v1609_v5 = vpop.f32.mrb[45].mxu1 }
0x1714   :  { %v6361_v45 = vadd.f32 %v1609_v5, %v1508_v28  ;;  %v1611_v41 = vpop.f32.mrb[46].mxu1 }
0x1715   :  { %v6363_v33 = vadd.f32 %v1611_v41, %v1504_v60  ;;  %v1613_v23 = vpop.f32.mrb[47].mxu1 }
0x1716   :  { %v6365_v46 = vadd.f32 %v1613_v23, %v1508_v28 }
0x1719   :  { %v5528_v48 = vpop.eup %5527 }
0x171a   :  { %v1617_v50 = vpop.f32.mrb[48].mxu1  ;;  %1779 = vrot.lane.b32.xlu0 %v5528_v48, %s5790_s0 }
0x171b   :  { %v6368_v52 = vadd.f32 %v1617_v50, %v1504_v60  ;;  %v1619_v51 = vpop.f32.mrb[49].mxu1 }
0x171c   :  { %v6370_v53 = vadd.f32 %v1619_v51, %v1508_v28  ;;  %v1621_v57 = vpop.f32.mrb[50].mxu1 }
0x171d   :  { %v6372_v47 = vadd.f32 %v1621_v57, %v1504_v60  ;;  %v1623_v49 = vpop.f32.mrb[51].mxu1 }
0x171e   :  { %v6374_v61 = vadd.f32 %v1623_v49, %v1508_v28 }
0x1722   :  { %v1627_v15 = vpop.f32.mrb[52].mxu1 }
0x1723   :  { %v6376_v63 = vadd.f32 %v1627_v15, %v1504_v60  ;;  %v1629_v54 = vpop.f32.mrb[53].mxu1 }
0x1724   :  { %v6378_v4 = vadd.f32 %v1629_v54, %v1508_v28  ;;  %v1631_v34 = vpop.f32.mrb[54].mxu1 }
0x1725   :  { %v6380_v6 = vadd.f32 %v1631_v34, %v1504_v60  ;;  %v1633_v58 = vpop.f32.mrb[55].mxu1 }
0x1726   :  { %v1634_v8 = vadd.f32 %v1633_v58, %v1508_v28 }
0x1728   :  { %v1769_v11 = vadd.f32 %v1763_v32, %v1634_v8 }
0x172a   :  { %5529 = vtanh.f32 %v1769_v11  ;;  %v4649_v62 = vmul.f32 -1.442695, %v1769_v11 }
0x172b   :  { %5531 = vpow2.f32 %v4648_v37 }
0x1734   :  { %v5530_v27 = vpop.eup %5529 }
0x1735   :  { %1803 = vrot.lane.b32.xlu1 %v5530_v27, %s5790_s0  ;;  %v5532_v3 = vpop.eup %5531 }
0x1736   :  { %v1773_v13 = vadd.f32 1.0, %v5532_v3 }
0x1738   :  { %5533 = vrcp.f32 %v1773_v13 }
0x1739   :  { %5535 = vpow2.f32 %v4649_v62 }
0x1742   :  { %v5534_v17 = vpop.eup %5533 }
0x1743   :  { %v5536_v0 = vpop.eup %5535  ;;  %v1777_v26 = vmul.f32 0.0, %v5534_v17 }
0x1744   :  { %v1797_v24 = vadd.f32 1.0, %v5536_v0 }
0x1746   :  { %5537 = vrcp.f32 %v1797_v24 }
0x1750   :  { %v5538_v9 = vpop.eup %5537 }
0x1751   :  { %v1801_v29 = vmul.f32 0.0, %v5538_v9 }
0x178c   :  { %v1780_v16 = vpop.permute.xlu0 %1779 }
0x178d   :  { %v1782_v7 = vmul.f32 %v5534_v17, %v1780_v16 }
0x178f   :  { %1784 = vrot.lane.b32.xlu0 %v1782_v7, %s5791_s22 }
0x17a7   :  { %v1804_v25 = vpop.permute.xlu1 %1803 }
0x17a8   :  { %v1806_v21 = vmul.f32 %v5538_v9, %v1804_v25 }
0x17aa   :  { %1808 = vrot.lane.b32.xlu1 %v1806_v21, %s5791_s22 }
0x1801   :  { %v1785_v32 = vpop.permute.xlu0 %1784 }
0x1802   :  { %v6385_v12 = vadd.f32 %v1785_v32, %v1777_v26 }
0x1804   :  { %5539 = vtanh.f32 %v6385_v12 }
0x180e   :  { %v5540_v43 = vpop.eup %5539 }
0x180f   :  { %1790 = vrot.lane.b32.xlu0 %v5540_v43, %s5790_s0 }
0x181c   :  { %v1809_v30 = vpop.permute.xlu1 %1808 }
0x181d   :  { %v6389_v60 = vadd.f32 %v1809_v30, %v1801_v29 }
0x181f   :  { %5541 = vtanh.f32 %v6389_v60 }
0x1829   :  { %v5542_v28 = vpop.eup %5541 }
0x182a   :  { %1814 = vrot.lane.b32.xlu1 %v5542_v28, %s5790_s0 }
0x1881   :  { %v1791_v35 = vpop.permute.xlu0 %1790 }
0x1882   :  { %v1793_v14 = vmul.f32 %v5534_v17, %v1791_v35 }
0x1884   :  { %v1818_v36 = vpack.c.bf16 %v1793_v14, %v1793_v14 }
0x1886   :  { %1820 = vrot.lane.b32.xlu0 %v1818_v36, %s5791_s22 }
0x189c   :  { %v1815_v38 = vpop.permute.xlu1 %1814 }
0x189d   :  { %v1817_v39 = vmul.f32 %v5538_v9, %v1815_v38 }
0x189f   :  { %v6394_v40 = vpack.c.bf16 %v1817_v39, %v1817_v39 }
0x18a1   :  { %1877 = vrot.lane.b32.xlu1 %v6394_v40, %s5791_s22 }
0x18f8   :  { %v1821_v44 = vpop.permute.xlu0 %1820 }
0x18f9   :  { %1823 = vst.msk [vmem:[#allocation3] sm:$0xf] %vm396_vm2, %v1821_v44  ;;  %5063 = vmatmul.mubr.msk.bf16.vlgmr.msra.gmra.mrb[48].mxu0 %vm244_vm3, %v1821_v44 }
0x18fa   :  { %5067 = vmatpush3.bf16.msra.mxu0 %v6306_v10  ;;  %5070 = vmatprep.mubr.msk.bf16.mxu0 %vm5789_vm0, %v5787_v1 }
0x18fb   :  { %5068 = vmatprep.subr.bf16.mxu0 %v5787_v1 }
0x18fe   :  { %5069 = vmatpush3.bf16.msra.mxu0 %v6313_v18 }
0x18ff   :  { %5074 = vmatprep.subr.bf16.mxu0 %v5787_v1 }
0x1913   :  { %v1878_v5 = vpop.permute.xlu1 %1877 }
0x1914   :  { %5071 = vmatmul.mubr.msk.bf16.vlgmr.msra.gmra.mrb[52].mxu0 %vm244_vm3, %v1878_v5 }
0x1915   :  { %5075 = vmatpush3.bf16.msra.mxu0 %v6272_v55  ;;  %5078 = vmatprep.mubr.msk.bf16.mxu0 %vm5789_vm0, %v5787_v1 }
0x1916   :  { %5076 = vmatprep.subr.bf16.mxu0 %v5787_v1 }
0x1919   :  { %5077 = vmatpush3.bf16.msra.mxu0 %v6286_v59 }
0x191a   :  { %5090 = vmatprep.subr.bf16.mxu0 %v5787_v1 }
0x19cc   :  { %v1869_v41 = vpop.f32.mrb[48].mxu0 }
0x19cd   :  { %v1875_v23 = vadd.f32 %v1869_v41, %v6355_v31  ;;  %v5064_v48 = vpop.f32.mrb[49].mxu0 }
0x19ce   :  { %v1872_v50 = vpop.f32.mrb[50].mxu0 }
0x19cf   :  { %5543 = vtanh.f32 %v1875_v23  ;;  %v5065_v51 = vpop.f32.mrb[51].mxu0  ;;  %v4652_v11 = vmul.f32 -1.442695, %v1875_v23 }
0x19d9   :  { %v5544_v57 = vpop.eup %5543 }
0x19da   :  { %1932 = vrot.lane.b32.xlu1 %v5544_v57, %s5790_s0 }
0x19e7   :  { %v1916_v49 = vpop.f32.mrb[52].mxu0 }
0x19e8   :  { %v1922_v15 = vadd.f32 %v1916_v49, %v6378_v4  ;;  %v5072_v54 = vpop.f32.mrb[53].mxu0 }
0x19e9   :  { %v1919_v34 = vpop.f32.mrb[54].mxu0 }
0x19ea   :  { %5545 = vtanh.f32 %v1922_v15  ;;  %v5073_v58 = vpop.f32.mrb[55].mxu0  ;;  %v4653_v37 = vmul.f32 -1.442695, %v1922_v15 }
0x19eb   :  { %5547 = vpow2.f32 %v4652_v11 }
0x19f4   :  { %v5546_v8 = vpop.eup %5545 }
0x19f5   :  { %1956 = vrot.lane.b32.xlu0 %v5546_v8, %s5790_s0  ;;  %v5548_v31 = vpop.eup %5547 }
0x19f6   :  { %v1926_v27 = vadd.f32 1.0, %v5548_v31 }
0x19f8   :  { %5549 = vrcp.f32 %v1926_v27 }
0x19f9   :  { %5551 = vpow2.f32 %v4653_v37 }
0x1a02   :  { %v5550_v3 = vpop.eup %5549 }
0x1a03   :  { %v5552_v4 = vpop.eup %5551  ;;  %v1930_v24 = vmul.f32 %v5550_v3, %v6385_v12 }
0x1a04   :  { %v1950_v17 = vadd.f32 1.0, %v5552_v4 }
0x1a06   :  { %5553 = vrcp.f32 %v1950_v17 }
0x1a10   :  { %v5554_v16 = vpop.eup %5553 }
0x1a11   :  { %v1954_v26 = vmul.f32 %v5554_v16, %v6389_v60 }
0x1a4c   :  { %v1933_v13 = vpop.permute.xlu1 %1932 }
0x1a4d   :  { %v1935_v62 = vmul.f32 %v5550_v3, %v1933_v13 }
0x1a4f   :  { %1937 = vrot.lane.b32.xlu1 %v1935_v62, %s5791_s22 }
0x1a67   :  { %v1957_v7 = vpop.permute.xlu0 %1956 }
0x1a68   :  { %v1959_v0 = vmul.f32 %v5554_v16, %v1957_v7 }
0x1a6a   :  { %1961 = vrot.lane.b32.xlu0 %v1959_v0, %s5791_s22 }
0x1ac1   :  { %v1938_v9 = vpop.permute.xlu1 %1937 }
0x1ac2   :  { %v6420_v25 = vadd.f32 %v1938_v9, %v1930_v24 }
0x1ac4   :  { %5555 = vtanh.f32 %v6420_v25 }
0x1ace   :  { %v5556_v21 = vpop.eup %5555 }
0x1acf   :  { %1943 = vrot.lane.b32.xlu1 %v5556_v21, %s5790_s0 }
0x1adc   :  { %v1962_v32 = vpop.permute.xlu0 %1961 }
0x1add   :  { %v6425_v43 = vadd.f32 %v1962_v32, %v1954_v26 }
0x1adf   :  { %5557 = vtanh.f32 %v6425_v43 }
0x1ae9   :  { %v5558_v29 = vpop.eup %5557 }
0x1aea   :  { %1967 = vrot.lane.b32.xlu0 %v5558_v29, %s5790_s0 }
0x1b41   :  { %v1944_v30 = vpop.permute.xlu1 %1943 }
0x1b42   :  { %v1946_v12 = vmul.f32 %v5550_v3, %v1944_v30 }
0x1b44   :  { %v6429_v28 = vpack.c.bf16 %v1946_v12, %v1946_v12 }
0x1b46   :  { %1985 = vrot.lane.b32.xlu1 %v6429_v28, %s5791_s22 }
0x1b5c   :  { %v1968_v35 = vpop.permute.xlu0 %1967 }
0x1b5d   :  { %v1970_v14 = vmul.f32 %v5554_v16, %v1968_v35 }
0x1b5f   :  { %v6433_v36 = vpack.c.bf16 %v1970_v14, %v1970_v14 }
0x1b61   :  { %2032 = vrot.lane.b32.xlu0 %v6433_v36, %s5791_s22 }
0x1bb8   :  { %v1986_v60 = vpop.permute.xlu1 %1985 }
0x1bb9   :  { %5079 = vmatmul.mubr.msk.bf16.vlgmr.msra.gmra.mrb[56].mxu0 %vm244_vm3, %v1986_v60 }
0x1bba   :  { %5091 = vmatpush3.bf16.msra.mxu0 %v6272_v55  ;;  %5094 = vmatprep.mubr.msk.bf16.mxu0 %vm5789_vm0, %v5787_v1 }
0x1bbb   :  { %5092 = vmatprep.subr.bf16.mxu0 %v5787_v1 }
0x1bbe   :  { %5093 = vmatpush3.bf16.msra.mxu0 %v6286_v59 }
0x1bbf   :  { %5106 = vmatprep.subr.bf16.mxu0 %v5787_v1 }
0x1bd3   :  { %v2033_v38 = vpop.permute.xlu0 %2032 }
0x1bd4   :  { %5087 = vmatmul.mubr.msk.bf16.vlgmr.msra.gmra.mrb[56].mxu1 %vm244_vm3, %v2033_v38 }
0x1bd5   :  { %5099 = vmatpush3.bf16.msra.mxu1 %v6306_v10  ;;  %5102 = vmatprep.mubr.msk.bf16.mxu1 %vm5789_vm0, %v5787_v1 }
0x1bd6   :  { %5100 = vmatprep.subr.bf16.mxu1 %v5787_v1 }
0x1bd9   :  { %5101 = vmatpush3.bf16.msra.mxu1 %v6313_v18 }
0x1bda   :  { %5114 = vmatprep.subr.bf16.mxu1 %v5787_v1 }
0x1c8c   :  { %v2024_v39 = vpop.f32.mrb[56].mxu0 }
0x1c8d   :  { %v2030_v44 = vadd.f32 %v2024_v39, %v6359_v19  ;;  %v5080_v5 = vpop.f32.mrb[57].mxu0 }
0x1c8e   :  { %v2027_v41 = vpop.f32.mrb[58].mxu0 }
0x1c8f   :  { %5559 = vtanh.f32 %v2030_v44  ;;  %v5081_v23 = vpop.f32.mrb[59].mxu0  ;;  %v4656_v34 = vmul.f32 -1.442695, %v2030_v44 }
0x1c99   :  { %v5560_v48 = vpop.eup %5559 }
0x1c9a   :  { %2087 = vrot.lane.b32.xlu1 %v5560_v48, %s5790_s0 }
0x1ca7   :  { %v2071_v50 = vpop.f32.mrb[56].mxu1 }
0x1ca8   :  { %v2077_v51 = vadd.f32 %v2071_v50, %v6374_v61  ;;  %v5088_v57 = vpop.f32.mrb[57].mxu1 }
0x1ca9   :  { %v2074_v49 = vpop.f32.mrb[58].mxu1 }
0x1caa   :  { %5561 = vtanh.f32 %v2077_v51  ;;  %v5089_v15 = vpop.f32.mrb[59].mxu1  ;;  %v4657_v8 = vmul.f32 -1.442695, %v2077_v51 }
0x1cab   :  { %5563 = vpow2.f32 %v4656_v34 }
0x1cb4   :  { %v5562_v54 = vpop.eup %5561 }
0x1cb5   :  { %2111 = vrot.lane.b32.xlu0 %v5562_v54, %s5790_s0  ;;  %v5564_v19 = vpop.eup %5563 }
0x1cb6   :  { %v2081_v58 = vadd.f32 1.0, %v5564_v19 }
0x1cb8   :  { %5565 = vrcp.f32 %v2081_v58 }
0x1cb9   :  { %5567 = vpow2.f32 %v4657_v8 }
0x1cc2   :  { %v5566_v11 = vpop.eup %5565 }
0x1cc3   :  { %v5568_v61 = vpop.eup %5567  ;;  %v2085_v4 = vmul.f32 %v5566_v11, %v6420_v25 }
0x1cc4   :  { %v2105_v37 = vadd.f32 1.0, %v5568_v61 }
0x1cc6   :  { %5569 = vrcp.f32 %v2105_v37 }
0x1cd0   :  { %v5570_v3 = vpop.eup %5569 }
0x1cd1   :  { %v2109_v0 = vmul.f32 %v5570_v3, %v6425_v43 }
0x1d0c   :  { %v2088_v31 = vpop.permute.xlu1 %2087 }
0x1d0d   :  { %v2090_v27 = vmul.f32 %v5566_v11, %v2088_v31 }
0x1d0f   :  { %2092 = vrot.lane.b32.xlu1 %v2090_v27, %s5791_s22 }
0x1d27   :  { %v2112_v13 = vpop.permute.xlu0 %2111 }
0x1d28   :  { %v2114_v62 = vmul.f32 %v5570_v3, %v2112_v13 }
0x1d2a   :  { %2116 = vrot.lane.b32.xlu0 %v2114_v62, %s5791_s22 }
0x1d81   :  { %v2093_v17 = vpop.permute.xlu1 %2092 }
0x1d82   :  { %v6458_v16 = vadd.f32 %v2093_v17, %v2085_v4 }
0x1d84   :  { %5571 = vtanh.f32 %v6458_v16 }
0x1d8e   :  { %v5572_v7 = vpop.eup %5571 }
0x1d8f   :  { %2098 = vrot.lane.b32.xlu1 %v5572_v7, %s5790_s0 }
0x1d9c   :  { %v2117_v24 = vpop.permute.xlu0 %2116 }
0x1d9d   :  { %v6463_v9 = vadd.f32 %v2117_v24, %v2109_v0 }
0x1d9f   :  { %5573 = vtanh.f32 %v6463_v9 }
0x1da9   :  { %v5574_v21 = vpop.eup %5573 }
0x1daa   :  { %2122 = vrot.lane.b32.xlu0 %v5574_v21, %s5790_s0 }
0x1e01   :  { %v2099_v26 = vpop.permute.xlu1 %2098 }
0x1e02   :  { %v2101_v25 = vmul.f32 %v5566_v11, %v2099_v26 }
0x1e04   :  { %v2126_v32 = vpack.c.bf16 %v2101_v25, %v2101_v25 }
0x1e06   :  { %2128 = vrot.lane.b32.xlu1 %v2126_v32, %s5791_s22 }
0x1e1c   :  { %v2123_v29 = vpop.permute.xlu0 %2122 }
0x1e1d   :  { %v2125_v30 = vmul.f32 %v5570_v3, %v2123_v29 }
0x1e1f   :  { %v6468_v12 = vpack.c.bf16 %v2125_v30, %v2125_v30 }
0x1e21   :  { %2185 = vrot.lane.b32.xlu0 %v6468_v12, %s5791_s22 }
0x1e78   :  { %v2129_v43 = vpop.permute.xlu1 %2128 }
0x1e79   :  { %2131 = vst.msk [vmem:[#allocation3 + $0x8] sm:$0xf] %vm396_vm2, %v2129_v43  ;;  %5095 = vmatmul.mubr.msk.bf16.vlgmr.msra.gmra.mrb[60].mxu0 %vm244_vm3, %v2129_v43 }
0x1e7a   :  { %5107 = vmatpush3.bf16.msra.mxu0 %v6272_v55  ;;  %5110 = vmatprep.mubr.msk.bf16.mxu0 %vm5789_vm0, %v5787_v1 }
0x1e7b   :  { %5108 = vmatprep.subr.bf16.mxu0 %v5787_v1 }
0x1e7e   :  { %5109 = vmatpush3.bf16.msra.mxu0 %v6286_v59 }
0x1e7f   :  { %5122 = vmatprep.subr.bf16.mxu0 %v5787_v1 }
0x1e93   :  { %v2186_v35 = vpop.permute.xlu0 %2185 }
0x1e94   :  { %5103 = vmatmul.mubr.msk.bf16.vlgmr.msra.gmra.mrb[60].mxu1 %vm244_vm3, %v2186_v35 }
0x1e95   :  { %5115 = vmatpush3.bf16.msra.mxu1 %v6306_v10  ;;  %5118 = vmatprep.mubr.msk.bf16.mxu1 %vm5789_vm0, %v5787_v1 }
0x1e96   :  { %5116 = vmatprep.subr.bf16.mxu1 %v5787_v1 }
0x1e99   :  { %5117 = vmatpush3.bf16.msra.mxu1 %v6313_v18 }
0x1e9a   :  { %5130 = vmatprep.subr.bf16.mxu1 %v5787_v1 }
0x1f4c   :  { %v2177_v14 = vpop.f32.mrb[60].mxu0 }
0x1f4d   :  { %v2183_v60 = vadd.f32 %v2177_v14, %v6363_v33  ;;  %v5096_v38 = vpop.f32.mrb[61].mxu0 }
0x1f4e   :  { %v2180_v39 = vpop.f32.mrb[62].mxu0 }
0x1f4f   :  { %5575 = vtanh.f32 %v2183_v60  ;;  %v5097_v44 = vpop.f32.mrb[63].mxu0  ;;  %v4660_v49 = vmul.f32 -1.442695, %v2183_v60 }
0x1f59   :  { %v5576_v5 = vpop.eup %5575 }
0x1f5a   :  { %2240 = vrot.lane.b32.xlu1 %v5576_v5, %s5790_s0 }
0x1f67   :  { %v2224_v41 = vpop.f32.mrb[60].mxu1 }
0x1f68   :  { %v2230_v23 = vadd.f32 %v2224_v41, %v6370_v53  ;;  %v5104_v48 = vpop.f32.mrb[61].mxu1 }
0x1f69   :  { %v2227_v50 = vpop.f32.mrb[62].mxu1 }
0x1f6a   :  { %5577 = vtanh.f32 %v2230_v23  ;;  %v5105_v51 = vpop.f32.mrb[63].mxu1  ;;  %v4661_v54 = vmul.f32 -1.442695, %v2230_v23 }
0x1f6b   :  { %5579 = vpow2.f32 %v4660_v49 }
0x1f74   :  { %v5578_v57 = vpop.eup %5577 }
0x1f75   :  { %2264 = vrot.lane.b32.xlu0 %v5578_v57, %s5790_s0  ;;  %v5580_v33 = vpop.eup %5579 }
0x1f76   :  { %v2234_v15 = vadd.f32 1.0, %v5580_v33 }
0x1f78   :  { %5581 = vrcp.f32 %v2234_v15 }
0x1f79   :  { %5583 = vpow2.f32 %v4661_v54 }
0x1f82   :  { %v5582_v34 = vpop.eup %5581 }
0x1f83   :  { %v5584_v53 = vpop.eup %5583  ;;  %v2238_v61 = vmul.f32 %v5582_v34, %v6458_v16 }
0x1f84   :  { %v2258_v8 = vadd.f32 1.0, %v5584_v53 }
0x1f86   :  { %5585 = vrcp.f32 %v2258_v8 }
0x1f90   :  { %v5586_v11 = vpop.eup %5585 }
0x1f91   :  { %v2262_v62 = vmul.f32 %v5586_v11, %v6463_v9 }
0x1fcc   :  { %v2241_v19 = vpop.permute.xlu1 %2240 }
0x1fcd   :  { %v2243_v58 = vmul.f32 %v5582_v34, %v2241_v19 }
0x1fcf   :  { %2245 = vrot.lane.b32.xlu1 %v2243_v58, %s5791_s22 }
0x1fe7   :  { %v2265_v31 = vpop.permute.xlu0 %2264 }
0x1fe8   :  { %v2267_v27 = vmul.f32 %v5586_v11, %v2265_v31 }
0x1fea   :  { %2269 = vrot.lane.b32.xlu0 %v2267_v27, %s5791_s22 }
0x2041   :  { %v2246_v37 = vpop.permute.xlu1 %2245 }
0x2042   :  { %v6494_v3 = vadd.f32 %v2246_v37, %v2238_v61 }
0x2044   :  { %5587 = vtanh.f32 %v6494_v3 }
0x204e   :  { %v5588_v13 = vpop.eup %5587 }
0x204f   :  { %2251 = vrot.lane.b32.xlu1 %v5588_v13, %s5790_s0 }
0x205c   :  { %v2270_v4 = vpop.permute.xlu0 %2269 }
0x205d   :  { %v6499_v17 = vadd.f32 %v2270_v4, %v2262_v62 }
0x205f   :  { %5589 = vtanh.f32 %v6499_v17 }
0x2069   :  { %v5590_v7 = vpop.eup %5589 }
0x206a   :  { %2275 = vrot.lane.b32.xlu0 %v5590_v7, %s5790_s0 }
0x20c1   :  { %v2252_v0 = vpop.permute.xlu1 %2251 }
0x20c2   :  { %v2254_v16 = vmul.f32 %v5582_v34, %v2252_v0 }
0x20c4   :  { %v6503_v24 = vpack.c.bf16 %v2254_v16, %v2254_v16 }
0x20c6   :  { %2293 = vrot.lane.b32.xlu1 %v6503_v24, %s5791_s22 }
0x20dc   :  { %v2276_v21 = vpop.permute.xlu0 %2275 }
0x20dd   :  { %v2278_v26 = vmul.f32 %v5586_v11, %v2276_v21 }
0x20df   :  { %v6507_v25 = vpack.c.bf16 %v2278_v26, %v2278_v26 }
0x20e1   :  { %2340 = vrot.lane.b32.xlu0 %v6507_v25, %s5791_s22 }
0x2138   :  { %v2294_v9 = vpop.permute.xlu1 %2293 }
0x2139   :  { %5111 = vmatmul.mubr.msk.bf16.vlgmr.msra.gmra.mrb[64].mxu0 %vm244_vm3, %v2294_v9 }
0x213a   :  { %5123 = vmatpush3.bf16.msra.mxu0 %v6272_v55  ;;  %5126 = vmatprep.mubr.msk.bf16.mxu0 %vm5789_vm0, %v5787_v1 }
0x213b   :  { %5124 = vmatprep.subr.bf16.mxu0 %v5787_v1 }
0x213e   :  { %5125 = vmatpush3.bf16.msra.mxu0 %v6286_v59 }
0x213f   :  { %5138 = vmatprep.subr.bf16.mxu0 %v5787_v1 }
0x2153   :  { %v2341_v32 = vpop.permute.xlu0 %2340 }
0x2154   :  { %5119 = vmatmul.mubr.msk.bf16.vlgmr.msra.gmra.mrb[64].mxu1 %vm244_vm3, %v2341_v32 }
0x2155   :  { %5131 = vmatpush3.bf16.msra.mxu1 %v6306_v10  ;;  %5134 = vmatprep.mubr.msk.bf16.mxu1 %vm5789_vm0, %v5787_v1 }
0x2156   :  { %5132 = vmatprep.subr.bf16.mxu1 %v5787_v1 }
0x2159   :  { %5133 = vmatpush3.bf16.msra.mxu1 %v6313_v18 }
0x215a   :  { %5146 = vmatprep.subr.bf16.mxu1 %v5787_v1 }
0x220c   :  { %v2332_v29 = vpop.f32.mrb[64].mxu0 }
0x220d   :  { %v2338_v30 = vadd.f32 %v2332_v29, %v6368_v52  ;;  %v5112_v43 = vpop.f32.mrb[65].mxu0 }
0x220e   :  { %v2335_v35 = vpop.f32.mrb[66].mxu0 }
0x220f   :  { %5591 = vtanh.f32 %v2338_v30  ;;  %v5113_v14 = vpop.f32.mrb[67].mxu0  ;;  %v4664_v48 = vmul.f32 -1.442695, %v2338_v30 }
0x2219   :  { %v5592_v60 = vpop.eup %5591 }
0x221a   :  { %2395 = vrot.lane.b32.xlu1 %v5592_v60, %s5790_s0 }
0x2227   :  { %v2379_v38 = vpop.f32.mrb[64].mxu1 }
0x2228   :  { %v2385_v39 = vadd.f32 %v2379_v38, %v6365_v46  ;;  %v5120_v44 = vpop.f32.mrb[65].mxu1 }
0x2229   :  { %v2382_v5 = vpop.f32.mrb[66].mxu1 }
0x222a   :  { %5593 = vtanh.f32 %v2385_v39  ;;  %v5121_v41 = vpop.f32.mrb[67].mxu1  ;;  %v4665_v51 = vmul.f32 -1.442695, %v2385_v39 }
0x222b   :  { %5595 = vpow2.f32 %v4664_v48 }
0x2234   :  { %v5594_v23 = vpop.eup %5593 }
0x2235   :  { %2419 = vrot.lane.b32.xlu0 %v5594_v23, %s5790_s0  ;;  %v5596_v52 = vpop.eup %5595 }
0x2236   :  { %v2389_v50 = vadd.f32 1.0, %v5596_v52 }
0x2238   :  { %5597 = vrcp.f32 %v2389_v50 }
0x2239   :  { %5599 = vpow2.f32 %v4665_v51 }
0x2242   :  { %v5598_v57 = vpop.eup %5597 }
0x2243   :  { %v5600_v46 = vpop.eup %5599  ;;  %v2393_v58 = vmul.f32 %v5598_v57, %v6494_v3 }
0x2244   :  { %v2413_v15 = vadd.f32 1.0, %v5600_v46 }
0x2246   :  { %5601 = vrcp.f32 %v2413_v15 }
0x2250   :  { %v5602_v54 = vpop.eup %5601 }
0x2251   :  { %v2417_v31 = vmul.f32 %v5602_v54, %v6499_v17 }
0x228c   :  { %v2396_v49 = vpop.permute.xlu1 %2395 }
0x228d   :  { %v2398_v33 = vmul.f32 %v5598_v57, %v2396_v49 }
0x228f   :  { %2400 = vrot.lane.b32.xlu1 %v2398_v33, %s5791_s22 }
0x22a7   :  { %v2420_v34 = vpop.permute.xlu0 %2419 }
0x22a8   :  { %v2422_v19 = vmul.f32 %v5602_v54, %v2420_v34 }
0x22aa   :  { %2424 = vrot.lane.b32.xlu0 %v2422_v19, %s5791_s22 }
0x2301   :  { %v2401_v53 = vpop.permute.xlu1 %2400 }
0x2302   :  { %v6532_v8 = vadd.f32 %v2401_v53, %v2393_v58 }
0x2304   :  { %5603 = vtanh.f32 %v6532_v8 }
0x230e   :  { %v5604_v11 = vpop.eup %5603 }
0x230f   :  { %2406 = vrot.lane.b32.xlu1 %v5604_v11, %s5790_s0 }
0x231c   :  { %v2425_v27 = vpop.permute.xlu0 %2424 }
0x231d   :  { %v6537_v61 = vadd.f32 %v2425_v27, %v2417_v31 }
0x231f   :  { %5605 = vtanh.f32 %v6537_v61 }
0x2329   :  { %v5606_v37 = vpop.eup %5605 }
0x232a   :  { %2430 = vrot.lane.b32.xlu0 %v5606_v37, %s5790_s0 }
0x2381   :  { %v2407_v13 = vpop.permute.xlu1 %2406 }
0x2382   :  { %v2409_v3 = vmul.f32 %v5598_v57, %v2407_v13 }
0x2384   :  { %v2434_v62 = vpack.c.bf16 %v2409_v3, %v2409_v3 }
0x2386   :  { %2436 = vrot.lane.b32.xlu1 %v2434_v62, %s5791_s22 }
0x239c   :  { %v2431_v4 = vpop.permute.xlu0 %2430 }
0x239d   :  { %v2433_v7 = vmul.f32 %v5602_v54, %v2431_v4 }
0x239f   :  { %v6542_v0 = vpack.c.bf16 %v2433_v7, %v2433_v7 }
0x23a1   :  { %2493 = vrot.lane.b32.xlu0 %v6542_v0, %s5791_s22 }
0x23f8   :  { %v6546_v17 = vpop.permute.xlu1 %2436 }
0x23f9   :  { %5127 = vmatmul.mubr.msk.bf16.vlgmr.msra.gmra.mrb[68].mxu0 %vm244_vm3, %v6546_v17 }
0x23fa   :  { %5139 = vmatpush3.bf16.msra.mxu0 %v6272_v55  ;;  %5142 = vmatprep.mubr.msk.bf16.mxu0 %vm5789_vm0, %v5787_v1 }
0x23fb   :  { %5140 = vmatprep.subr.bf16.mxu0 %v5787_v1 }
0x23fe   :  { %5141 = vmatpush3.bf16.msra.mxu0 %v6286_v59 }
0x23ff   :  { %5154 = vmatprep.subr.bf16.mxu0 %v5787_v1 }
0x2413   :  { %v2494_v16 = vpop.permute.xlu0 %2493 }
0x2414   :  { %5135 = vmatmul.mubr.msk.bf16.vlgmr.msra.gmra.mrb[68].mxu1 %vm244_vm3, %v2494_v16 }
0x2415   :  { %5147 = vmatpush3.bf16.msra.mxu1 %v6306_v10  ;;  %5150 = vmatprep.mubr.msk.bf16.mxu1 %vm5789_vm0, %v5787_v1 }
0x2416   :  { %5148 = vmatprep.subr.bf16.mxu1 %v5787_v1 }
0x2419   :  { %5149 = vmatpush3.bf16.msra.mxu1 %v6313_v18 }
0x241a   :  { %5162 = vmatprep.subr.bf16.mxu1 %v5787_v1 }
0x24cc   :  { %v2485_v21 = vpop.f32.mrb[68].mxu0 }
0x24cd   :  { %v2491_v26 = vadd.f32 %v2485_v21, %v6372_v47  ;;  %v5128_v9 = vpop.f32.mrb[69].mxu0 }
0x24ce   :  { %v2488_v32 = vpop.f32.mrb[70].mxu0 }
0x24cf   :  { %5607 = vtanh.f32 %v2491_v26  ;;  %v5129_v29 = vpop.f32.mrb[71].mxu0  ;;  %v4668_v44 = vmul.f32 -1.442695, %v2491_v26 }
0x24d9   :  { %v5608_v30 = vpop.eup %5607 }
0x24da   :  { %2548 = vrot.lane.b32.xlu1 %v5608_v30, %s5790_s0 }
0x24e7   :  { %v2532_v43 = vpop.f32.mrb[68].mxu1 }
0x24e8   :  { %v2538_v35 = vadd.f32 %v2532_v43, %v6361_v45  ;;  %v5136_v14 = vpop.f32.mrb[69].mxu1 }
0x24e9   :  { %v2535_v60 = vpop.f32.mrb[70].mxu1 }
0x24ea   :  { %5609 = vtanh.f32 %v2538_v35  ;;  %v5137_v38 = vpop.f32.mrb[71].mxu1  ;;  %v4669_v41 = vmul.f32 -1.442695, %v2538_v35 }
0x24eb   :  { %5611 = vpow2.f32 %v4668_v44 }
0x24f4   :  { %v5610_v39 = vpop.eup %5609 }
0x24f5   :  { %2572 = vrot.lane.b32.xlu0 %v5610_v39, %s5790_s0  ;;  %v5612_v47 = vpop.eup %5611 }
0x24f6   :  { %v2542_v5 = vadd.f32 1.0, %v5612_v47 }
0x24f8   :  { %5613 = vrcp.f32 %v2542_v5 }
0x24f9   :  { %5615 = vpow2.f32 %v4669_v41 }
0x2502   :  { %v5614_v23 = vpop.eup %5613 }
0x2503   :  { %v5616_v45 = vpop.eup %5615  ;;  %v2546_v33 = vmul.f32 %v5614_v23, %v6532_v8 }
0x2504   :  { %v2566_v50 = vadd.f32 1.0, %v5616_v45 }
0x2506   :  { %5617 = vrcp.f32 %v2566_v50 }
0x2510   :  { %v5618_v51 = vpop.eup %5617 }
0x2511   :  { %v2570_v34 = vmul.f32 %v5618_v51, %v6537_v61 }
0x254c   :  { %v2549_v48 = vpop.permute.xlu1 %2548 }
0x254d   :  { %v2551_v52 = vmul.f32 %v5614_v23, %v2549_v48 }
0x254f   :  { %2553 = vrot.lane.b32.xlu1 %v2551_v52, %s5791_s22 }
0x2567   :  { %v2573_v57 = vpop.permute.xlu0 %2572 }
0x2568   :  { %v2575_v49 = vmul.f32 %v5618_v51, %v2573_v57 }
0x256a   :  { %2577 = vrot.lane.b32.xlu0 %v2575_v49, %s5791_s22 }
0x25c1   :  { %v2554_v46 = vpop.permute.xlu1 %2553 }
0x25c2   :  { %v6570_v15 = vadd.f32 %v2554_v46, %v2546_v33 }
0x25c4   :  { %5619 = vtanh.f32 %v6570_v15 }
0x25ce   :  { %v5620_v54 = vpop.eup %5619 }
0x25cf   :  { %2559 = vrot.lane.b32.xlu1 %v5620_v54, %s5790_s0 }
0x25dc   :  { %v2578_v19 = vpop.permute.xlu0 %2577 }
0x25dd   :  { %v6575_v58 = vadd.f32 %v2578_v19, %v2570_v34 }
0x25df   :  { %5621 = vtanh.f32 %v6575_v58 }
0x25e9   :  { %v5622_v53 = vpop.eup %5621 }
0x25ea   :  { %2583 = vrot.lane.b32.xlu0 %v5622_v53, %s5790_s0 }
0x2641   :  { %v2560_v11 = vpop.permute.xlu1 %2559 }
0x2642   :  { %v2562_v8 = vmul.f32 %v5614_v23, %v2560_v11 }
0x2644   :  { %v6579_v31 = vpack.c.bf16 %v2562_v8, %v2562_v8 }
0x2646   :  { %2601 = vrot.lane.b32.xlu1 %v6579_v31, %s5791_s22 }
0x265c   :  { %v2584_v27 = vpop.permute.xlu0 %2583 }
0x265d   :  { %v2586_v37 = vmul.f32 %v5618_v51, %v2584_v27 }
0x265f   :  { %v6583_v13 = vpack.c.bf16 %v2586_v37, %v2586_v37 }
0x2661   :  { %2648 = vrot.lane.b32.xlu0 %v6583_v13, %s5791_s22 }
0x26b8   :  { %v2602_v61 = vpop.permute.xlu1 %2601 }
0x26b9   :  { %5143 = vmatmul.mubr.msk.bf16.vlgmr.msra.gmra.mrb[72].mxu0 %vm244_vm3, %v2602_v61 }
0x26ba   :  { %5155 = vmatpush3.bf16.msra.mxu0 %v6272_v55  ;;  %5158 = vmatprep.mubr.msk.bf16.mxu0 %vm5789_vm0, %v5787_v1 }
0x26bb   :  { %5156 = vmatprep.subr.bf16.mxu0 %v5787_v1 }
0x26be   :  { %5157 = vmatpush3.bf16.msra.mxu0 %v6286_v59 }
0x26d3   :  { %v2649_v3 = vpop.permute.xlu0 %2648 }
0x26d4   :  { %5151 = vmatmul.mubr.msk.bf16.vlgmr.msra.gmra.mrb[72].mxu1 %vm244_vm3, %v2649_v3 }
0x26d5   :  { %5163 = vmatpush3.bf16.msra.mxu1 %v6306_v10  ;;  %5166 = vmatprep.mubr.msk.bf16.mxu1 %vm5789_vm0, %v5787_v1 }
0x26d6   :  { %5164 = vmatprep.subr.bf16.mxu1 %v5787_v1 }
0x26d9   :  { %5165 = vmatpush3.bf16.msra.mxu1 %v6313_v18 }
0x26da   :  { %5170 = vmatprep.subr.bf16.mxu1 %v5787_v1 }
0x278c   :  { %v2640_v55 = vpop.f32.mrb[72].mxu0 }
0x278d   :  { %v2646_v62 = vadd.f32 %v2640_v55, %v6376_v63  ;;  %v5144_v4 = vpop.f32.mrb[73].mxu0 }
0x278e   :  { %v2643_v7 = vpop.f32.mrb[74].mxu0 }
0x278f   :  { %5623 = vtanh.f32 %v2646_v62  ;;  %v5145_v59 = vpop.f32.mrb[75].mxu0  ;;  %v4672_v29 = vmul.f32 -1.442695, %v2646_v62 }
0x2799   :  { %v5624_v16 = vpop.eup %5623 }
0x279a   :  { %2703 = vrot.lane.b32.xlu1 %v5624_v16, %s5790_s0 }
0x27a7   :  { %v2687_v10 = vpop.f32.mrb[72].mxu1 }
0x27a8   :  { %v2693_v21 = vadd.f32 %v2687_v10, %v6357_v42  ;;  %v5152_v26 = vpop.f32.mrb[73].mxu1 }
0x27a9   :  { %v2690_v9 = vpop.f32.mrb[74].mxu1 }
0x27aa   :  { %5625 = vtanh.f32 %v2693_v21  ;;  %v5153_v32 = vpop.f32.mrb[75].mxu1  ;;  %v4673_v43 = vmul.f32 -1.442695, %v2693_v21 }
0x27ab   :  { %5627 = vpow2.f32 %v4672_v29 }
0x27b4   :  { %v5626_v18 = vpop.eup %5625 }
0x27b5   :  { %2727 = vrot.lane.b32.xlu0 %v5626_v18, %s5790_s0  ;;  %v5628_v63 = vpop.eup %5627 }
0x27b6   :  { %v2697_v30 = vadd.f32 1.0, %v5628_v63 }
0x27b8   :  { %5629 = vrcp.f32 %v2697_v30 }
0x27b9   :  { %5631 = vpow2.f32 %v4673_v43 }
0x27c2   :  { %v5630_v35 = vpop.eup %5629 }
0x27c3   :  { %v5632_v42 = vpop.eup %5631  ;;  %v2701_v5 = vmul.f32 %v5630_v35, %v6570_v15 }
0x27c4   :  { %v2721_v38 = vadd.f32 1.0, %v5632_v42  ;;  %v2281_v42 = vrot.slane %v6503_v24, 4  ;;  %v1973_v24 = vrot.slane %v6429_v28, 4  ;;  %v5374_v28 = vld [vmem:[%s7208_s1 + $0x90] ss:$8 sps:$4 sm:$0xff]  }
0x27c6   :  { %5633 = vrcp.f32 %v2721_v38 }
0x27d0   :  { %v5634_v39 = vpop.eup %5633 }
0x27d1   :  { %v2725_v52 = vmul.f32 %v5634_v39, %v6575_v58 }
0x280c   :  { %v2704_v14 = vpop.permute.xlu1 %2703 }
0x280d   :  { %v2706_v60 = vmul.f32 %v5630_v35, %v2704_v14 }
0x280f   :  { %2708 = vrot.lane.b32.xlu1 %v2706_v60, %s5791_s22 }
0x2827   :  { %v2728_v44 = vpop.permute.xlu0 %2727 }
0x2828   :  { %v2730_v47 = vmul.f32 %v5634_v39, %v2728_v44 }
0x282a   :  { %2732 = vrot.lane.b32.xlu0 %v2730_v47, %s5791_s22  ;;  %v1826_v47 = vrot.slane %v6394_v40, 4  ;;  %v5376_v40 = vld [vmem:[%s7208_s1 + $0x94] ss:$8 sps:$4 sm:$0xff]  }
0x2881   :  { %v2709_v41 = vpop.permute.xlu1 %2708 }
0x2882   :  { %v2711_v23 = vadd.f32 %v2709_v41, %v2701_v5  ;;  %v5373_v41 = vld [vmem:[%s7208_s1 + $0x84] ss:$8 sps:$4 sm:$0xff]  }
0x2883   :  { %2986 = vmatprep.subr.bf16.mxu0 %v5373_v41 }
0x2884   :  { %5635 = vtanh.f32 %v2711_v23 }
0x288e   :  { %v5636_v48 = vpop.eup %5635 }
0x288f   :  { %2714 = vrot.lane.b32.xlu1 %v5636_v48, %s5790_s0 }
0x289c   :  { %v2733_v45 = vpop.permute.xlu0 %2732 }
0x289d   :  { %v6609_v50 = vadd.f32 %v2733_v45, %v2725_v52 }
0x289f   :  { %5637 = vtanh.f32 %v6609_v50 }
0x28a9   :  { %v5638_v51 = vpop.eup %5637 }
0x28aa   :  { %2738 = vrot.lane.b32.xlu0 %v5638_v51, %s5790_s0 }
0x2901   :  { %v2715_v57 = vpop.permute.xlu1 %2714 }
0x2902   :  { %v2717_v49 = vmul.f32 %v5630_v35, %v2715_v57 }
0x2904   :  { %v2742_v33 = vpack.c.bf16 %v2717_v49, %v2717_v49  ;;  %v5379_v49 = vld [vmem:[%s7208_s1 + $0xa4] ss:$8 sps:$4 sm:$0xff]  }
0x2906   :  { %2744 = vrot.lane.b32.xlu1 %v2742_v33, %s5791_s22  ;;  %v5377_v33 = vld [vmem:[%s7208_s1 + $0xa0] ss:$8 sps:$4 sm:$0xff]  }
0x291c   :  { %v2739_v46 = vpop.permute.xlu0 %2738 }
0x291d   :  { %v2741_v15 = vmul.f32 %v5634_v39, %v2739_v46  ;;  %v6674_v46 = vld [vmem:[%s7209_s2 + $0x40] sm:$0xff]  }
0x291f   :  { %v2748_v54 = vpack.c.bf16 %v2741_v15, %v2741_v15 }
0x2921   :  { %2801 = vrot.lane.b32.xlu0 %v2748_v54, %s5791_s22  ;;  %v2750_v60 = vrot.slane %v2748_v54, 4  ;;  %v5381_v54 = vld [vmem:[%s7208_s1 + $0xb0] ss:$8 sps:$4 sm:$0xff]  }
0x2978   :  { %v6615_v34 = vpop.permute.xlu1 %2744 }
0x2979   :  { %5159 = vmatmul.mubr.msk.bf16.vlgmr.msra.gmra.mrb[76].mxu0 %vm244_vm3, %v6615_v34 }
0x297a   :  { %3018 = vmatprep.mubr.bf16.mxu0 %v5788_v2 }
0x2993   :  { %v2802_v19 = vpop.permute.xlu0 %2801 }
0x2994   :  { %5167 = vmatmul.mubr.msk.bf16.vlgmr.msra.gmra.mrb[76].mxu1 %vm244_vm3, %v2802_v19  ;;  %v6688_v19 = vld [vmem:[%s7209_s2 + $0x48] sm:$0xff]  }
0x2995   :  { %5174 = vmatprep.mubr.msk.bf16.mxu1 %vm5789_vm0, %v5787_v1  ;;  %5171 = vmatpush3.bf16.msra.mxu1 %v6674_v46 }
0x2996   :  { %5172 = vmatprep.subr.bf16.mxu1 %v5787_v1 }
0x2999   :  { %5173 = vmatpush3.bf16.msra.mxu1 %v6688_v19 }
0x299a   :  { %5178 = vmatprep.subr.bf16.mxu1 %v5787_v1 }
0x299c   :  { %5175 = vmatmul.mubr.bf16.vlgmr.msra.gmra.mrb[80].mxu1 %v5788_v2 }
0x299d   :  { %5182 = vmatprep.mubr.msk.bf16.mxu1 %vm5789_vm0, %v5787_v1 }
0x2a4c   :  { %v2793_v58 = vpop.f32.mrb[76].mxu0 }
0x2a4d   :  { %v2799_v53 = vadd.f32 %v2793_v58, %v6380_v6  ;;  %v5160_v11 = vpop.f32.mrb[77].mxu0 }
0x2a4e   :  { %v2796_v8 = vpop.f32.mrb[78].mxu0 }
0x2a4f   :  { %5639 = vtanh.f32 %v2799_v53  ;;  %v5161_v27 = vpop.f32.mrb[79].mxu0  ;;  %v4676_v59 = vmul.f32 -1.442695, %v2799_v53 }
0x2a50   :  { %v2442_v27 = vrot.slane %v6542_v0, 4  ;;  %v6715_v0 = vld [vmem:[%s7209_s2 + $0x58] sm:$0xff]  }
0x2a59   :  { %v5640_v37 = vpop.eup %5639 }
0x2a5a   :  { %2856 = vrot.lane.b32.xlu1 %v5640_v37, %s5790_s0  ;;  %v2134_v37 = vrot.slane %v6468_v12, 4 }
0x2a67   :  { %v2840_v61 = vpop.f32.mrb[76].mxu1 }
0x2a68   :  { %v2846_v3 = vadd.f32 %v2840_v61, %v6353_v56  ;;  %v5168_v55 = vpop.f32.mrb[77].mxu1  ;;  %v2589_v61 = vrot.slane %v6579_v31, 4 }
0x2a69   :  { %v2843_v62 = vpop.f32.mrb[78].mxu1 }
0x2a6a   :  { %5641 = vtanh.f32 %v2846_v3  ;;  %v5169_v4 = vpop.f32.mrb[79].mxu1  ;;  %v4677_v10 = vmul.f32 -1.442695, %v2846_v3  ;;  %v6708_v3 = vld [vmem:[%s7209_s2 + $0x50] sm:$0xff]  }
0x2a6b   :  { %5643 = vpow2.f32 %v4676_v59  ;;  %5179 = vmatpush3.bf16.msra.mxu1 %v6708_v3 }
0x2a6c   :  { %5180 = vmatprep.subr.bf16.mxu1 %v5787_v1 }
0x2a6f   :  { %5181 = vmatpush3.bf16.msra.mxu1 %v6715_v0 }
0x2a70   :  { %5186 = vmatprep.subr.bf16.mxu1 %v5787_v1 }
0x2a72   :  { %5183 = vmatmul.mubr.bf16.vlgmr.msra.gmra.mrb[84].mxu1 %v5788_v2 }
0x2a73   :  { %5187 = vmatpush3.bf16.msra.mxu1 %v6674_v46  ;;  %5190 = vmatprep.mubr.msk.bf16.mxu1 %vm5789_vm0, %v5787_v1 }
0x2a74   :  { %v5642_v7 = vpop.eup %5641  ;;  %5188 = vmatprep.subr.bf16.mxu1 %v5787_v1 }
0x2a75   :  { %2880 = vrot.lane.b32.xlu0 %v5642_v7, %s5790_s0  ;;  %v5644_v6 = vpop.eup %5643 }
0x2a76   :  { %v2850_v16 = vadd.f32 1.0, %v5644_v6 }
0x2a77   :  { %5189 = vmatpush3.bf16.msra.mxu1 %v6688_v19 }
0x2a78   :  { %5645 = vrcp.f32 %v2850_v16  ;;  %5194 = vmatprep.subr.bf16.mxu1 %v5787_v1 }
0x2a79   :  { %5647 = vpow2.f32 %v4677_v10  ;;  %v3132_v10 = vpop.f32.mrb[80].mxu1 }
0x2a82   :  { %v5646_v21 = vpop.eup %5645 }
0x2a83   :  { %v5648_v56 = vpop.eup %5647  ;;  %v2854_v30 = vmul.f32 %v5646_v21, %v2711_v23 }
0x2a84   :  { %v2874_v32 = vadd.f32 1.0, %v5648_v56 }
0x2a86   :  { %5649 = vrcp.f32 %v2874_v32 }
0x2a90   :  { %v6628_v18 = vpop.eup %5649 }
0x2a91   :  { %v2878_v38 = vmul.f32 %v6628_v18, %v6609_v50 }
0x2acc   :  { %v2857_v26 = vpop.permute.xlu1 %2856 }
0x2acd   :  { %v2859_v9 = vmul.f32 %v5646_v21, %v2857_v26 }
0x2acf   :  { %2861 = vrot.lane.b32.xlu1 %v2859_v9, %s5791_s22 }
0x2ae7   :  { %v2881_v29 = vpop.permute.xlu0 %2880 }
0x2ae8   :  { %v2883_v63 = vmul.f32 %v6628_v18, %v2881_v29  ;;  %v4686_v29 = vld [vmem:[%s7211_s3 + $0x4] sm:$0x3] }
0x2aea   :  { %2885 = vrot.lane.b32.xlu0 %v2883_v63, %s5791_s22  ;;  %v2931_v63 = vrot.slane %v4686_v29, %v5939_v22 }
0x2b41   :  { %v2862_v43 = vpop.permute.xlu1 %2861 }
0x2b42   :  { %v2864_v35 = vadd.f32 %v2862_v43, %v2854_v30 }
0x2b44   :  { %5651 = vtanh.f32 %v2864_v35 }
0x2b4e   :  { %v5652_v14 = vpop.eup %5651 }
0x2b4f   :  { %2867 = vrot.lane.b32.xlu1 %v5652_v14, %s5790_s0 }
0x2b53   :  { %2751 = vrot.lane.b32.xlu1 %v2750_v60, %s5790_s0 }
0x2b57   :  { %2282 = vrot.lane.b32.xlu1 %v2281_v42, %s5791_s22 }
0x2b5b   :  { %2596 = vrot.lane.b32.xlu1 %v6583_v13, %s5790_s0  ;;  %v5371_v13 = vld [vmem:[%s7208_s1 + $0x80] ss:$8 sps:$4 sm:$0xff]  }
0x2b5c   :  { %v2886_v39 = vpop.permute.xlu0 %2885  ;;  %2987 = vmatpush1.bf16.msra.mxu0 %v5371_v13 }
0x2b5d   :  { %v2888_v44 = vadd.f32 %v2886_v39, %v2878_v38  ;;  %2988 = vmatprep.subr.bf16.mxu0 %v5376_v40 }
0x2b5f   :  { %5653 = vtanh.f32 %v2888_v44  ;;  %2288 = vrot.lane.b32.xlu1 %v6507_v25, %s5790_s0 }
0x2b60   :  { %2989 = vmatpush1.bf16.msra.mxu0 %v5374_v28 }
0x2b61   :  { %2990 = vmatprep.subr.bf16.mxu0 %v5379_v49 }
0x2b63   :  { %1827 = vrot.lane.b32.xlu1 %v1826_v47, %s5790_s0 }
0x2b64   :  { %2991 = vmatpush1.bf16.msra.mxu0 %v5377_v33 }
0x2b69   :  { %v5654_v5 = vpop.eup %5653 }
0x2b6a   :  { %2891 = vrot.lane.b32.xlu0 %v5654_v5, %s5790_s0 }
0x2b6e   :  { %1974 = vrot.lane.b32.xlu0 %v1973_v24, %s5791_s22 }
0x2bc1   :  { %v2868_v25 = vpop.permute.xlu1 %2867 }
0x2bc2   :  { %v2870_v23 = vmul.f32 %v5646_v21, %v2868_v25  ;;  %v5176_v21 = vpop.f32.mrb[81].mxu1 }
0x2bc3   :  { %v3135_v26 = vpop.f32.mrb[82].mxu1 }
0x2bc4   :  { %v2895_v48 = vpack.c.bf16 %v2870_v23, %v2870_v23  ;;  %v5177_v9 = vpop.f32.mrb[83].mxu1 }
0x2bc5   :  { %v2752_v52 = vpop.permute.xlu1 %2751  ;;  %v3186_v56 = vpop.f32.mrb[84].mxu1 }
0x2bc6   :  { %v2897_v45 = vrot.slane %v2895_v48, 4  ;;  %v5184_v32 = vpop.f32.mrb[85].mxu1 }
0x2bc8   :  { %2898 = vrot.lane.b32.xlu1 %v2897_v45, %s5791_s22 }
0x2bc9   :  { %v2283_v50 = vpop.permute.xlu1 %2282 }
0x2bca   :  { %2285 = vst.msk [vmem:[#allocation3 + $0x8] sm:$0xf0] %vm552_vm4, %v2283_v50 }
0x2bcd   :  { %v2597_v51 = vpop.permute.xlu1 %2596 }
0x2bce   :  { %2599 = vst.msk [vmem:[#allocation3 + $0x8] sm:$0xf] %vm559_vm5, %v2597_v51 }
0x2bd1   :  { %v2289_v57 = vpop.permute.xlu1 %2288 }
0x2bd2   :  { %2291 = vst.msk [vmem:[#allocation3 + $0x10] sm:$0xf] %vm559_vm5, %v2289_v57 }
0x2bd3   :  { %2439 = vst.msk [vmem:[#allocation3 + $0x10] sm:$0xf] %vm396_vm2, %v6546_v17  ;;  %v5383_v17 = vld [vmem:[%s7208_s1 + $0xb4] ss:$8 sps:$4 sm:$0xff]  }
0x2bd4   :  { %2992 = vmatprep.subr.bf16.mxu0 %v5383_v17 }
0x2bd5   :  { %v1828_v15 = vpop.permute.xlu1 %1827  ;;  %2993 = vmatpush1.bf16.msra.mxu0 %v5381_v54 }
0x2bd6   :  { %1830 = vst.msk [vmem:[#allocation3 + $0x18] sm:$0xf0] %vm404_vm6, %v1828_v15  ;;  %5210 = vmatprep.subr.bf16.mxu0 %v5787_v1 }
0x2bdc   :  { %v2892_v58 = vpop.permute.xlu0 %2891 }
0x2bdd   :  { %v2894_v53 = vmul.f32 %v6628_v18, %v2892_v58 }
0x2bdf   :  { %v2902_v11 = vpack.c.bf16 %v2894_v53, %v2894_v53 }
0x2be0   :  { %v1975_v8 = vpop.permute.xlu0 %1974 }
0x2be1   :  { %1977 = vst.msk [vmem:[#allocation3] sm:$0xf0] %vm552_vm4, %v1975_v8  ;;  %2904 = vrot.lane.b32.xlu0 %v2902_v11, %s5790_s0 }
0x2be2   :  { %2754 = vst.msk [vmem:[#allocation3] sm:$0xf0] %vm404_vm6, %v2752_v52 }
0x2be5   :  { %2443 = vrot.lane.b32.xlu0 %v2442_v27, %s5790_s0 }
0x2be9   :  { %2135 = vrot.lane.b32.xlu0 %v2134_v37, %s5790_s0 }
0x2bed   :  { %2590 = vrot.lane.b32.xlu0 %v2589_v61, %s5791_s22 }
0x2bf1   :  { %1980 = vrot.lane.b32.xlu0 %v6433_v36, %s5790_s0 }
0x2c3a   :  { %v2899_v12 = vpop.permute.xlu1 %2898 }
0x2c3b   :  { %2901 = vst.msk [vmem:[#allocation3 + $0x18] sm:$0xf0] %vm552_vm4, %v2899_v12 }
0x2c53   :  { %v2905_v36 = vpop.permute.xlu0 %2904 }
0x2c54   :  { %2907 = vst.msk [vmem:[#allocation3] sm:$0xf] %vm559_vm5, %v2905_v36 }
0x2c57   :  { %v2444_v31 = vpop.permute.xlu0 %2443 }
0x2c58   :  { %2446 = vst.msk [vmem:[#allocation3 + $0x8] sm:$0xf0] %vm404_vm6, %v2444_v31 }
0x2c5b   :  { %v2136_v55 = vpop.permute.xlu0 %2135  ;;  %v2908_v62 = vld [vmem:[#allocation3] sm:$0xff] }
0x2c5c   :  { %2138 = vst.msk [vmem:[#allocation3 + $0x10] sm:$0xf0] %vm404_vm6, %v2136_v55  ;;  %4695 = vmatmul.mubr.msk.bf16.vlgmr.msra.gmra.mrb[80].mxu0 %vm120_vm1, %v2908_v62 }
0x2c5d   :  { %3028 = vmatprep.mubr.bf16.mxu0 %v5788_v2  ;;  %5211 = vmatpush3.bf16.msra.mxu0 %v6708_v3 }
0x2c5e   :  { %5212 = vmatprep.subr.bf16.mxu0 %v5787_v1 }
0x2c5f   :  { %v2591_v4 = vpop.permute.xlu0 %2590  ;;  %v2909_v59 = vld [vmem:[#allocation3 + $0x8] sm:$0xff] }
0x2c60   :  { %2593 = vst.msk [vmem:[#allocation3 + $0x10] sm:$0xf0] %vm552_vm4, %v2591_v4 }
0x2c61   :  { %5213 = vmatpush3.bf16.msra.mxu0 %v6715_v0 }
0x2c62   :  { %5226 = vmatprep.subr.bf16.mxu0 %v5787_v1 }
0x2c63   :  { %v1981_v7 = vpop.permute.xlu0 %1980 }
0x2c64   :  { %1983 = vst.msk [vmem:[#allocation3 + $0x18] sm:$0xf] %vm559_vm5, %v1981_v7  ;;  %4696 = vmatmul.mubr.msk.bf16.gmra.mrb[84].mxu0 %vm120_vm1, %v2909_v59 }
0x2c65   :  { %2747 = vst.msk [vmem:[#allocation3 + $0x18] sm:$0xf] %vm396_vm2, %v6615_v34  ;;  %3038 = vmatprep.mubr.bf16.mxu0 %v5788_v2  ;;  %v3189_v34 = vpop.f32.mrb[86].mxu1 }
0x2c66   :  { %v5185_v18 = vpop.f32.mrb[87].mxu1 }
0x2c67   :  { %v2910_v6 = vld [vmem:[#allocation3 + $0x10] sm:$0xff] }
0x2c6c   :  { %4697 = vmatmul.mubr.msk.bf16.gmra.mrb[88].mxu0 %vm120_vm1, %v2910_v6  ;;  %v2911_v16 = vld [vmem:[#allocation3 + $0x18] sm:$0xff] }
0x2c6d   :  { %3048 = vmatprep.mubr.bf16.mxu0 %v5788_v2  ;;  %v2927_v2 = vrot.slane %v4686_v29, %v5934_v20 }
0x2c74   :  { %4698 = vmatmul.mubr.msk.bf16.gmra.mrb[92].mxu0 %vm120_vm1, %v2911_v16 }
0x2c75   :  { %5214 = vmatprep.mubr.msk.bf16.mxu0 %vm5789_vm0, %v5787_v1 }
0x2d2f   :  { %v3020_v30 = vpop.f32.mrb[80].mxu0 }
0x2d30   :  { %v3021_v43 = vadd.f32 %v3020_v30, %v2927_v2  ;;  %v3022_v35 = vpop.f32.mrb[81].mxu0 }
0x2d31   :  { %v6755_v14 = vadd.f32 %v3022_v35, %v2931_v63  ;;  %v3024_v60 = vpop.f32.mrb[82].mxu0 }
0x2d32   :  { %v6757_v42 = vadd.f32 %v3024_v60, %v2927_v2  ;;  %v3138_v38 = vadd.f32 %v3132_v10, %v3021_v43  ;;  %v3026_v39 = vpop.f32.mrb[83].mxu0 }
0x2d33   :  { %v6759_v44 = vadd.f32 %v3026_v39, %v2931_v63 }
0x2d34   :  { %5655 = vtanh.f32 %v3138_v38  ;;  %v4711_v37 = vmul.f32 -1.442695, %v3138_v38 }
0x2d37   :  { %v3030_v47 = vpop.f32.mrb[84].mxu0 }
0x2d38   :  { %v6761_v5 = vadd.f32 %v3030_v47, %v2927_v2  ;;  %v3032_v24 = vpop.f32.mrb[85].mxu0 }
0x2d39   :  { %v6763_v20 = vadd.f32 %v3032_v24, %v2931_v63  ;;  %v3034_v22 = vpop.f32.mrb[86].mxu0 }
0x2d3a   :  { %v6765_v13 = vadd.f32 %v3034_v22, %v2927_v2  ;;  %v3036_v41 = vpop.f32.mrb[87].mxu0 }
0x2d3b   :  { %v6767_v40 = vadd.f32 %v3036_v41, %v2931_v63 }
0x2d3e   :  { %v5656_v28 = vpop.eup %5655 }
0x2d3f   :  { %v3040_v25 = vpop.f32.mrb[88].mxu0  ;;  %3202 = vrot.lane.b32.xlu0 %v5656_v28, %s5790_s0 }
0x2d40   :  { %v6770_v23 = vadd.f32 %v3040_v25, %v2927_v2  ;;  %v3042_v48 = vpop.f32.mrb[89].mxu0 }
0x2d41   :  { %v6772_v52 = vadd.f32 %v3042_v48, %v2931_v63  ;;  %v3044_v45 = vpop.f32.mrb[90].mxu0 }
0x2d42   :  { %v6774_v50 = vadd.f32 %v3044_v45, %v2927_v2  ;;  %v3046_v51 = vpop.f32.mrb[91].mxu0 }
0x2d43   :  { %v6776_v57 = vadd.f32 %v3046_v51, %v2931_v63 }
0x2d47   :  { %v3050_v49 = vpop.f32.mrb[92].mxu0 }
0x2d48   :  { %v6778_v33 = vadd.f32 %v3050_v49, %v2927_v2  ;;  %v3052_v15 = vpop.f32.mrb[93].mxu0 }
0x2d49   :  { %v6780_v17 = vadd.f32 %v3052_v15, %v2931_v63  ;;  %v3054_v54 = vpop.f32.mrb[94].mxu0 }
0x2d4a   :  { %v6782_v58 = vadd.f32 %v3054_v54, %v2927_v2  ;;  %v3056_v53 = vpop.f32.mrb[95].mxu0 }
0x2d4b   :  { %v3057_v11 = vadd.f32 %v3056_v53, %v2931_v63 }
0x2d4d   :  { %v3192_v8 = vadd.f32 %v3186_v56, %v3057_v11 }
0x2d4f   :  { %5657 = vtanh.f32 %v3192_v8  ;;  %v4712_v36 = vmul.f32 -1.442695, %v3192_v8 }
0x2d50   :  { %5659 = vpow2.f32 %v4711_v37 }
0x2d59   :  { %v5658_v27 = vpop.eup %5657 }
0x2d5a   :  { %3226 = vrot.lane.b32.xlu1 %v5658_v27, %s5790_s0  ;;  %v5660_v61 = vpop.eup %5659 }
0x2d5b   :  { %v3196_v12 = vadd.f32 1.0, %v5660_v61 }
0x2d5d   :  { %5661 = vrcp.f32 %v3196_v12 }
0x2d5e   :  { %5663 = vpow2.f32 %v4712_v36 }
0x2d67   :  { %v5662_v31 = vpop.eup %5661 }
0x2d68   :  { %v5664_v4 = vpop.eup %5663  ;;  %v3200_v10 = vmul.f32 0.0, %v5662_v31 }
0x2d69   :  { %v3220_v7 = vadd.f32 1.0, %v5664_v4 }
0x2d6b   :  { %5665 = vrcp.f32 %v3220_v7 }
0x2d75   :  { %v5666_v59 = vpop.eup %5665 }
0x2d76   :  { %v3224_v56 = vmul.f32 0.0, %v5666_v59 }
0x2db1   :  { %v3203_v55 = vpop.permute.xlu0 %3202 }
0x2db2   :  { %v3205_v62 = vmul.f32 %v5662_v31, %v3203_v55 }
0x2db4   :  { %3207 = vrot.lane.b32.xlu0 %v3205_v62, %s5791_s22 }
0x2dcc   :  { %v3227_v6 = vpop.permute.xlu1 %3226 }
0x2dcd   :  { %v3229_v16 = vmul.f32 %v5666_v59, %v3227_v6 }
0x2dcf   :  { %3231 = vrot.lane.b32.xlu1 %v3229_v16, %s5791_s22 }
0x2e26   :  { %v3208_v21 = vpop.permute.xlu0 %3207 }
0x2e27   :  { %v6787_v26 = vadd.f32 %v3208_v21, %v3200_v10 }
0x2e29   :  { %5667 = vtanh.f32 %v6787_v26 }
0x2e33   :  { %v5668_v9 = vpop.eup %5667 }
0x2e34   :  { %3213 = vrot.lane.b32.xlu0 %v5668_v9, %s5790_s0 }
0x2e41   :  { %v3232_v32 = vpop.permute.xlu1 %3231 }
0x2e42   :  { %v6791_v34 = vadd.f32 %v3232_v32, %v3224_v56 }
0x2e44   :  { %5669 = vtanh.f32 %v6791_v34 }
0x2e4e   :  { %v5670_v18 = vpop.eup %5669 }
0x2e4f   :  { %3237 = vrot.lane.b32.xlu1 %v5670_v18, %s5790_s0 }
0x2ea6   :  { %v3214_v29 = vpop.permute.xlu0 %3213 }
0x2ea7   :  { %v6795_v2 = vmul.f32 %v5662_v31, %v3214_v29 }
0x2ea9   :  { %v3253_v63 = vpack.c.bf16 %v6795_v2, %v6795_v2 }
0x2eab   :  { %3255 = vrot.lane.b32.xlu0 %v3253_v63, %s5791_s22 }
0x2ec1   :  { %v3238_v30 = vpop.permute.xlu1 %3237 }
0x2ec2   :  { %v6800_v43 = vmul.f32 %v5666_v59, %v3238_v30 }
0x2ec4   :  { %v3302_v35 = vpack.c.bf16 %v6800_v43, %v6800_v43 }
0x2ec6   :  { %3304 = vrot.lane.b32.xlu1 %v3302_v35, %s5791_s22 }
0x2f1d   :  { %v3256_v60 = vpop.permute.xlu0 %3255 }
0x2f1e   :  { %5191 = vmatmul.mubr.msk.bf16.vlgmr.msra.gmra.mrb[88].mxu1 %vm244_vm3, %v3256_v60 }
0x2f1f   :  { %5195 = vmatpush3.bf16.msra.mxu1 %v6708_v3  ;;  %5198 = vmatprep.mubr.msk.bf16.mxu1 %vm5789_vm0, %v5787_v1 }
0x2f20   :  { %5196 = vmatprep.subr.bf16.mxu1 %v5787_v1 }
0x2f23   :  { %5197 = vmatpush3.bf16.msra.mxu1 %v6715_v0 }
0x2f24   :  { %5202 = vmatprep.subr.bf16.mxu1 %v5787_v1 }
0x2f38   :  { %v3305_v38 = vpop.permute.xlu1 %3304 }
0x2f39   :  { %5199 = vmatmul.mubr.msk.bf16.vlgmr.msra.gmra.mrb[92].mxu1 %vm244_vm3, %v3305_v38 }
0x2f3a   :  { %5203 = vmatpush3.bf16.msra.mxu1 %v6674_v46  ;;  %5206 = vmatprep.mubr.msk.bf16.mxu1 %vm5789_vm0, %v5787_v1 }
0x2f3b   :  { %5204 = vmatprep.subr.bf16.mxu1 %v5787_v1 }
0x2f3e   :  { %5205 = vmatpush3.bf16.msra.mxu1 %v6688_v19 }
0x2f3f   :  { %5218 = vmatprep.subr.bf16.mxu1 %v5787_v1 }
0x2ff1   :  { %v3294_v39 = vpop.f32.mrb[88].mxu1 }
0x2ff2   :  { %v3300_v47 = vadd.f32 %v3294_v39, %v6757_v42  ;;  %v5192_v24 = vpop.f32.mrb[89].mxu1 }
0x2ff3   :  { %v3297_v22 = vpop.f32.mrb[90].mxu1 }
0x2ff4   :  { %5671 = vtanh.f32 %v3300_v47  ;;  %v5193_v41 = vpop.f32.mrb[91].mxu1  ;;  %v4715_v54 = vmul.f32 -1.442695, %v3300_v47 }
0x2ffe   :  { %v5672_v28 = vpop.eup %5671 }
0x2fff   :  { %3359 = vrot.lane.b32.xlu0 %v5672_v28, %s5790_s0 }
0x300c   :  { %v3343_v25 = vpop.f32.mrb[92].mxu1 }
0x300d   :  { %v3349_v48 = vadd.f32 %v3343_v25, %v6780_v17  ;;  %v5200_v45 = vpop.f32.mrb[93].mxu1 }
0x300e   :  { %v3346_v51 = vpop.f32.mrb[94].mxu1 }
0x300f   :  { %5673 = vtanh.f32 %v3349_v48  ;;  %v5201_v49 = vpop.f32.mrb[95].mxu1  ;;  %v4716_v11 = vmul.f32 -1.442695, %v3349_v48 }
0x3010   :  { %5675 = vpow2.f32 %v4715_v54 }
0x3019   :  { %v5674_v15 = vpop.eup %5673 }
0x301a   :  { %3383 = vrot.lane.b32.xlu1 %v5674_v15, %s5790_s0  ;;  %v5676_v42 = vpop.eup %5675 }
0x301b   :  { %v3353_v53 = vadd.f32 1.0, %v5676_v42 }
0x301d   :  { %5677 = vrcp.f32 %v3353_v53 }
0x301e   :  { %5679 = vpow2.f32 %v4716_v11 }
0x3027   :  { %v5678_v8 = vpop.eup %5677 }
0x3028   :  { %v5680_v17 = vpop.eup %5679  ;;  %v3357_v55 = vmul.f32 %v5678_v8, %v6787_v26 }
0x3029   :  { %v3377_v61 = vadd.f32 1.0, %v5680_v17 }
0x302b   :  { %5681 = vrcp.f32 %v3377_v61 }
0x3035   :  { %v5682_v12 = vpop.eup %5681 }
0x3036   :  { %v3381_v59 = vmul.f32 %v5682_v12, %v6791_v34 }
0x3071   :  { %v3360_v27 = vpop.permute.xlu0 %3359 }
0x3072   :  { %v3362_v37 = vmul.f32 %v5678_v8, %v3360_v27 }
0x3074   :  { %3364 = vrot.lane.b32.xlu0 %v3362_v37, %s5791_s22 }
0x308c   :  { %v3384_v36 = vpop.permute.xlu1 %3383 }
0x308d   :  { %v3386_v31 = vmul.f32 %v5682_v12, %v3384_v36 }
0x308f   :  { %3388 = vrot.lane.b32.xlu1 %v3386_v31, %s5791_s22 }
0x30e6   :  { %v3365_v62 = vpop.permute.xlu0 %3364 }
0x30e7   :  { %v6826_v4 = vadd.f32 %v3365_v62, %v3357_v55 }
0x30e9   :  { %5683 = vtanh.f32 %v6826_v4 }
0x30f3   :  { %v5684_v7 = vpop.eup %5683 }
0x30f4   :  { %3370 = vrot.lane.b32.xlu0 %v5684_v7, %s5790_s0 }
0x3101   :  { %v3389_v6 = vpop.permute.xlu1 %3388 }
0x3102   :  { %v6831_v16 = vadd.f32 %v3389_v6, %v3381_v59 }
0x3104   :  { %5685 = vtanh.f32 %v6831_v16 }
0x310e   :  { %v5686_v10 = vpop.eup %5685 }
0x310f   :  { %3394 = vrot.lane.b32.xlu1 %v5686_v10, %s5790_s0 }
0x3166   :  { %v3371_v21 = vpop.permute.xlu0 %3370 }
0x3167   :  { %v6835_v26 = vmul.f32 %v5678_v8, %v3371_v21 }
0x3169   :  { %v3409_v9 = vpack.c.bf16 %v6835_v26, %v6835_v26 }
0x316b   :  { %3411 = vrot.lane.b32.xlu0 %v3409_v9, %s5791_s22 }
0x3181   :  { %v3395_v56 = vpop.permute.xlu1 %3394 }
0x3182   :  { %v6840_v32 = vmul.f32 %v5682_v12, %v3395_v56 }
0x3184   :  { %v3458_v34 = vpack.c.bf16 %v6840_v32, %v6840_v32 }
0x3186   :  { %3460 = vrot.lane.b32.xlu1 %v3458_v34, %s5791_s22 }
0x31dd   :  { %v3412_v18 = vpop.permute.xlu0 %3411 }
0x31de   :  { %5207 = vmatmul.mubr.msk.bf16.vlgmr.msra.gmra.mrb[96].mxu1 %vm244_vm3, %v3412_v18 }
0x31df   :  { %5219 = vmatpush3.bf16.msra.mxu1 %v6674_v46  ;;  %5222 = vmatprep.mubr.msk.bf16.mxu1 %vm5789_vm0, %v5787_v1 }
0x31e0   :  { %5220 = vmatprep.subr.bf16.mxu1 %v5787_v1 }
0x31e3   :  { %5221 = vmatpush3.bf16.msra.mxu1 %v6688_v19 }
0x31e4   :  { %5234 = vmatprep.subr.bf16.mxu1 %v5787_v1 }
0x31f8   :  { %v3461_v29 = vpop.permute.xlu1 %3460 }
0x31f9   :  { %5215 = vmatmul.mubr.msk.bf16.vlgmr.msra.gmra.mrb[96].mxu0 %vm244_vm3, %v3461_v29 }
0x31fa   :  { %5227 = vmatpush3.bf16.msra.mxu0 %v6708_v3  ;;  %5230 = vmatprep.mubr.msk.bf16.mxu0 %vm5789_vm0, %v5787_v1 }
0x31fb   :  { %5228 = vmatprep.subr.bf16.mxu0 %v5787_v1 }
0x31fe   :  { %5229 = vmatpush3.bf16.msra.mxu0 %v6715_v0 }
0x31ff   :  { %5242 = vmatprep.subr.bf16.mxu0 %v5787_v1 }
0x32b1   :  { %v3450_v63 = vpop.f32.mrb[96].mxu1 }
0x32b2   :  { %v3456_v30 = vadd.f32 %v3450_v63, %v6761_v5  ;;  %v5208_v35 = vpop.f32.mrb[97].mxu1 }
0x32b3   :  { %v3453_v60 = vpop.f32.mrb[98].mxu1 }
0x32b4   :  { %5687 = vtanh.f32 %v3456_v30  ;;  %v5209_v38 = vpop.f32.mrb[99].mxu1  ;;  %v4719_v48 = vmul.f32 -1.442695, %v3456_v30 }
0x32be   :  { %v5688_v39 = vpop.eup %5687 }
0x32bf   :  { %3515 = vrot.lane.b32.xlu0 %v5688_v39, %s5790_s0 }
0x32cc   :  { %v3499_v47 = vpop.f32.mrb[96].mxu0 }
0x32cd   :  { %v3505_v24 = vadd.f32 %v3499_v47, %v6776_v57  ;;  %v5216_v22 = vpop.f32.mrb[97].mxu0 }
0x32ce   :  { %v3502_v41 = vpop.f32.mrb[98].mxu0 }
0x32cf   :  { %5689 = vtanh.f32 %v3505_v24  ;;  %v5217_v28 = vpop.f32.mrb[99].mxu0  ;;  %v4720_v51 = vmul.f32 -1.442695, %v3505_v24 }
0x32d0   :  { %5691 = vpow2.f32 %v4719_v48 }
0x32d9   :  { %v5690_v25 = vpop.eup %5689 }
0x32da   :  { %3539 = vrot.lane.b32.xlu1 %v5690_v25, %s5790_s0  ;;  %v5692_v5 = vpop.eup %5691 }
0x32db   :  { %v3509_v45 = vadd.f32 1.0, %v5692_v5 }
0x32dd   :  { %5693 = vrcp.f32 %v3509_v45 }
0x32de   :  { %5695 = vpow2.f32 %v4720_v51 }
0x32e7   :  { %v5694_v49 = vpop.eup %5693 }
0x32e8   :  { %v5696_v57 = vpop.eup %5695  ;;  %v3513_v27 = vmul.f32 %v5694_v49, %v6826_v4 }
0x32e9   :  { %v3533_v42 = vadd.f32 1.0, %v5696_v57 }
0x32eb   :  { %5697 = vrcp.f32 %v3533_v42 }
0x32f5   :  { %v5698_v53 = vpop.eup %5697 }
0x32f6   :  { %v3537_v12 = vmul.f32 %v5698_v53, %v6831_v16 }
0x3331   :  { %v3516_v15 = vpop.permute.xlu0 %3515 }
0x3332   :  { %v3518_v54 = vmul.f32 %v5694_v49, %v3516_v15 }
0x3334   :  { %3520 = vrot.lane.b32.xlu0 %v3518_v54, %s5791_s22 }
0x334c   :  { %v3540_v11 = vpop.permute.xlu1 %3539 }
0x334d   :  { %v3542_v8 = vmul.f32 %v5698_v53, %v3540_v11 }
0x334f   :  { %3544 = vrot.lane.b32.xlu1 %v3542_v8, %s5791_s22 }
0x33a6   :  { %v3521_v37 = vpop.permute.xlu0 %3520 }
0x33a7   :  { %v6866_v17 = vadd.f32 %v3521_v37, %v3513_v27 }
0x33a9   :  { %5699 = vtanh.f32 %v6866_v17 }
0x33b3   :  { %v5700_v61 = vpop.eup %5699 }
0x33b4   :  { %3526 = vrot.lane.b32.xlu0 %v5700_v61, %s5790_s0 }
0x33c1   :  { %v3545_v36 = vpop.permute.xlu1 %3544 }
0x33c2   :  { %v6871_v31 = vadd.f32 %v3545_v36, %v3537_v12 }
0x33c4   :  { %5701 = vtanh.f32 %v6871_v31 }
0x33ce   :  { %v5702_v55 = vpop.eup %5701 }
0x33cf   :  { %3550 = vrot.lane.b32.xlu1 %v5702_v55, %s5790_s0 }
0x3426   :  { %v3527_v62 = vpop.permute.xlu0 %3526 }
0x3427   :  { %v6875_v4 = vmul.f32 %v5694_v49, %v3527_v62 }
0x3429   :  { %v3565_v7 = vpack.c.bf16 %v6875_v4, %v6875_v4 }
0x342b   :  { %3567 = vrot.lane.b32.xlu0 %v3565_v7, %s5791_s22 }
0x3441   :  { %v3551_v59 = vpop.permute.xlu1 %3550 }
0x3442   :  { %v6880_v6 = vmul.f32 %v5698_v53, %v3551_v59 }
0x3444   :  { %v3614_v16 = vpack.c.bf16 %v6880_v6, %v6880_v6 }
0x3446   :  { %3616 = vrot.lane.b32.xlu1 %v3614_v16, %s5791_s22 }
0x349d   :  { %v3568_v10 = vpop.permute.xlu0 %3567 }
0x349e   :  { %5223 = vmatmul.mubr.msk.bf16.vlgmr.msra.gmra.mrb[100].mxu1 %vm244_vm3, %v3568_v10 }
0x349f   :  { %5235 = vmatpush3.bf16.msra.mxu1 %v6674_v46  ;;  %5238 = vmatprep.mubr.msk.bf16.mxu1 %vm5789_vm0, %v5787_v1 }
0x34a0   :  { %5236 = vmatprep.subr.bf16.mxu1 %v5787_v1 }
0x34a3   :  { %5237 = vmatpush3.bf16.msra.mxu1 %v6688_v19 }
0x34a4   :  { %5250 = vmatprep.subr.bf16.mxu1 %v5787_v1 }
0x34b8   :  { %v3617_v21 = vpop.permute.xlu1 %3616 }
0x34b9   :  { %5231 = vmatmul.mubr.msk.bf16.vlgmr.msra.gmra.mrb[100].mxu0 %vm244_vm3, %v3617_v21 }
0x34ba   :  { %5243 = vmatpush3.bf16.msra.mxu0 %v6708_v3  ;;  %5246 = vmatprep.mubr.msk.bf16.mxu0 %vm5789_vm0, %v5787_v1 }
0x34bb   :  { %5244 = vmatprep.subr.bf16.mxu0 %v5787_v1 }
0x34be   :  { %5245 = vmatpush3.bf16.msra.mxu0 %v6715_v0 }
0x34bf   :  { %5258 = vmatprep.subr.bf16.mxu0 %v5787_v1 }
0x3571   :  { %v3606_v9 = vpop.f32.mrb[100].mxu1 }
0x3572   :  { %v3612_v56 = vadd.f32 %v3606_v9, %v6765_v13  ;;  %v5224_v34 = vpop.f32.mrb[101].mxu1 }
0x3573   :  { %v3609_v18 = vpop.f32.mrb[102].mxu1 }
0x3574   :  { %5703 = vtanh.f32 %v3612_v56  ;;  %v5225_v29 = vpop.f32.mrb[103].mxu1  ;;  %v4723_v24 = vmul.f32 -1.442695, %v3612_v56 }
0x357e   :  { %v5704_v63 = vpop.eup %5703 }
0x357f   :  { %3671 = vrot.lane.b32.xlu0 %v5704_v63, %s5790_s0 }
0x358c   :  { %v3655_v30 = vpop.f32.mrb[100].mxu0 }
0x358d   :  { %v3661_v35 = vadd.f32 %v3655_v30, %v6772_v52  ;;  %v5232_v60 = vpop.f32.mrb[101].mxu0 }
0x358e   :  { %v3658_v38 = vpop.f32.mrb[102].mxu0 }
0x358f   :  { %5705 = vtanh.f32 %v3661_v35  ;;  %v5233_v39 = vpop.f32.mrb[103].mxu0  ;;  %v4724_v41 = vmul.f32 -1.442695, %v3661_v35 }
0x3590   :  { %5707 = vpow2.f32 %v4723_v24 }
0x3599   :  { %v5706_v47 = vpop.eup %5705 }
0x359a   :  { %3695 = vrot.lane.b32.xlu1 %v5706_v47, %s5790_s0  ;;  %v5708_v13 = vpop.eup %5707 }
0x359b   :  { %v3665_v22 = vadd.f32 1.0, %v5708_v13 }
0x359d   :  { %5709 = vrcp.f32 %v3665_v22 }
0x359e   :  { %5711 = vpow2.f32 %v4724_v41 }
0x35a7   :  { %v5710_v28 = vpop.eup %5709 }
0x35a8   :  { %v5712_v52 = vpop.eup %5711  ;;  %v3669_v15 = vmul.f32 %v5710_v28, %v6866_v17 }
0x35a9   :  { %v3689_v5 = vadd.f32 1.0, %v5712_v52 }
0x35ab   :  { %5713 = vrcp.f32 %v3689_v5 }
0x35b5   :  { %v5714_v45 = vpop.eup %5713 }
0x35b6   :  { %v3693_v53 = vmul.f32 %v5714_v45, %v6871_v31 }
0x35f1   :  { %v3672_v25 = vpop.permute.xlu0 %3671 }
0x35f2   :  { %v3674_v48 = vmul.f32 %v5710_v28, %v3672_v25 }
0x35f4   :  { %3676 = vrot.lane.b32.xlu0 %v3674_v48, %s5791_s22 }
0x360c   :  { %v3696_v51 = vpop.permute.xlu1 %3695 }
0x360d   :  { %v3698_v49 = vmul.f32 %v5714_v45, %v3696_v51 }
0x360f   :  { %3700 = vrot.lane.b32.xlu1 %v3698_v49, %s5791_s22 }
0x3666   :  { %v3677_v54 = vpop.permute.xlu0 %3676 }
0x3667   :  { %v6906_v57 = vadd.f32 %v3677_v54, %v3669_v15 }
0x3669   :  { %5715 = vtanh.f32 %v6906_v57 }
0x3673   :  { %v5716_v42 = vpop.eup %5715 }
0x3674   :  { %3682 = vrot.lane.b32.xlu0 %v5716_v42, %s5790_s0 }
0x3681   :  { %v3701_v11 = vpop.permute.xlu1 %3700 }
0x3682   :  { %v6911_v8 = vadd.f32 %v3701_v11, %v3693_v53 }
0x3684   :  { %5717 = vtanh.f32 %v6911_v8 }
0x368e   :  { %v5718_v27 = vpop.eup %5717 }
0x368f   :  { %3706 = vrot.lane.b32.xlu1 %v5718_v27, %s5790_s0 }
0x36e6   :  { %v3683_v37 = vpop.permute.xlu0 %3682 }
0x36e7   :  { %v6915_v17 = vmul.f32 %v5710_v28, %v3683_v37 }
0x36e9   :  { %v3721_v61 = vpack.c.bf16 %v6915_v17, %v6915_v17 }
0x36eb   :  { %3723 = vrot.lane.b32.xlu0 %v3721_v61, %s5791_s22 }
0x3701   :  { %v3707_v12 = vpop.permute.xlu1 %3706 }
0x3702   :  { %v6920_v36 = vmul.f32 %v5714_v45, %v3707_v12 }
0x3704   :  { %v3770_v31 = vpack.c.bf16 %v6920_v36, %v6920_v36 }
0x3706   :  { %3772 = vrot.lane.b32.xlu1 %v3770_v31, %s5791_s22 }
0x375d   :  { %v3724_v55 = vpop.permute.xlu0 %3723 }
0x375e   :  { %5239 = vmatmul.mubr.msk.bf16.vlgmr.msra.gmra.mrb[104].mxu1 %vm244_vm3, %v3724_v55 }
0x375f   :  { %5251 = vmatpush3.bf16.msra.mxu1 %v6674_v46  ;;  %5254 = vmatprep.mubr.msk.bf16.mxu1 %vm5789_vm0, %v5787_v1 }
0x3760   :  { %5252 = vmatprep.subr.bf16.mxu1 %v5787_v1 }
0x3763   :  { %5253 = vmatpush3.bf16.msra.mxu1 %v6688_v19 }
0x3764   :  { %5266 = vmatprep.subr.bf16.mxu1 %v5787_v1 }
0x3778   :  { %v3773_v62 = vpop.permute.xlu1 %3772 }
0x3779   :  { %5247 = vmatmul.mubr.msk.bf16.vlgmr.msra.gmra.mrb[104].mxu0 %vm244_vm3, %v3773_v62 }
0x377a   :  { %5259 = vmatpush3.bf16.msra.mxu0 %v6708_v3  ;;  %5262 = vmatprep.mubr.msk.bf16.mxu0 %vm5789_vm0, %v5787_v1 }
0x377b   :  { %5260 = vmatprep.subr.bf16.mxu0 %v5787_v1 }
0x377e   :  { %5261 = vmatpush3.bf16.msra.mxu0 %v6715_v0 }
0x377f   :  { %5274 = vmatprep.subr.bf16.mxu0 %v5787_v1 }
0x3831   :  { %v3762_v7 = vpop.f32.mrb[104].mxu1 }
0x3832   :  { %v3768_v59 = vadd.f32 %v3762_v7, %v6770_v23  ;;  %v5240_v16 = vpop.f32.mrb[105].mxu1 }
0x3833   :  { %v3765_v10 = vpop.f32.mrb[106].mxu1 }
0x3834   :  { %5719 = vtanh.f32 %v3768_v59  ;;  %v5241_v21 = vpop.f32.mrb[107].mxu1  ;;  %v4727_v35 = vmul.f32 -1.442695, %v3768_v59 }
0x383e   :  { %v5720_v9 = vpop.eup %5719 }
0x383f   :  { %3827 = vrot.lane.b32.xlu0 %v5720_v9, %s5790_s0 }
0x384c   :  { %v3811_v56 = vpop.f32.mrb[104].mxu0 }
0x384d   :  { %v3817_v34 = vadd.f32 %v3811_v56, %v6767_v40  ;;  %v5248_v18 = vpop.f32.mrb[105].mxu0 }
0x384e   :  { %v3814_v29 = vpop.f32.mrb[106].mxu0 }
0x384f   :  { %5721 = vtanh.f32 %v3817_v34  ;;  %v5249_v63 = vpop.f32.mrb[107].mxu0  ;;  %v4728_v38 = vmul.f32 -1.442695, %v3817_v34 }
0x3850   :  { %5723 = vpow2.f32 %v4727_v35 }
0x3859   :  { %v5722_v30 = vpop.eup %5721 }
0x385a   :  { %3851 = vrot.lane.b32.xlu1 %v5722_v30, %s5790_s0  ;;  %v5724_v23 = vpop.eup %5723 }
0x385b   :  { %v3821_v60 = vadd.f32 1.0, %v5724_v23 }
0x385d   :  { %5725 = vrcp.f32 %v3821_v60 }
0x385e   :  { %5727 = vpow2.f32 %v4728_v38 }
0x3867   :  { %v5726_v39 = vpop.eup %5725 }
0x3868   :  { %v5728_v40 = vpop.eup %5727  ;;  %v3825_v25 = vmul.f32 %v5726_v39, %v6906_v57 }
0x3869   :  { %v3845_v13 = vadd.f32 1.0, %v5728_v40 }
0x386b   :  { %5729 = vrcp.f32 %v3845_v13 }
0x3875   :  { %v5730_v22 = vpop.eup %5729 }
0x3876   :  { %v3849_v45 = vmul.f32 %v5730_v22, %v6911_v8 }
0x38b1   :  { %v3828_v47 = vpop.permute.xlu0 %3827 }
0x38b2   :  { %v3830_v24 = vmul.f32 %v5726_v39, %v3828_v47 }
0x38b4   :  { %3832 = vrot.lane.b32.xlu0 %v3830_v24, %s5791_s22 }
0x38cc   :  { %v3852_v41 = vpop.permute.xlu1 %3851 }
0x38cd   :  { %v3854_v28 = vmul.f32 %v5730_v22, %v3852_v41 }
0x38cf   :  { %3856 = vrot.lane.b32.xlu1 %v3854_v28, %s5791_s22 }
0x3926   :  { %v3833_v48 = vpop.permute.xlu0 %3832 }
0x3927   :  { %v6946_v52 = vadd.f32 %v3833_v48, %v3825_v25 }
0x3929   :  { %5731 = vtanh.f32 %v6946_v52 }
0x3933   :  { %v5732_v5 = vpop.eup %5731 }
0x3934   :  { %3838 = vrot.lane.b32.xlu0 %v5732_v5, %s5790_s0 }
0x3941   :  { %v3857_v51 = vpop.permute.xlu1 %3856 }
0x3942   :  { %v6951_v49 = vadd.f32 %v3857_v51, %v3849_v45 }
0x3944   :  { %5733 = vtanh.f32 %v6951_v49 }
0x394e   :  { %v5734_v15 = vpop.eup %5733 }
0x394f   :  { %3862 = vrot.lane.b32.xlu1 %v5734_v15, %s5790_s0 }
0x39a6   :  { %v3839_v54 = vpop.permute.xlu0 %3838 }
0x39a7   :  { %v6955_v57 = vmul.f32 %v5726_v39, %v3839_v54 }
0x39a9   :  { %v3877_v42 = vpack.c.bf16 %v6955_v57, %v6955_v57 }
0x39ab   :  { %3879 = vrot.lane.b32.xlu0 %v3877_v42, %s5791_s22 }
0x39c1   :  { %v3863_v53 = vpop.permute.xlu1 %3862 }
0x39c2   :  { %v6960_v11 = vmul.f32 %v5730_v22, %v3863_v53 }
0x39c4   :  { %v3926_v8 = vpack.c.bf16 %v6960_v11, %v6960_v11 }
0x39c6   :  { %3928 = vrot.lane.b32.xlu1 %v3926_v8, %s5791_s22 }
0x3a1d   :  { %v3880_v27 = vpop.permute.xlu0 %3879 }
0x3a1e   :  { %5255 = vmatmul.mubr.msk.bf16.vlgmr.msra.gmra.mrb[108].mxu1 %vm244_vm3, %v3880_v27 }
0x3a1f   :  { %5267 = vmatpush3.bf16.msra.mxu1 %v6674_v46  ;;  %5270 = vmatprep.mubr.msk.bf16.mxu1 %vm5789_vm0, %v5787_v1 }
0x3a20   :  { %5268 = vmatprep.subr.bf16.mxu1 %v5787_v1 }
0x3a23   :  { %5269 = vmatpush3.bf16.msra.mxu1 %v6688_v19 }
0x3a24   :  { %5282 = vmatprep.subr.bf16.mxu1 %v5787_v1 }
0x3a38   :  { %v3929_v37 = vpop.permute.xlu1 %3928 }
0x3a39   :  { %5263 = vmatmul.mubr.msk.bf16.vlgmr.msra.gmra.mrb[108].mxu0 %vm244_vm3, %v3929_v37 }
0x3a3a   :  { %5275 = vmatpush3.bf16.msra.mxu0 %v6708_v3  ;;  %5278 = vmatprep.mubr.msk.bf16.mxu0 %vm5789_vm0, %v5787_v1 }
0x3a3b   :  { %5276 = vmatprep.subr.bf16.mxu0 %v5787_v1 }
0x3a3e   :  { %5277 = vmatpush3.bf16.msra.mxu0 %v6715_v0 }
0x3a3f   :  { %5290 = vmatprep.subr.bf16.mxu0 %v5787_v1 }
0x3af1   :  { %v3918_v61 = vpop.f32.mrb[108].mxu1 }
0x3af2   :  { %v3924_v12 = vadd.f32 %v3918_v61, %v6774_v50  ;;  %v5256_v31 = vpop.f32.mrb[109].mxu1 }
0x3af3   :  { %v3921_v55 = vpop.f32.mrb[110].mxu1 }
0x3af4   :  { %5735 = vtanh.f32 %v3924_v12  ;;  %v5257_v62 = vpop.f32.mrb[111].mxu1  ;;  %v4731_v34 = vmul.f32 -1.442695, %v3924_v12 }
0x3afe   :  { %v5736_v7 = vpop.eup %5735 }
0x3aff   :  { %3983 = vrot.lane.b32.xlu0 %v5736_v7, %s5790_s0 }
0x3b0c   :  { %v3967_v59 = vpop.f32.mrb[108].mxu0 }
0x3b0d   :  { %v3973_v16 = vadd.f32 %v3967_v59, %v6763_v20  ;;  %v5264_v10 = vpop.f32.mrb[109].mxu0 }
0x3b0e   :  { %v3970_v21 = vpop.f32.mrb[110].mxu0 }
0x3b0f   :  { %5737 = vtanh.f32 %v3973_v16  ;;  %v5265_v9 = vpop.f32.mrb[111].mxu0  ;;  %v4732_v29 = vmul.f32 -1.442695, %v3973_v16 }
0x3b10   :  { %5739 = vpow2.f32 %v4731_v34 }
0x3b19   :  { %v5738_v56 = vpop.eup %5737 }
0x3b1a   :  { %4007 = vrot.lane.b32.xlu1 %v5738_v56, %s5790_s0  ;;  %v5740_v50 = vpop.eup %5739 }
0x3b1b   :  { %v3977_v18 = vadd.f32 1.0, %v5740_v50 }
0x3b1d   :  { %5741 = vrcp.f32 %v3977_v18 }
0x3b1e   :  { %5743 = vpow2.f32 %v4732_v29 }
0x3b27   :  { %v5742_v63 = vpop.eup %5741 }
0x3b28   :  { %v5744_v20 = vpop.eup %5743  ;;  %v3981_v47 = vmul.f32 %v5742_v63, %v6946_v52 }
0x3b29   :  { %v4001_v23 = vadd.f32 1.0, %v5744_v20 }
0x3b2b   :  { %5745 = vrcp.f32 %v4001_v23 }
0x3b35   :  { %v5746_v60 = vpop.eup %5745 }
0x3b36   :  { %v4005_v22 = vmul.f32 %v5746_v60, %v6951_v49 }
0x3b71   :  { %v3984_v30 = vpop.permute.xlu0 %3983 }
0x3b72   :  { %v3986_v35 = vmul.f32 %v5742_v63, %v3984_v30 }
0x3b74   :  { %3988 = vrot.lane.b32.xlu0 %v3986_v35, %s5791_s22 }
0x3b8c   :  { %v4008_v38 = vpop.permute.xlu1 %4007 }
0x3b8d   :  { %v4010_v39 = vmul.f32 %v5746_v60, %v4008_v38 }
0x3b8f   :  { %4012 = vrot.lane.b32.xlu1 %v4010_v39, %s5791_s22 }
0x3be6   :  { %v3989_v24 = vpop.permute.xlu0 %3988 }
0x3be7   :  { %v6986_v40 = vadd.f32 %v3989_v24, %v3981_v47 }
0x3be9   :  { %5747 = vtanh.f32 %v6986_v40 }
0x3bf3   :  { %v5748_v13 = vpop.eup %5747 }
0x3bf4   :  { %3994 = vrot.lane.b32.xlu0 %v5748_v13, %s5790_s0 }
0x3c01   :  { %v4013_v41 = vpop.permute.xlu1 %4012 }
0x3c02   :  { %v6991_v28 = vadd.f32 %v4013_v41, %v4005_v22 }
0x3c04   :  { %5749 = vtanh.f32 %v6991_v28 }
0x3c0e   :  { %v5750_v25 = vpop.eup %5749 }
0x3c0f   :  { %4018 = vrot.lane.b32.xlu1 %v5750_v25, %s5790_s0 }
0x3c66   :  { %v3995_v48 = vpop.permute.xlu0 %3994 }
0x3c67   :  { %v6995_v52 = vmul.f32 %v5742_v63, %v3995_v48 }
0x3c69   :  { %v4033_v5 = vpack.c.bf16 %v6995_v52, %v6995_v52 }
0x3c6b   :  { %4035 = vrot.lane.b32.xlu0 %v4033_v5, %s5791_s22 }
0x3c81   :  { %v4019_v45 = vpop.permute.xlu1 %4018 }
0x3c82   :  { %v7000_v51 = vmul.f32 %v5746_v60, %v4019_v45 }
0x3c84   :  { %v4082_v49 = vpack.c.bf16 %v7000_v51, %v7000_v51 }
0x3c86   :  { %4084 = vrot.lane.b32.xlu1 %v4082_v49, %s5791_s22 }
0x3cdd   :  { %v4036_v15 = vpop.permute.xlu0 %4035 }
0x3cde   :  { %5271 = vmatmul.mubr.msk.bf16.vlgmr.msra.gmra.mrb[112].mxu1 %vm244_vm3, %v4036_v15 }
0x3cdf   :  { %5283 = vmatpush3.bf16.msra.mxu1 %v6674_v46  ;;  %5286 = vmatprep.mubr.msk.bf16.mxu1 %vm5789_vm0, %v5787_v1 }
0x3ce0   :  { %5284 = vmatprep.subr.bf16.mxu1 %v5787_v1 }
0x3ce3   :  { %5285 = vmatpush3.bf16.msra.mxu1 %v6688_v19 }
0x3ce4   :  { %5298 = vmatprep.subr.bf16.mxu1 %v5787_v1 }
0x3cf8   :  { %v4085_v54 = vpop.permute.xlu1 %4084 }
0x3cf9   :  { %5279 = vmatmul.mubr.msk.bf16.vlgmr.msra.gmra.mrb[112].mxu0 %vm244_vm3, %v4085_v54 }
0x3cfa   :  { %5291 = vmatpush3.bf16.msra.mxu0 %v6708_v3  ;;  %5294 = vmatprep.mubr.msk.bf16.mxu0 %vm5789_vm0, %v5787_v1 }
0x3cfb   :  { %5292 = vmatprep.subr.bf16.mxu0 %v5787_v1 }
0x3cfe   :  { %5293 = vmatpush3.bf16.msra.mxu0 %v6715_v0 }
0x3cff   :  { %5318 = vmatprep.subr.bf16.mxu0 %v5787_v1 }
0x3db1   :  { %v4074_v46 = vpop.f32.mrb[112].mxu1 }
0x3db2   :  { %v4080_v42 = vadd.f32 %v4074_v46, %v6778_v33  ;;  %v5272_v19 = vpop.f32.mrb[113].mxu1 }
0x3db3   :  { %v4077_v53 = vpop.f32.mrb[114].mxu1 }
0x3db4   :  { %5751 = vtanh.f32 %v4080_v42  ;;  %v5273_v8 = vpop.f32.mrb[115].mxu1  ;;  %v4735_v55 = vmul.f32 -1.442695, %v4080_v42 }
0x3dbe   :  { %v5752_v27 = vpop.eup %5751 }
0x3dbf   :  { %4139 = vrot.lane.b32.xlu0 %v5752_v27, %s5790_s0 }
0x3dcc   :  { %v4123_v3 = vpop.f32.mrb[112].mxu0 }
0x3dcd   :  { %v4129_v37 = vadd.f32 %v4123_v3, %v6759_v44  ;;  %v5280_v61 = vpop.f32.mrb[113].mxu0 }
0x3dce   :  { %v4126_v12 = vpop.f32.mrb[114].mxu0 }
0x3dcf   :  { %5753 = vtanh.f32 %v4129_v37  ;;  %v5281_v31 = vpop.f32.mrb[115].mxu0  ;;  %v4736_v7 = vmul.f32 -1.442695, %v4129_v37 }
0x3dd0   :  { %5755 = vpow2.f32 %v4735_v55 }
0x3dd9   :  { %v5754_v0 = vpop.eup %5753 }
0x3dda   :  { %4163 = vrot.lane.b32.xlu1 %v5754_v0, %s5790_s0  ;;  %v5756_v33 = vpop.eup %5755 }
0x3ddb   :  { %v4133_v62 = vadd.f32 1.0, %v5756_v33 }
0x3ddd   :  { %5757 = vrcp.f32 %v4133_v62 }
0x3dde   :  { %5759 = vpow2.f32 %v4736_v7 }
0x3de7   :  { %v5758_v59 = vpop.eup %5757 }
0x3de8   :  { %v5760_v44 = vpop.eup %5759  ;;  %v4137_v50 = vmul.f32 %v5758_v59, %v6986_v40 }
0x3de9   :  { %v4157_v21 = vadd.f32 1.0, %v5760_v44 }
0x3deb   :  { %5761 = vrcp.f32 %v4157_v21 }
0x3df5   :  { %v5762_v9 = vpop.eup %5761 }
0x3df6   :  { %v4161_v30 = vmul.f32 %v5762_v9, %v6991_v28 }
0x3e31   :  { %v4140_v16 = vpop.permute.xlu0 %4139 }
0x3e32   :  { %v4142_v10 = vmul.f32 %v5758_v59, %v4140_v16 }
0x3e34   :  { %4144 = vrot.lane.b32.xlu0 %v4142_v10, %s5791_s22 }
0x3e4c   :  { %v4164_v56 = vpop.permute.xlu1 %4163 }
0x3e4d   :  { %v4166_v34 = vmul.f32 %v5762_v9, %v4164_v56  ;;  %v5388_v56 = vld [vmem:[%s7212_s4 + $0x8] sm:$0xff]  }
0x3e4f   :  { %4168 = vrot.lane.b32.xlu1 %v4166_v34, %s5791_s22  ;;  %v5389_v34 = vld [vmem:[%s7212_s4 + $0x10] sm:$0xff]  }
0x3ea6   :  { %v4145_v18 = vpop.permute.xlu0 %4144 }
0x3ea7   :  { %v4147_v29 = vadd.f32 %v4145_v18, %v4137_v50 }
0x3ea9   :  { %5763 = vtanh.f32 %v4147_v29 }
0x3eb3   :  { %v5764_v63 = vpop.eup %5763 }
0x3eb4   :  { %4150 = vrot.lane.b32.xlu0 %v5764_v63, %s5790_s0  ;;  %v5391_v63 = vld [vmem:[%s7212_s4 + $0x20] sm:$0xff]  }
0x3ec1   :  { %v4169_v35 = vpop.permute.xlu1 %4168 }
0x3ec2   :  { %v4171_v20 = vadd.f32 %v4169_v35, %v4161_v30  ;;  %v5392_v30 = vld [vmem:[%s7212_s4 + $0x28] sm:$0xff]   ;;  %v5393_v35 = vld [vmem:[%s7212_s4 + $0x30] sm:$0xff]  }
0x3ec4   :  { %5765 = vtanh.f32 %v4171_v20 }
0x3ece   :  { %v5766_v23 = vpop.eup %5765 }
0x3ecf   :  { %4174 = vrot.lane.b32.xlu1 %v5766_v23, %s5790_s0 }
0x3f26   :  { %v4151_v60 = vpop.permute.xlu0 %4150 }
0x3f27   :  { %v7029_v38 = vmul.f32 %v5758_v59, %v4151_v60 }
0x3f29   :  { %v4189_v39 = vpack.c.bf16 %v7029_v38, %v7029_v38 }
0x3f2b   :  { %4191 = vrot.lane.b32.xlu0 %v4189_v39, %s5791_s22 }
0x3f41   :  { %v4175_v47 = vpop.permute.xlu1 %4174 }
0x3f42   :  { %v7034_v24 = vmul.f32 %v5762_v9, %v4175_v47  ;;  %v5387_v9 = vld [vmem:[%s7212_s4] sm:$0xff]  }
0x3f44   :  { %v4238_v40 = vpack.c.bf16 %v7034_v24, %v7034_v24 }
0x3f46   :  { %4240 = vrot.lane.b32.xlu1 %v4238_v40, %s5791_s22 }
0x3f9d   :  { %v4192_v13 = vpop.permute.xlu0 %4191 }
0x3f9e   :  { %5287 = vmatmul.mubr.msk.bf16.vlgmr.msra.gmra.mrb[116].mxu1 %vm244_vm3, %v4192_v13 }
0x3f9f   :  { %5314 = vmatprep.mubr.msk.bf16.mxu1 %vm5789_vm0, %v5787_v1  ;;  %5299 = vmatpush3.bf16.msra.mxu1 %v5387_v9 }
0x3fa0   :  { %5300 = vmatprep.subr.bf16.mxu1 %v5787_v1 }
0x3fa3   :  { %5301 = vmatpush3.bf16.msra.mxu1 %v5388_v56 }
0x3fa4   :  { %5302 = vmatprep.subr.bf16.mxu1 %v5787_v1 }
0x3fa7   :  { %5303 = vmatpush3.bf16.msra.mxu1 %v5389_v34 }
0x3fa8   :  { %5304 = vmatprep.subr.bf16.mxu1 %v5787_v1 }
0x3fb8   :  { %v4241_v22 = vpop.permute.xlu1 %4240 }
0x3fb9   :  { %5295 = vmatmul.mubr.msk.bf16.vlgmr.msra.gmra.mrb[116].mxu0 %vm244_vm3, %v4241_v22 }
0x3fba   :  { %5326 = vmatprep.mubr.msk.bf16.mxu0 %vm5789_vm0, %v5787_v1 }
0x4071   :  { %v4230_v41 = vpop.f32.mrb[116].mxu1 }
0x4072   :  { %v4236_v28 = vadd.f32 %v4230_v41, %v6782_v58  ;;  %v5288_v25 = vpop.f32.mrb[117].mxu1 }
0x4073   :  { %v4233_v48 = vpop.f32.mrb[118].mxu1 }
0x4074   :  { %5767 = vtanh.f32 %v4236_v28  ;;  %v5289_v5 = vpop.f32.mrb[119].mxu1  ;;  %v4739_v53 = vmul.f32 -1.442695, %v4236_v28 }
0x407e   :  { %v5768_v45 = vpop.eup %5767 }
0x407f   :  { %4295 = vrot.lane.b32.xlu0 %v5768_v45, %s5790_s0  ;;  %v5397_v45 = vld [vmem:[%s7213_s6 + $0x10] sm:$0xff]  }
0x408c   :  { %v4279_v49 = vpop.f32.mrb[116].mxu0 }
0x408d   :  { %v4285_v15 = vadd.f32 %v4279_v49, %v6755_v14  ;;  %v5296_v54 = vpop.f32.mrb[117].mxu0  ;;  %v5398_v49 = vld [vmem:[%s7213_s6 + $0x18] sm:$0xff]  }
0x408e   :  { %v4282_v46 = vpop.f32.mrb[118].mxu0 }
0x408f   :  { %5769 = vtanh.f32 %v4285_v15  ;;  %v5297_v42 = vpop.f32.mrb[119].mxu0  ;;  %v4740_v27 = vmul.f32 -1.442695, %v4285_v15  ;;  %v4741_v15 = vld [vmem:[%s7215_s5] ss:$0 sm:$0xff] }
0x4090   :  { %5771 = vpow2.f32 %v4739_v53 }
0x4099   :  { %v5770_v19 = vpop.eup %5769 }
0x409a   :  { %4319 = vrot.lane.b32.xlu1 %v5770_v19, %s5790_s0  ;;  %v5772_v58 = vpop.eup %5771 }
0x409b   :  { %v4289_v8 = vadd.f32 1.0, %v5772_v58 }
0x409d   :  { %5773 = vrcp.f32 %v4289_v8 }
0x409e   :  { %5775 = vpow2.f32 %v4740_v27 }
0x40a7   :  { %v5774_v3 = vpop.eup %5773 }
0x40a8   :  { %v5776_v14 = vpop.eup %5775  ;;  %v4293_v33 = vmul.f32 %v5774_v3, %v4147_v29  ;;  %v5390_v29 = vld [vmem:[%s7212_s4 + $0x18] sm:$0xff]  }
0x40a9   :  { %v4313_v12 = vadd.f32 1.0, %v5776_v14  ;;  %5305 = vmatpush3.bf16.msra.mxu1 %v5390_v29 }
0x40aa   :  { %5306 = vmatprep.subr.bf16.mxu1 %v5787_v1 }
0x40ab   :  { %5777 = vrcp.f32 %v4313_v12 }
0x40ad   :  { %5307 = vmatpush3.bf16.msra.mxu1 %v5391_v63 }
0x40ae   :  { %5308 = vmatprep.subr.bf16.mxu1 %v5787_v1 }
0x40b1   :  { %5309 = vmatpush3.bf16.msra.mxu1 %v5392_v30 }
0x40b2   :  { %5310 = vmatprep.subr.bf16.mxu1 %v5787_v1 }
0x40b5   :  { %v5778_v31 = vpop.eup %5777  ;;  %5311 = vmatpush3.bf16.msra.mxu1 %v5393_v35 }
0x40b6   :  { %v4317_v16 = vmul.f32 %v5778_v31, %v4171_v20  ;;  %5312 = vmatprep.subr.bf16.mxu1 %v5787_v1 }
0x40f1   :  { %v4296_v37 = vpop.permute.xlu0 %4295 }
0x40f2   :  { %v4298_v61 = vmul.f32 %v5774_v3, %v4296_v37 }
0x40f4   :  { %4300 = vrot.lane.b32.xlu0 %v4298_v61, %s5791_s22 }
0x410c   :  { %v4320_v0 = vpop.permute.xlu1 %4319 }
0x410d   :  { %v4322_v55 = vmul.f32 %v5778_v31, %v4320_v0 }
0x410f   :  { %4324 = vrot.lane.b32.xlu1 %v4322_v55, %s5791_s22 }
0x4166   :  { %v4301_v62 = vpop.permute.xlu0 %4300 }
0x4167   :  { %v4303_v7 = vadd.f32 %v4301_v62, %v4293_v33 }
0x4169   :  { %5779 = vtanh.f32 %v4303_v7 }
0x4173   :  { %v5780_v59 = vpop.eup %5779 }
0x4174   :  { %4306 = vrot.lane.b32.xlu0 %v5780_v59, %s5790_s0 }
0x4181   :  { %v4325_v10 = vpop.permute.xlu1 %4324 }
0x4182   :  { %v4327_v44 = vadd.f32 %v4325_v10, %v4317_v16 }
0x4184   :  { %5781 = vtanh.f32 %v4327_v44 }
0x418e   :  { %v5782_v21 = vpop.eup %5781 }
0x418f   :  { %4330 = vrot.lane.b32.xlu1 %v5782_v21, %s5790_s0 }
0x41e6   :  { %v4307_v50 = vpop.permute.xlu0 %4306 }
0x41e7   :  { %v4309_v18 = vmul.f32 %v5774_v3, %v4307_v50 }
0x41e9   :  { %4335 = vrot.lane.b32.xlu0 %v4309_v18, %s5791_s22 }
0x41ed   :  { %4345 = vrot.lane.b32.xlu0 %v4303_v7, %s5791_s22 }
0x41f1   :  { %3242 = vrot.lane.b32.xlu0 %v6795_v2, %s5791_s22  ;;  %v5394_v2 = vld [vmem:[%s7212_s4 + $0x38] sm:$0xff]  }
0x41f2   :  { %5313 = vmatpush3.bf16.msra.mxu1 %v5394_v2 }
0x41f5   :  { %3399 = vrot.lane.b32.xlu0 %v6835_v26, %s5791_s22 }
0x41f9   :  { %3555 = vrot.lane.b32.xlu0 %v6875_v4, %s5791_s22  ;;  %v5395_v4 = vld [vmem:[%s7213_s6] sm:$0xff]  }
0x41fa   :  { %5319 = vmatpush3.bf16.msra.mxu0 %v5395_v4 }
0x41fb   :  { %5320 = vmatprep.subr.bf16.mxu0 %v5787_v1 }
0x41fd   :  { %3711 = vrot.lane.b32.xlu0 %v6915_v17, %s5791_s22  ;;  %v5396_v17 = vld [vmem:[%s7213_s6 + $0x8] sm:$0xff]  }
0x41fe   :  { %5321 = vmatpush3.bf16.msra.mxu0 %v5396_v17 }
0x41ff   :  { %5322 = vmatprep.subr.bf16.mxu0 %v5787_v1 }
0x4201   :  { %v4331_v20 = vpop.permute.xlu1 %4330  ;;  %3867 = vrot.lane.b32.xlu0 %v6955_v57, %s5791_s22 }
0x4202   :  { %v4333_v26 = vmul.f32 %v5778_v31, %v4331_v20  ;;  %5323 = vmatpush3.bf16.msra.mxu0 %v5397_v45 }
0x4203   :  { %5324 = vmatprep.subr.bf16.mxu0 %v5787_v1  ;;  %v4750_v1 = vld [vmem:[%s7216_s7] ss:$0 sm:$0xff] }
0x4204   :  { %4340 = vrot.lane.b32.xlu1 %v4333_v26, %s5790_s0 }
0x4205   :  { %4023 = vrot.lane.b32.xlu0 %v6995_v52, %s5791_s22 }
0x4206   :  { %5325 = vmatpush3.bf16.msra.mxu0 %v5398_v49 }
0x4208   :  { %4349 = vrot.lane.b32.xlu1 %v4327_v44, %s5790_s0 }
0x4209   :  { %4179 = vrot.lane.b32.xlu0 %v7029_v38, %s5791_s22 }
0x420c   :  { %3247 = vrot.lane.b32.xlu1 %v6800_v43, %s5790_s0 }
0x4210   :  { %3404 = vrot.lane.b32.xlu1 %v6840_v32, %s5790_s0 }
0x4214   :  { %3560 = vrot.lane.b32.xlu1 %v6880_v6, %s5790_s0 }
0x4218   :  { %3716 = vrot.lane.b32.xlu1 %v6920_v36, %s5790_s0 }
0x421c   :  { %3872 = vrot.lane.b32.xlu1 %v6960_v11, %s5790_s0 }
0x4220   :  { %4028 = vrot.lane.b32.xlu1 %v7000_v51, %s5790_s0 }
0x4224   :  { %4184 = vrot.lane.b32.xlu1 %v7034_v24, %s5790_s0 }
0x425b   :  { %v4336_v43 = vpop.permute.xlu0 %4335 }
0x425f   :  { %v4346_v32 = vpop.permute.xlu0 %4345 }
0x4263   :  { %v3243_v6 = vpop.permute.xlu0 %3242 }
0x4264   :  { %3245 = vst.msk [vmem:[%s7214_s8] sm:$0xff] %vm244_vm3, %v3243_v6 }
0x4267   :  { %v3400_v36 = vpop.permute.xlu0 %3399 }
0x4268   :  { %3402 = vst.msk [vmem:[%s7214_s8 + $0x8] sm:$0xff] %vm244_vm3, %v3400_v36 }
0x426b   :  { %v3556_v57 = vpop.permute.xlu0 %3555 }
0x426c   :  { %3558 = vst.msk [vmem:[%s7214_s8 + $0x10] sm:$0xff] %vm244_vm3, %v3556_v57 }
0x426f   :  { %v3712_v11 = vpop.permute.xlu0 %3711 }
0x4270   :  { %3714 = vst.msk [vmem:[%s7214_s8 + $0x18] sm:$0xff] %vm244_vm3, %v3712_v11 }
0x4273   :  { %v3868_v51 = vpop.permute.xlu0 %3867 }
0x4276   :  { %v4341_v52 = vpop.permute.xlu1 %4340 }
0x4277   :  { %4343 = vst.msk [vmem:[%s7214_s8] sm:$0xff] %vm3250_vm7, %v4341_v52  ;;  %v4352_v23 = vsel %vm244_vm3, %v4336_v43, %v4341_v52  ;;  %v4024_v24 = vpop.permute.xlu0 %4023 }
0x4278   :  { %v4353_v38 = vsel %vm120_vm1, %v4352_v23, %v4346_v32 }
0x427a   :  { %v4350_v60 = vpop.permute.xlu1 %4349 }
0x427b   :  { %v4355_v39 = vsel %vm4354_vm8, %v4353_v38, %v4350_v60  ;;  %v4180_v22 = vpop.permute.xlu0 %4179 }
0x427c   :  { %v4356_v47 = vpack.c.bf16 %v4355_v39, %v4355_v39 }
0x427e   :  { %v3248_v40 = vpop.permute.xlu1 %3247  ;;  %5315 = vmatmul.mubr.bf16.vlgmr.msra.gmra.mrb[120].mxu1 %v4356_v47 }
0x427f   :  { %3251 = vst.msk [vmem:[%s7214_s8 + $0x38] sm:$0xff] %vm3250_vm7, %v3248_v40 }
0x4280   :  { %4338 = vst.msk [vmem:[%s7214_s8 + $0x38] sm:$0xff] %vm244_vm3, %v4336_v43 }
0x4282   :  { %v3405_v13 = vpop.permute.xlu1 %3404 }
0x4283   :  { %3407 = vst.msk [vmem:[%s7214_s8 + $0x30] sm:$0xff] %vm3250_vm7, %v3405_v13 }
0x4284   :  { %4182 = vst.msk [vmem:[%s7214_s8 + $0x30] sm:$0xff] %vm244_vm3, %v4180_v22 }
0x4286   :  { %v3561_v41 = vpop.permute.xlu1 %3560 }
0x4287   :  { %3563 = vst.msk [vmem:[%s7214_s8 + $0x28] sm:$0xff] %vm3250_vm7, %v3561_v41 }
0x4288   :  { %4026 = vst.msk [vmem:[%s7214_s8 + $0x28] sm:$0xff] %vm244_vm3, %v4024_v24 }
0x428a   :  { %v3717_v28 = vpop.permute.xlu1 %3716 }
0x428b   :  { %3719 = vst.msk [vmem:[%s7214_s8 + $0x20] sm:$0xff] %vm3250_vm7, %v3717_v28 }
0x428c   :  { %3870 = vst.msk [vmem:[%s7214_s8 + $0x20] sm:$0xff] %vm244_vm3, %v3868_v51 }
0x428e   :  { %v3873_v25 = vpop.permute.xlu1 %3872 }
0x428f   :  { %3875 = vst.msk [vmem:[%s7214_s8 + $0x18] sm:$0xff] %vm3250_vm7, %v3873_v25 }
0x4292   :  { %v4029_v48 = vpop.permute.xlu1 %4028 }
0x4293   :  { %4031 = vst.msk [vmem:[%s7214_s8 + $0x10] sm:$0xff] %vm3250_vm7, %v4029_v48 }
0x4296   :  { %v4185_v5 = vpop.permute.xlu1 %4184 }
0x4297   :  { %4187 = vst.msk [vmem:[%s7214_s8 + $0x8] sm:$0xff] %vm3250_vm7, %v4185_v5 }
0x4351   :  { %v4462_v54 = vpop.f32.mrb[120].mxu1 }
0x4352   :  { %v4463_v46 = vadd.f32 %v4741_v15, %v4462_v54  ;;  %v5316_v42 = vpop.f32.mrb[121].mxu1 }
0x4353   :  { %v4465_v19 = vpop.f32.mrb[122].mxu1 }
0x4354   :  { %v4468_v53 = vmax.f32 %v4463_v46, 0.0  ;;  %v5317_v58 = vpop.f32.mrb[123].mxu1 }
0x4356   :  { %v4469_v8 = vpack.c.bf16 %v4468_v53, %v4468_v53 }
0x4358   :  { %5327 = vmatmul.mubr.msk.bf16.vlgmr.msra.gmra.mrb[120].mxu0 %vm120_vm1, %v4469_v8 }
0x442b   :  { %v4546_v27 = vpop.f32.mrb[120].mxu0 }
0x442c   :  { %v4547_v3 = vadd.f32 %v4750_v1, %v4546_v27  ;;  %v5328_v37 = vpop.f32.mrb[121].mxu0 }
0x442d   :  { %v4549_v61 = vpop.f32.mrb[122].mxu0 }
0x442e   :  { %4552 = vst.msk [vmem:[%s7217_s9] sm:$0xff] %vm120_vm1, %v4547_v3  ;;  %v5329_v14 = vpop.f32.mrb[123].mxu0 }

</bundles_post_ra>
